<compile_context>
chip_gen: v7x
topology: tpu7x:2x2x1
jax: 0.10.0
libtpu: 0.0.40
codegen_flags: <defaults>
</compile_context>

<pallas_src>
import functools
import math

import jax
import jax.numpy as jnp
from jax import lax
from jax.experimental import pallas as pl
from jax.experimental.pallas import tpu as pltpu


# ----------------------------- in-kernel helpers -----------------------------

def _layernorm(x, w, b, eps=1e-5):
    mu = jnp.mean(x, axis=-1, keepdims=True)
    var = jnp.mean((x - mu) ** 2, axis=-1, keepdims=True)
    return (x - mu) * lax.rsqrt(var + eps) * w + b


def _erf(x):
    # Abramowitz & Stegun 7.1.26 (max abs err ~1.5e-7 -> float32-exact).
    a1, a2, a3, a4, a5 = 0.254829592, -0.284496736, 1.421413741, -1.453152027, 1.061405429
    p = 0.3275911
    s = jnp.where(x >= 0.0, 1.0, -1.0)
    ax = jnp.abs(x)
    t = 1.0 / (1.0 + p * ax)
    poly = ((((a5 * t + a4) * t + a3) * t + a2) * t + a1) * t
    return s * (1.0 - poly * jnp.exp(-ax * ax))


def _gelu_exact(x):
    # matches torch.nn.GELU() default (erf form)
    return 0.5 * x * (1.0 + _erf(x * 0.7071067811865476))


# Packed small-param row layout (rows of the (L, 8, W) array)
_ROW_LN1W, _ROW_LN1B, _ROW_BQKV, _ROW_BP, _ROW_LN2W, _ROW_LN2B, _ROW_B1, _ROW_B2 = range(8)


# ------------------------------ fused Pallas kernel ---------------------------

def _fused_blocks_kernel(x_ref, small_ref, wqkv_ref, wp_ref, w1_ref, w2_ref,
                         o_ref, *, n_head):
    """All transformer blocks for one batch tile.

    grid = (B/Bt, num_layers); batch tile is 'parallel', layer is 'arbitrary'.
    The output block (Bt, T, E) is resident in VMEM across the layer axis and
    used as the activation accumulator (aliased to the x input in HBM):
    initialized from x at layer 0, updated every layer, written back to HBM
    only when the batch-tile index changes.
    """
    layer = pl.program_id(1)

    @pl.when(layer == 0)
    def _():
        o_ref[...] = x_ref[...]

    xb = o_ref[...]                        # (Bt, T, E) f32, resident across layers
    Bt, T, E = xb.shape
    M = Bt * T
    D = E // n_head
    H4 = w1_ref.shape[-1]

    x = xb.reshape(M, E)

    # --- small per-layer params: one packed (8, W) f32 window, static slices ---
    sp = small_ref[0]
    ln1_w = sp[_ROW_LN1W:_ROW_LN1W + 1, :E]
    ln1_b = sp[_ROW_LN1B:_ROW_LN1B + 1, :E]
    bqkv  = sp[_ROW_BQKV:_ROW_BQKV + 1, :3 * E]
    bp    = sp[_ROW_BP:_ROW_BP + 1, :E]
    ln2_w = sp[_ROW_LN2W:_ROW_LN2W + 1, :E]
    ln2_b = sp[_ROW_LN2B:_ROW_LN2B + 1, :E]
    b1    = sp[_ROW_B1:_ROW_B1 + 1, :H4]
    b2    = sp[_ROW_B2:_ROW_B2 + 1, :E]

    # --- causal additive bias built in-kernel (no VMEM input, no DMA) ---
    row = lax.broadcasted_iota(jnp.int32, (T, T), 0)
    col = lax.broadcasted_iota(jnp.int32, (T, T), 1)
    causal = jnp.where(col <= row, 0.0, -1e30).astype(jnp.float32)

    # ---- attention branch (pre-LN); 1/sqrt(D) is folded into wqkv/bqkv q-part ----
    h = _layernorm(x, ln1_w, ln1_b)
    qkv = jnp.dot(h.astype(jnp.bfloat16), wqkv_ref[0],
                  preferred_element_type=jnp.float32) + bqkv          # (M, 3E)

    y_rows = []
    for b in range(Bt):                    # static unroll, Bt is small
        qkv_b = qkv[b * T:(b + 1) * T, :].reshape(T, 3 * n_head, D)
        qkv_b = pltpu.einshape("tad->atd", qkv_b).astype(jnp.bfloat16)  # (3H, T, D)
        qh = qkv_b[:n_head]
        kh = qkv_b[n_head:2 * n_head]
        vh = qkv_b[2 * n_head:]

        att = jnp.einsum('htd,hsd->hts', qh, kh,
                         preferred_element_type=jnp.float32) + causal  # (H, T, T)
        att = att - jnp.max(att, axis=-1, keepdims=True)
        p = jnp.exp(att)
        p = p * pl.reciprocal(jnp.sum(p, axis=-1, keepdims=True), approx=True)
        yb = jnp.einsum('hts,hsd->htd', p.astype(jnp.bfloat16), vh,
                        preferred_element_type=jnp.float32)            # (H, T, D)
        yb = yb.astype(jnp.bfloat16)

        # output projection as per-head accumulating contraction:
        # wp pre-reshaped to (H, D, E) -> no htd->thd relayout of y.
        acc = jnp.zeros((T, E), jnp.float32)
        for hh in range(n_head):
            acc = acc + jnp.dot(yb[hh], wp_ref[0, hh],
                                preferred_element_type=jnp.float32)
        y_rows.append(acc)

    y = y_rows[0] if Bt == 1 else jnp.concatenate(y_rows, axis=0)      # (M, E)
    x = x + y + bp                                                     # residual

    # ---- MLP branch ----
    h2 = _layernorm(x, ln2_w, ln2_b)
    m = jnp.dot(h2.astype(jnp.bfloat16), w1_ref[0],
                preferred_element_type=jnp.float32) + b1
    m = _gelu_exact(m)
    m = jnp.dot(m.astype(jnp.bfloat16), w2_ref[0],
                preferred_element_type=jnp.float32) + b2
    o_ref[...] = (x + m).reshape(Bt, T, E)


# --------------------------------- wrapper ------------------------------------

def run_blocks(x, stacked, n_head, *, batch_tile=None):
    B, T, E = x.shape
    L = stacked['wqkv'].shape[0]
    H4 = stacked['w1'].shape[-1]

    # Batch tile: amortizes per-layer weight streaming by Bt and raises matmul M.
    # (Roughly 2x larger tiles fit v5e/v6e 128 MiB VMEM than v7x 64 MiB.)
    Bt = batch_tile if batch_tile is not None else min(B, 8)
    Bp = -(-B // Bt) * Bt
    if Bp != B:
        x = jnp.pad(x, ((0, Bp - B), (0, 0), (0, 0)))

    weights = [stacked['small'], stacked['wqkv'], stacked['wp'],
               stacked['w1'], stacked['w2']]

    def wspec(arr):
        nd = arr.ndim
        return pl.BlockSpec((1,) + arr.shape[1:],
                            lambda b, l: (l,) + (0,) * (nd - 1))

    in_specs = ([pl.BlockSpec((Bt, T, E), lambda b, l: (b, 0, 0))]
                + [wspec(w) for w in weights])

    # Advisory cost estimate so XLA overlaps surrounding ops (gathers, PE add).
    flops = int(Bp * L * (2 * T * E * (3 * E + E + 2 * H4) + 4 * T * T * E))
    transcendentals = int(Bp * L * (n_head * T * T + T * H4 + 2 * T))
    bytes_accessed = int(sum(int(w.size) * w.dtype.itemsize for w in weights)
                         + 2 * int(x.size) * x.dtype.itemsize)

    out = pl.pallas_call(
        functools.partial(_fused_blocks_kernel, n_head=n_head),
        out_shape=jax.ShapeDtypeStruct((Bp, T, E), jnp.float32),
        grid=(Bp // Bt, L),
        in_specs=in_specs,
        out_specs=pl.BlockSpec((Bt, T, E), lambda b, l: (b, 0, 0)),
        input_output_aliases={0: 0},       # x aliased to output: in-place layer stack
        compiler_params=pltpu.CompilerParams(
            dimension_semantics=("parallel", "arbitrary"),
            # <= 48-56 MB keeps v7x (64 MiB physical) safe; raise on v6e/v5e
            # (128 MiB) if batch tiles / weight prefetch depth are grown.
            vmem_limit_bytes=48 * 1024 * 1024),
        cost_estimate=pl.CostEstimate(flops=flops,
                                      transcendentals=transcendentals,
                                      bytes_accessed=bytes_accessed),
    )(x, *weights)
    return out[:B]


# ------------------------------ glue (plain JAX) ------------------------------

def sincos_pos_embed(seq_len, dim):
    # pos_encoding.PositionEmbedding (fixed sinusoidal, dropout=0.0)
    pos = jnp.arange(seq_len, dtype=jnp.float32)[:, None]
    div = jnp.exp(jnp.arange(0, dim, 2, dtype=jnp.float32) * (-math.log(10000.0) / dim))
    pe = jnp.zeros((seq_len, dim), jnp.float32)
    pe = pe.at[:, 0::2].set(jnp.sin(pos * div))
    pe = pe.at[:, 1::2].set(jnp.cos(pos * div))
    return pe


def init_params(key, *, num_vq, embed_dim, clip_dim, num_layers, fc_rate,
                num_parts, n_head):
    keys = list(jax.random.split(key, 3 + num_parts + 6 * num_layers))
    kit = iter(keys)

    def nrm(shape):
        return 0.02 * jax.random.normal(next(kit), shape, jnp.float32)

    E, Hf = embed_dim, fc_rate * embed_dim
    D = E // n_head
    scale = 1.0 / math.sqrt(D)

    params = {
        'tok_emb': [nrm((num_vq + 3, E)) for _ in range(num_parts)],
        'sem_emb': nrm((num_vq + 3, E)),
        'cond_w': nrm((clip_dim, E)),
        'cond_b': jnp.zeros((1, E), jnp.float32),
    }
    blocks = []
    for _ in range(num_layers):
        blocks.append({
            'ln1_w': jnp.ones((1, E), jnp.float32), 'ln1_b': jnp.zeros((1, E), jnp.float32),
            'wq': nrm((E, E)), 'wk': nrm((E, E)), 'wv': nrm((E, E)),
            'bq': jnp.zeros((1, E), jnp.float32),
            'bk': jnp.zeros((1, E), jnp.float32),
            'bv': jnp.zeros((1, E), jnp.float32),
            'wp': nrm((E, E)), 'bp': jnp.zeros((1, E), jnp.float32),
            'ln2_w': jnp.ones((1, E), jnp.float32), 'ln2_b': jnp.zeros((1, E), jnp.float32),
            'w1': nrm((E, Hf)), 'b1': jnp.zeros((1, Hf), jnp.float32),
            'w2': nrm((Hf, E)), 'b2': jnp.zeros((1, E), jnp.float32),
        })

    # Stack per-layer weights on a leading layer axis:
    #  * wqkv = [wq*scale | wk | wv] (E, 3E) bf16 -- 1/sqrt(D) folded into q.
    #  * wp reshaped to (H, D, E) bf16 for per-head accumulating output proj.
    #  * all small params packed into ONE (8, W) f32 slab per layer.
    W = max(3 * E, Hf)

    def pad_row(v):
        return jnp.pad(v, ((0, 0), (0, W - v.shape[1])))

    wqkv_l, wp_l, w1_l, w2_l, small_l = [], [], [], [], []
    for b in blocks:
        wqkv_l.append(jnp.concatenate([b['wq'] * scale, b['wk'], b['wv']], axis=1))
        wp_l.append(b['wp'].reshape(n_head, D, E))
        w1_l.append(b['w1'])
        w2_l.append(b['w2'])
        bqkv = jnp.concatenate([b['bq'] * scale, b['bk'], b['bv']], axis=1)
        small_l.append(jnp.concatenate(
            [pad_row(b['ln1_w']), pad_row(b['ln1_b']), pad_row(bqkv), pad_row(b['bp']),
             pad_row(b['ln2_w']), pad_row(b['ln2_b']), pad_row(b['b1']), pad_row(b['b2'])],
            axis=0))

    params['stacked'] = {
        'small': jnp.stack(small_l, axis=0),                       # (L, 8, W) f32
        'wqkv': jnp.stack(wqkv_l, axis=0).astype(jnp.bfloat16),    # (L, E, 3E)
        'wp':   jnp.stack(wp_l, axis=0).astype(jnp.bfloat16),      # (L, H, D, E)
        'w1':   jnp.stack(w1_l, axis=0).astype(jnp.bfloat16),      # (L, E, 4E)
        'w2':   jnp.stack(w2_l, axis=0).astype(jnp.bfloat16),      # (L, 4E, E)
    }
    return params


def cross_cond_trans_forward(params, idx, clip_feature, *,
                             semantic_len, block_size, n_head):
    # cond_emb: tiny (B, clip_dim) x (clip_dim, E) matmul -> plain JAX
    # (a dedicated pallas_call launch + HBM round trip would cost more).
    cond = (clip_feature @ params['cond_w'] + params['cond_b'])[:, None, :]

    B, num_parts, t_idx = idx.shape
    assert t_idx <= block_size, "idx sequence length exceeds model block size"

    # embedding lookups (gathers) in plain JAX
    if t_idx <= semantic_len:
        tok_uncond = jnp.take(params['sem_emb'], idx[:, 0, :], axis=0)
    else:
        sem = jnp.take(params['sem_emb'], idx[:, 0, :semantic_len], axis=0)
        recon = None
        for i in range(num_parts):
            e = jnp.take(params['tok_emb'][i], idx[:, i, semantic_len:t_idx], axis=0)
            recon = e if recon is None else recon + e
        tok_uncond = jnp.concatenate([sem, recon], axis=1)

    token_embeddings = jnp.concatenate([cond, tok_uncond], axis=1)   # (B, T, E)
    T, E = token_embeddings.shape[1], token_embeddings.shape[2]

    pe = sincos_pos_embed(block_size, E)
    x = token_embeddings + pe[None, :T, :]

    # Pad seq to a multiple of 8 (sublane-dense tiles). Padded KEY columns are
    # causally masked for all valid query rows, and padded QUERY rows are
    # sliced off below, so this is semantics-preserving.
    T_pad = -(-T // 8) * 8
    if T_pad != T:
        x = jnp.pad(x, ((0, 0), (0, T_pad - T), (0, 0)))

    # key_padding_mask is None in the reference call -> all-False mask -> no-op
    y = run_blocks(x, params['stacked'], n_head)
    return y[:, :T, :]


# ---------------------------------- main --------------------------------------

if __name__ == "__main__":
    # small, consistent shapes
    num_vq, embed_dim, clip_dim = 16, 64, 64
    block_size, num_layers, n_head, fc_rate = 16, 2, 8, 4
    semantic_len, num_parts = 4, 3
    B, t_idx = 2, 8    # t_idx > semantic_len exercises the multi-part sum branch

    key = jax.random.PRNGKey(0)
    kparam, kidx, kclip = jax.random.split(key, 3)

    params = init_params(kparam, num_vq=num_vq, embed_dim=embed_dim,
                         clip_dim=clip_dim, num_layers=num_layers,
                         fc_rate=fc_rate, num_parts=num_parts, n_head=n_head)

    idx = jax.random.randint(kidx, (B, num_parts, t_idx), 0, num_vq + 3,
                             dtype=jnp.int32)
    clip_feature = jax.random.normal(kclip, (B, clip_dim), jnp.float32)

    out = cross_cond_trans_forward(params, idx, clip_feature,
                                   semantic_len=semantic_len,
                                   block_size=block_size, n_head=n_head)
    out = jax.block_until_ready(out)
    assert out.shape == (B, t_idx + 1, embed_dim)
    assert bool(jnp.all(jnp.isfinite(out)))
    print("KERNEL_OK")
</pallas_src>

<mosaic_0001>
module attributes {stable_mosaic.version = 11 : i64} {
  func.func @_fused_blocks_kernel(%arg0: i32, %arg1: i32, %arg2: memref<2x16x64xf32, #tpu.memory_space<vmem>>, %arg3: memref<1x8x256xf32, #tpu.memory_space<vmem>>, %arg4: memref<1x64x192xbf16, #tpu.memory_space<vmem>>, %arg5: memref<1x8x8x64xbf16, #tpu.memory_space<vmem>>, %arg6: memref<1x64x256xbf16, #tpu.memory_space<vmem>>, %arg7: memref<1x256x64xbf16, #tpu.memory_space<vmem>>, %arg8: memref<2x16x64xf32, #tpu.memory_space<vmem>>) attributes {dimension_semantics = [#tpu.dimension_semantics<parallel>, #tpu.dimension_semantics<arbitrary>], iteration_bounds = array<i64: 1, 2>, scalar_prefetch = 0 : i64, scratch_operands = 0 : i64, tpu.core_type = #tpu.core_type<tc>, window_params = [{transform_indices = @transform_0, window_bounds = array<i64: 2, 16, 64>}, {transform_indices = @transform_1, window_bounds = array<i64: 1, 8, 256>}, {transform_indices = @transform_2, window_bounds = array<i64: 1, 64, 192>}, {transform_indices = @transform_3, window_bounds = array<i64: 1, 8, 8, 64>}, {transform_indices = @transform_4, window_bounds = array<i64: 1, 64, 256>}, {transform_indices = @transform_5, window_bounds = array<i64: 1, 256, 64>}, {transform_indices = @transform_6, window_bounds = array<i64: 2, 16, 64>}]} {
    %c0_i32 = arith.constant 0 : i32
    %0 = arith.cmpi eq, %arg1, %c0_i32 : i32
    %1 = arith.extui %0 : i1 to i32
    %c0_i32_0 = arith.constant 0 : i32
    %2 = arith.cmpi ne, %1, %c0_i32_0 : i32
    scf.if %2 {
      %c0_131 = arith.constant 0 : index
      %c0_132 = arith.constant 0 : index
      %c0_133 = arith.constant 0 : index
      %277 = vector.load %arg2[%c0_131, %c0_132, %c0_133] : memref<2x16x64xf32, #tpu.memory_space<vmem>>, vector<2x16x64xf32>
      %c0_134 = arith.constant 0 : index
      %c0_135 = arith.constant 0 : index
      %c0_136 = arith.constant 0 : index
      %278 = vector.load %arg8[%c0_134, %c0_135, %c0_136] : memref<2x16x64xf32, #tpu.memory_space<vmem>>, vector<2x16x64xf32>
      tpu.vector_store %arg8[%c0_134, %c0_135, %c0_136], %277 {strides = array<i32>} : memref<2x16x64xf32, #tpu.memory_space<vmem>>, vector<2x16x64xf32>,
    } else {
    }
    %c0 = arith.constant 0 : index
    %c0_1 = arith.constant 0 : index
    %c0_2 = arith.constant 0 : index
    %3 = vector.load %arg8[%c0, %c0_1, %c0_2] : memref<2x16x64xf32, #tpu.memory_space<vmem>>, vector<2x16x64xf32>
    %4 = vector.shape_cast %3 : vector<2x16x64xf32> to vector<32x64xf32>
    %c0_3 = arith.constant 0 : index
    %c0_4 = arith.constant 0 : index
    %c0_5 = arith.constant 0 : index
    %5 = vector.load %arg3[%c0_3, %c0_4, %c0_5] : memref<1x8x256xf32, #tpu.memory_space<vmem>>, vector<1x8x256xf32>
    %6 = vector.shape_cast %5 : vector<1x8x256xf32> to vector<8x256xf32>
    %7 = vector.extract_strided_slice %6 {offsets = [0, 0], sizes = [1, 64], strides = [1, 1]} : vector<8x256xf32> to vector<1x64xf32>
    %8 = vector.extract_strided_slice %6 {offsets = [1, 0], sizes = [1, 64], strides = [1, 1]} : vector<8x256xf32> to vector<1x64xf32>
    %9 = vector.extract_strided_slice %6 {offsets = [2, 0], sizes = [1, 192], strides = [1, 1]} : vector<8x256xf32> to vector<1x192xf32>
    %10 = vector.extract_strided_slice %6 {offsets = [3, 0], sizes = [1, 64], strides = [1, 1]} : vector<8x256xf32> to vector<1x64xf32>
    %11 = vector.extract_strided_slice %6 {offsets = [4, 0], sizes = [1, 64], strides = [1, 1]} : vector<8x256xf32> to vector<1x64xf32>
    %12 = vector.extract_strided_slice %6 {offsets = [5, 0], sizes = [1, 64], strides = [1, 1]} : vector<8x256xf32> to vector<1x64xf32>
    %13 = vector.extract_strided_slice %6 {offsets = [6, 0], sizes = [1, 256], strides = [1, 1]} : vector<8x256xf32> to vector<1x256xf32>
    %14 = vector.extract_strided_slice %6 {offsets = [7, 0], sizes = [1, 64], strides = [1, 1]} : vector<8x256xf32> to vector<1x64xf32>
    %15 = tpu.iota {dimensions = array<i32: 0>} : vector<16x16xi32>
    %16 = tpu.iota {dimensions = array<i32: 1>} : vector<16x16xi32>
    %17 = arith.cmpi sle, %16, %15 : vector<16x16xi32>
    %cst = arith.constant 0.000000e+00 : f32
    %cst_6 = arith.constant -1.000000e+30 : f32
    %18 = vector.broadcast %cst : f32 to vector<16x16xf32>
    %19 = vector.broadcast %cst_6 : f32 to vector<16x16xf32>
    %20 = arith.select %17, %18, %19 : vector<16x16xi1>, vector<16x16xf32>
    %cst_7 = arith.constant dense<0.000000e+00> : vector<32xf32>
    %21 = vector.multi_reduction <add>, %4, %cst_7 [1] : vector<32x64xf32> to vector<32xf32>
    %22 = vector.shape_cast %21 : vector<32xf32> to vector<32x1xf32>
    %cst_8 = arith.constant 6.400000e+01 : f32
    %23 = vector.broadcast %cst_8 : f32 to vector<32x1xf32>
    %24 = arith.divf %22, %23 : vector<32x1xf32>
    %25 = vector.broadcast %24 : vector<32x1xf32> to vector<32x64xf32>
    %26 = arith.subf %4, %25 : vector<32x64xf32>
    %27 = arith.mulf %26, %26 : vector<32x64xf32>
    %cst_9 = arith.constant dense<0.000000e+00> : vector<32xf32>
    %28 = vector.multi_reduction <add>, %27, %cst_9 [1] : vector<32x64xf32> to vector<32xf32>
    %29 = vector.shape_cast %28 : vector<32xf32> to vector<32x1xf32>
    %cst_10 = arith.constant 6.400000e+01 : f32
    %30 = vector.broadcast %cst_10 : f32 to vector<32x1xf32>
    %31 = arith.divf %29, %30 : vector<32x1xf32>
    %32 = vector.broadcast %24 : vector<32x1xf32> to vector<32x64xf32>
    %33 = arith.subf %4, %32 : vector<32x64xf32>
    %cst_11 = arith.constant 9.99999974E-6 : f32
    %34 = vector.broadcast %cst_11 : f32 to vector<32x1xf32>
    %35 = arith.addf %31, %34 : vector<32x1xf32>
    %36 = math.rsqrt %35 : vector<32x1xf32>
    %37 = vector.broadcast %36 : vector<32x1xf32> to vector<32x64xf32>
    %38 = arith.mulf %33, %37 : vector<32x64xf32>
    %39 = vector.broadcast %7 : vector<1x64xf32> to vector<32x64xf32>
    %40 = arith.mulf %38, %39 : vector<32x64xf32>
    %41 = vector.broadcast %8 : vector<1x64xf32> to vector<32x64xf32>
    %42 = arith.addf %40, %41 : vector<32x64xf32>
    %43 = arith.truncf %42 : vector<32x64xf32> to vector<32x64xbf16>
    %c0_12 = arith.constant 0 : index
    %c0_13 = arith.constant 0 : index
    %c0_14 = arith.constant 0 : index
    %44 = vector.load %arg4[%c0_12, %c0_13, %c0_14] : memref<1x64x192xbf16, #tpu.memory_space<vmem>>, vector<1x64x192xbf16>
    %45 = vector.shape_cast %44 : vector<1x64x192xbf16> to vector<64x192xbf16>
    %cst_15 = arith.constant dense<0.000000e+00> : vector<32x192xf32>
    %46 = tpu.matmul %43, %45, %cst_15 {dimension_numbers = #tpu.dot_dimension_numbers<[1], [0], [0], [1], [0, 0, 1, 1], [], []>} : vector<32x64xbf16>, vector<64x192xbf16>, vector<32x192xf32> -> vector<32x192xf32>
    %47 = vector.broadcast %9 : vector<1x192xf32> to vector<32x192xf32>
    %48 = arith.addf %46, %47 : vector<32x192xf32>
    %49 = vector.extract_strided_slice %48 {offsets = [0, 0], sizes = [16, 192], strides = [1, 1]} : vector<32x192xf32> to vector<16x192xf32>
    %50 = vector.shape_cast %49 : vector<16x192xf32> to vector<16x24x8xf32>
    %51 = tpu.transpose %50, [1, 0, 2] : vector<16x24x8xf32> -> vector<24x16x8xf32>
    %52 = arith.truncf %51 : vector<24x16x8xf32> to vector<24x16x8xbf16>
    %53 = vector.extract_strided_slice %52 {offsets = [0, 0, 0], sizes = [8, 16, 8], strides = [1, 1, 1]} : vector<24x16x8xbf16> to vector<8x16x8xbf16>
    %54 = vector.extract_strided_slice %52 {offsets = [8, 0, 0], sizes = [8, 16, 8], strides = [1, 1, 1]} : vector<24x16x8xbf16> to vector<8x16x8xbf16>
    %55 = vector.extract_strided_slice %52 {offsets = [16, 0, 0], sizes = [8, 16, 8], strides = [1, 1, 1]} : vector<24x16x8xbf16> to vector<8x16x8xbf16>
    "tpu.trace_start"() <{level = 10 : i32, message = "htd,hsd->hts"}> : () -> ()
    %cst_16 = arith.constant dense<0.000000e+00> : vector<8x16x16xf32>
    %56 = tpu.matmul %53, %54, %cst_16 {dimension_numbers = #tpu.dot_dimension_numbers<[2], [2], [1], [1], [0, 0, 0, 1, 1, 1], [0], [0]>} : vector<8x16x8xbf16>, vector<8x16x8xbf16>, vector<8x16x16xf32> -> vector<8x16x16xf32>
    "tpu.trace_stop"() : () -> ()
    %57 = vector.shape_cast %20 : vector<16x16xf32> to vector<1x16x16xf32>
    %58 = vector.broadcast %57 : vector<1x16x16xf32> to vector<8x16x16xf32>
    %59 = arith.addf %56, %58 : vector<8x16x16xf32>
    %cst_17 = arith.constant dense<0xFF800000> : vector<8x16xf32>
    %60 = vector.multi_reduction <maximumf>, %59, %cst_17 [2] : vector<8x16x16xf32> to vector<8x16xf32>
    %61 = vector.shape_cast %60 : vector<8x16xf32> to vector<8x16x1xf32>
    %62 = vector.broadcast %61 : vector<8x16x1xf32> to vector<8x16x16xf32>
    %63 = arith.subf %59, %62 : vector<8x16x16xf32>
    %64 = math.exp %63 : vector<8x16x16xf32>
    %cst_18 = arith.constant dense<0.000000e+00> : vector<8x16xf32>
    %65 = vector.multi_reduction <add>, %64, %cst_18 [2] : vector<8x16x16xf32> to vector<8x16xf32>
    %66 = vector.shape_cast %65 : vector<8x16xf32> to vector<8x16x1xf32>
    %67 = tpu.reciprocal %66 {approx = true} : vector<8x16x1xf32> -> vector<8x16x1xf32>
    %68 = vector.broadcast %67 : vector<8x16x1xf32> to vector<8x16x16xf32>
    %69 = arith.mulf %64, %68 : vector<8x16x16xf32>
    %70 = arith.truncf %69 : vector<8x16x16xf32> to vector<8x16x16xbf16>
    "tpu.trace_start"() <{level = 10 : i32, message = "hts,hsd->htd"}> : () -> ()
    %cst_19 = arith.constant dense<0.000000e+00> : vector<8x16x8xf32>
    %71 = tpu.matmul %70, %55, %cst_19 {dimension_numbers = #tpu.dot_dimension_numbers<[2], [1], [1], [2], [0, 0, 0, 1, 1, 2], [0], [0]>} : vector<8x16x16xbf16>, vector<8x16x8xbf16>, vector<8x16x8xf32> -> vector<8x16x8xf32>
    "tpu.trace_stop"() : () -> ()
    %72 = arith.truncf %71 : vector<8x16x8xf32> to vector<8x16x8xbf16>
    %cst_20 = arith.constant 0.000000e+00 : f32
    %73 = vector.broadcast %cst_20 : f32 to vector<16x64xf32>
    %74 = vector.extract_strided_slice %72 {offsets = [0, 0, 0], sizes = [1, 16, 8], strides = [1, 1, 1]} : vector<8x16x8xbf16> to vector<1x16x8xbf16>
    %75 = vector.shape_cast %74 : vector<1x16x8xbf16> to vector<16x8xbf16>
    %c0_21 = arith.constant 0 : index
    %c0_22 = arith.constant 0 : index
    %c0_23 = arith.constant 0 : index
    %c0_24 = arith.constant 0 : index
    %76 = vector.load %arg5[%c0_21, %c0_22, %c0_23, %c0_24] : memref<1x8x8x64xbf16, #tpu.memory_space<vmem>>, vector<1x1x8x64xbf16>
    %77 = vector.shape_cast %76 : vector<1x1x8x64xbf16> to vector<8x64xbf16>
    %cst_25 = arith.constant dense<0.000000e+00> : vector<16x64xf32>
    %78 = tpu.matmul %75, %77, %cst_25 {dimension_numbers = #tpu.dot_dimension_numbers<[1], [0], [0], [1], [0, 0, 1, 1], [], []>} : vector<16x8xbf16>, vector<8x64xbf16>, vector<16x64xf32> -> vector<16x64xf32>
    %79 = arith.addf %73, %78 : vector<16x64xf32>
    %80 = vector.extract_strided_slice %72 {offsets = [1, 0, 0], sizes = [1, 16, 8], strides = [1, 1, 1]} : vector<8x16x8xbf16> to vector<1x16x8xbf16>
    %81 = vector.shape_cast %80 : vector<1x16x8xbf16> to vector<16x8xbf16>
    %c0_26 = arith.constant 0 : index
    %c1 = arith.constant 1 : index
    %c0_27 = arith.constant 0 : index
    %c0_28 = arith.constant 0 : index
    %82 = vector.load %arg5[%c0_26, %c1, %c0_27, %c0_28] : memref<1x8x8x64xbf16, #tpu.memory_space<vmem>>, vector<1x1x8x64xbf16>
    %83 = vector.shape_cast %82 : vector<1x1x8x64xbf16> to vector<8x64xbf16>
    %cst_29 = arith.constant dense<0.000000e+00> : vector<16x64xf32>
    %84 = tpu.matmul %81, %83, %cst_29 {dimension_numbers = #tpu.dot_dimension_numbers<[1], [0], [0], [1], [0, 0, 1, 1], [], []>} : vector<16x8xbf16>, vector<8x64xbf16>, vector<16x64xf32> -> vector<16x64xf32>
    %85 = arith.addf %79, %84 : vector<16x64xf32>
    %86 = vector.extract_strided_slice %72 {offsets = [2, 0, 0], sizes = [1, 16, 8], strides = [1, 1, 1]} : vector<8x16x8xbf16> to vector<1x16x8xbf16>
    %87 = vector.shape_cast %86 : vector<1x16x8xbf16> to vector<16x8xbf16>
    %c0_30 = arith.constant 0 : index
    %c2 = arith.constant 2 : index
    %c0_31 = arith.constant 0 : index
    %c0_32 = arith.constant 0 : index
    %88 = vector.load %arg5[%c0_30, %c2, %c0_31, %c0_32] : memref<1x8x8x64xbf16, #tpu.memory_space<vmem>>, vector<1x1x8x64xbf16>
    %89 = vector.shape_cast %88 : vector<1x1x8x64xbf16> to vector<8x64xbf16>
    %cst_33 = arith.constant dense<0.000000e+00> : vector<16x64xf32>
    %90 = tpu.matmul %87, %89, %cst_33 {dimension_numbers = #tpu.dot_dimension_numbers<[1], [0], [0], [1], [0, 0, 1, 1], [], []>} : vector<16x8xbf16>, vector<8x64xbf16>, vector<16x64xf32> -> vector<16x64xf32>
    %91 = arith.addf %85, %90 : vector<16x64xf32>
    %92 = vector.extract_strided_slice %72 {offsets = [3, 0, 0], sizes = [1, 16, 8], strides = [1, 1, 1]} : vector<8x16x8xbf16> to vector<1x16x8xbf16>
    %93 = vector.shape_cast %92 : vector<1x16x8xbf16> to vector<16x8xbf16>
    %c0_34 = arith.constant 0 : index
    %c3 = arith.constant 3 : index
    %c0_35 = arith.constant 0 : index
    %c0_36 = arith.constant 0 : index
    %94 = vector.load %arg5[%c0_34, %c3, %c0_35, %c0_36] : memref<1x8x8x64xbf16, #tpu.memory_space<vmem>>, vector<1x1x8x64xbf16>
    %95 = vector.shape_cast %94 : vector<1x1x8x64xbf16> to vector<8x64xbf16>
    %cst_37 = arith.constant dense<0.000000e+00> : vector<16x64xf32>
    %96 = tpu.matmul %93, %95, %cst_37 {dimension_numbers = #tpu.dot_dimension_numbers<[1], [0], [0], [1], [0, 0, 1, 1], [], []>} : vector<16x8xbf16>, vector<8x64xbf16>, vector<16x64xf32> -> vector<16x64xf32>
    %97 = arith.addf %91, %96 : vector<16x64xf32>
    %98 = vector.extract_strided_slice %72 {offsets = [4, 0, 0], sizes = [1, 16, 8], strides = [1, 1, 1]} : vector<8x16x8xbf16> to vector<1x16x8xbf16>
    %99 = vector.shape_cast %98 : vector<1x16x8xbf16> to vector<16x8xbf16>
    %c0_38 = arith.constant 0 : index
    %c4 = arith.constant 4 : index
    %c0_39 = arith.constant 0 : index
    %c0_40 = arith.constant 0 : index
    %100 = vector.load %arg5[%c0_38, %c4, %c0_39, %c0_40] : memref<1x8x8x64xbf16, #tpu.memory_space<vmem>>, vector<1x1x8x64xbf16>
    %101 = vector.shape_cast %100 : vector<1x1x8x64xbf16> to vector<8x64xbf16>
    %cst_41 = arith.constant dense<0.000000e+00> : vector<16x64xf32>
    %102 = tpu.matmul %99, %101, %cst_41 {dimension_numbers = #tpu.dot_dimension_numbers<[1], [0], [0], [1], [0, 0, 1, 1], [], []>} : vector<16x8xbf16>, vector<8x64xbf16>, vector<16x64xf32> -> vector<16x64xf32>
    %103 = arith.addf %97, %102 : vector<16x64xf32>
    %104 = vector.extract_strided_slice %72 {offsets = [5, 0, 0], sizes = [1, 16, 8], strides = [1, 1, 1]} : vector<8x16x8xbf16> to vector<1x16x8xbf16>
    %105 = vector.shape_cast %104 : vector<1x16x8xbf16> to vector<16x8xbf16>
    %c0_42 = arith.constant 0 : index
    %c5 = arith.constant 5 : index
    %c0_43 = arith.constant 0 : index
    %c0_44 = arith.constant 0 : index
    %106 = vector.load %arg5[%c0_42, %c5, %c0_43, %c0_44] : memref<1x8x8x64xbf16, #tpu.memory_space<vmem>>, vector<1x1x8x64xbf16>
    %107 = vector.shape_cast %106 : vector<1x1x8x64xbf16> to vector<8x64xbf16>
    %cst_45 = arith.constant dense<0.000000e+00> : vector<16x64xf32>
    %108 = tpu.matmul %105, %107, %cst_45 {dimension_numbers = #tpu.dot_dimension_numbers<[1], [0], [0], [1], [0, 0, 1, 1], [], []>} : vector<16x8xbf16>, vector<8x64xbf16>, vector<16x64xf32> -> vector<16x64xf32>
    %109 = arith.addf %103, %108 : vector<16x64xf32>
    %110 = vector.extract_strided_slice %72 {offsets = [6, 0, 0], sizes = [1, 16, 8], strides = [1, 1, 1]} : vector<8x16x8xbf16> to vector<1x16x8xbf16>
    %111 = vector.shape_cast %110 : vector<1x16x8xbf16> to vector<16x8xbf16>
    %c0_46 = arith.constant 0 : index
    %c6 = arith.constant 6 : index
    %c0_47 = arith.constant 0 : index
    %c0_48 = arith.constant 0 : index
    %112 = vector.load %arg5[%c0_46, %c6, %c0_47, %c0_48] : memref<1x8x8x64xbf16, #tpu.memory_space<vmem>>, vector<1x1x8x64xbf16>
    %113 = vector.shape_cast %112 : vector<1x1x8x64xbf16> to vector<8x64xbf16>
    %cst_49 = arith.constant dense<0.000000e+00> : vector<16x64xf32>
    %114 = tpu.matmul %111, %113, %cst_49 {dimension_numbers = #tpu.dot_dimension_numbers<[1], [0], [0], [1], [0, 0, 1, 1], [], []>} : vector<16x8xbf16>, vector<8x64xbf16>, vector<16x64xf32> -> vector<16x64xf32>
    %115 = arith.addf %109, %114 : vector<16x64xf32>
    %116 = vector.extract_strided_slice %72 {offsets = [7, 0, 0], sizes = [1, 16, 8], strides = [1, 1, 1]} : vector<8x16x8xbf16> to vector<1x16x8xbf16>
    %117 = vector.shape_cast %116 : vector<1x16x8xbf16> to vector<16x8xbf16>
    %c0_50 = arith.constant 0 : index
    %c7 = arith.constant 7 : index
    %c0_51 = arith.constant 0 : index
    %c0_52 = arith.constant 0 : index
    %118 = vector.load %arg5[%c0_50, %c7, %c0_51, %c0_52] : memref<1x8x8x64xbf16, #tpu.memory_space<vmem>>, vector<1x1x8x64xbf16>
    %119 = vector.shape_cast %118 : vector<1x1x8x64xbf16> to vector<8x64xbf16>
    %cst_53 = arith.constant dense<0.000000e+00> : vector<16x64xf32>
    %120 = tpu.matmul %117, %119, %cst_53 {dimension_numbers = #tpu.dot_dimension_numbers<[1], [0], [0], [1], [0, 0, 1, 1], [], []>} : vector<16x8xbf16>, vector<8x64xbf16>, vector<16x64xf32> -> vector<16x64xf32>
    %121 = arith.addf %115, %120 : vector<16x64xf32>
    %122 = vector.extract_strided_slice %48 {offsets = [16, 0], sizes = [16, 192], strides = [1, 1]} : vector<32x192xf32> to vector<16x192xf32>
    %123 = vector.shape_cast %122 : vector<16x192xf32> to vector<16x24x8xf32>
    %124 = tpu.transpose %123, [1, 0, 2] : vector<16x24x8xf32> -> vector<24x16x8xf32>
    %125 = arith.truncf %124 : vector<24x16x8xf32> to vector<24x16x8xbf16>
    %126 = vector.extract_strided_slice %125 {offsets = [0, 0, 0], sizes = [8, 16, 8], strides = [1, 1, 1]} : vector<24x16x8xbf16> to vector<8x16x8xbf16>
    %127 = vector.extract_strided_slice %125 {offsets = [8, 0, 0], sizes = [8, 16, 8], strides = [1, 1, 1]} : vector<24x16x8xbf16> to vector<8x16x8xbf16>
    %128 = vector.extract_strided_slice %125 {offsets = [16, 0, 0], sizes = [8, 16, 8], strides = [1, 1, 1]} : vector<24x16x8xbf16> to vector<8x16x8xbf16>
    "tpu.trace_start"() <{level = 10 : i32, message = "htd,hsd->hts"}> : () -> ()
    %cst_54 = arith.constant dense<0.000000e+00> : vector<8x16x16xf32>
    %129 = tpu.matmul %126, %127, %cst_54 {dimension_numbers = #tpu.dot_dimension_numbers<[2], [2], [1], [1], [0, 0, 0, 1, 1, 1], [0], [0]>} : vector<8x16x8xbf16>, vector<8x16x8xbf16>, vector<8x16x16xf32> -> vector<8x16x16xf32>
    "tpu.trace_stop"() : () -> ()
    %130 = vector.shape_cast %20 : vector<16x16xf32> to vector<1x16x16xf32>
    %131 = vector.broadcast %130 : vector<1x16x16xf32> to vector<8x16x16xf32>
    %132 = arith.addf %129, %131 : vector<8x16x16xf32>
    %cst_55 = arith.constant dense<0xFF800000> : vector<8x16xf32>
    %133 = vector.multi_reduction <maximumf>, %132, %cst_55 [2] : vector<8x16x16xf32> to vector<8x16xf32>
    %134 = vector.shape_cast %133 : vector<8x16xf32> to vector<8x16x1xf32>
    %135 = vector.broadcast %134 : vector<8x16x1xf32> to vector<8x16x16xf32>
    %136 = arith.subf %132, %135 : vector<8x16x16xf32>
    %137 = math.exp %136 : vector<8x16x16xf32>
    %cst_56 = arith.constant dense<0.000000e+00> : vector<8x16xf32>
    %138 = vector.multi_reduction <add>, %137, %cst_56 [2] : vector<8x16x16xf32> to vector<8x16xf32>
    %139 = vector.shape_cast %138 : vector<8x16xf32> to vector<8x16x1xf32>
    %140 = tpu.reciprocal %139 {approx = true} : vector<8x16x1xf32> -> vector<8x16x1xf32>
    %141 = vector.broadcast %140 : vector<8x16x1xf32> to vector<8x16x16xf32>
    %142 = arith.mulf %137, %141 : vector<8x16x16xf32>
    %143 = arith.truncf %142 : vector<8x16x16xf32> to vector<8x16x16xbf16>
    "tpu.trace_start"() <{level = 10 : i32, message = "hts,hsd->htd"}> : () -> ()
    %cst_57 = arith.constant dense<0.000000e+00> : vector<8x16x8xf32>
    %144 = tpu.matmul %143, %128, %cst_57 {dimension_numbers = #tpu.dot_dimension_numbers<[2], [1], [1], [2], [0, 0, 0, 1, 1, 2], [0], [0]>} : vector<8x16x16xbf16>, vector<8x16x8xbf16>, vector<8x16x8xf32> -> vector<8x16x8xf32>
    "tpu.trace_stop"() : () -> ()
    %145 = arith.truncf %144 : vector<8x16x8xf32> to vector<8x16x8xbf16>
    %cst_58 = arith.constant 0.000000e+00 : f32
    %146 = vector.broadcast %cst_58 : f32 to vector<16x64xf32>
    %147 = vector.extract_strided_slice %145 {offsets = [0, 0, 0], sizes = [1, 16, 8], strides = [1, 1, 1]} : vector<8x16x8xbf16> to vector<1x16x8xbf16>
    %148 = vector.shape_cast %147 : vector<1x16x8xbf16> to vector<16x8xbf16>
    %c0_59 = arith.constant 0 : index
    %c0_60 = arith.constant 0 : index
    %c0_61 = arith.constant 0 : index
    %c0_62 = arith.constant 0 : index
    %149 = vector.load %arg5[%c0_59, %c0_60, %c0_61, %c0_62] : memref<1x8x8x64xbf16, #tpu.memory_space<vmem>>, vector<1x1x8x64xbf16>
    %150 = vector.shape_cast %149 : vector<1x1x8x64xbf16> to vector<8x64xbf16>
    %cst_63 = arith.constant dense<0.000000e+00> : vector<16x64xf32>
    %151 = tpu.matmul %148, %150, %cst_63 {dimension_numbers = #tpu.dot_dimension_numbers<[1], [0], [0], [1], [0, 0, 1, 1], [], []>} : vector<16x8xbf16>, vector<8x64xbf16>, vector<16x64xf32> -> vector<16x64xf32>
    %152 = arith.addf %146, %151 : vector<16x64xf32>
    %153 = vector.extract_strided_slice %145 {offsets = [1, 0, 0], sizes = [1, 16, 8], strides = [1, 1, 1]} : vector<8x16x8xbf16> to vector<1x16x8xbf16>
    %154 = vector.shape_cast %153 : vector<1x16x8xbf16> to vector<16x8xbf16>
    %c0_64 = arith.constant 0 : index
    %c1_65 = arith.constant 1 : index
    %c0_66 = arith.constant 0 : index
    %c0_67 = arith.constant 0 : index
    %155 = vector.load %arg5[%c0_64, %c1_65, %c0_66, %c0_67] : memref<1x8x8x64xbf16, #tpu.memory_space<vmem>>, vector<1x1x8x64xbf16>
    %156 = vector.shape_cast %155 : vector<1x1x8x64xbf16> to vector<8x64xbf16>
    %cst_68 = arith.constant dense<0.000000e+00> : vector<16x64xf32>
    %157 = tpu.matmul %154, %156, %cst_68 {dimension_numbers = #tpu.dot_dimension_numbers<[1], [0], [0], [1], [0, 0, 1, 1], [], []>} : vector<16x8xbf16>, vector<8x64xbf16>, vector<16x64xf32> -> vector<16x64xf32>
    %158 = arith.addf %152, %157 : vector<16x64xf32>
    %159 = vector.extract_strided_slice %145 {offsets = [2, 0, 0], sizes = [1, 16, 8], strides = [1, 1, 1]} : vector<8x16x8xbf16> to vector<1x16x8xbf16>
    %160 = vector.shape_cast %159 : vector<1x16x8xbf16> to vector<16x8xbf16>
    %c0_69 = arith.constant 0 : index
    %c2_70 = arith.constant 2 : index
    %c0_71 = arith.constant 0 : index
    %c0_72 = arith.constant 0 : index
    %161 = vector.load %arg5[%c0_69, %c2_70, %c0_71, %c0_72] : memref<1x8x8x64xbf16, #tpu.memory_space<vmem>>, vector<1x1x8x64xbf16>
    %162 = vector.shape_cast %161 : vector<1x1x8x64xbf16> to vector<8x64xbf16>
    %cst_73 = arith.constant dense<0.000000e+00> : vector<16x64xf32>
    %163 = tpu.matmul %160, %162, %cst_73 {dimension_numbers = #tpu.dot_dimension_numbers<[1], [0], [0], [1], [0, 0, 1, 1], [], []>} : vector<16x8xbf16>, vector<8x64xbf16>, vector<16x64xf32> -> vector<16x64xf32>
    %164 = arith.addf %158, %163 : vector<16x64xf32>
    %165 = vector.extract_strided_slice %145 {offsets = [3, 0, 0], sizes = [1, 16, 8], strides = [1, 1, 1]} : vector<8x16x8xbf16> to vector<1x16x8xbf16>
    %166 = vector.shape_cast %165 : vector<1x16x8xbf16> to vector<16x8xbf16>
    %c0_74 = arith.constant 0 : index
    %c3_75 = arith.constant 3 : index
    %c0_76 = arith.constant 0 : index
    %c0_77 = arith.constant 0 : index
    %167 = vector.load %arg5[%c0_74, %c3_75, %c0_76, %c0_77] : memref<1x8x8x64xbf16, #tpu.memory_space<vmem>>, vector<1x1x8x64xbf16>
    %168 = vector.shape_cast %167 : vector<1x1x8x64xbf16> to vector<8x64xbf16>
    %cst_78 = arith.constant dense<0.000000e+00> : vector<16x64xf32>
    %169 = tpu.matmul %166, %168, %cst_78 {dimension_numbers = #tpu.dot_dimension_numbers<[1], [0], [0], [1], [0, 0, 1, 1], [], []>} : vector<16x8xbf16>, vector<8x64xbf16>, vector<16x64xf32> -> vector<16x64xf32>
    %170 = arith.addf %164, %169 : vector<16x64xf32>
    %171 = vector.extract_strided_slice %145 {offsets = [4, 0, 0], sizes = [1, 16, 8], strides = [1, 1, 1]} : vector<8x16x8xbf16> to vector<1x16x8xbf16>
    %172 = vector.shape_cast %171 : vector<1x16x8xbf16> to vector<16x8xbf16>
    %c0_79 = arith.constant 0 : index
    %c4_80 = arith.constant 4 : index
    %c0_81 = arith.constant 0 : index
    %c0_82 = arith.constant 0 : index
    %173 = vector.load %arg5[%c0_79, %c4_80, %c0_81, %c0_82] : memref<1x8x8x64xbf16, #tpu.memory_space<vmem>>, vector<1x1x8x64xbf16>
    %174 = vector.shape_cast %173 : vector<1x1x8x64xbf16> to vector<8x64xbf16>
    %cst_83 = arith.constant dense<0.000000e+00> : vector<16x64xf32>
    %175 = tpu.matmul %172, %174, %cst_83 {dimension_numbers = #tpu.dot_dimension_numbers<[1], [0], [0], [1], [0, 0, 1, 1], [], []>} : vector<16x8xbf16>, vector<8x64xbf16>, vector<16x64xf32> -> vector<16x64xf32>
    %176 = arith.addf %170, %175 : vector<16x64xf32>
    %177 = vector.extract_strided_slice %145 {offsets = [5, 0, 0], sizes = [1, 16, 8], strides = [1, 1, 1]} : vector<8x16x8xbf16> to vector<1x16x8xbf16>
    %178 = vector.shape_cast %177 : vector<1x16x8xbf16> to vector<16x8xbf16>
    %c0_84 = arith.constant 0 : index
    %c5_85 = arith.constant 5 : index
    %c0_86 = arith.constant 0 : index
    %c0_87 = arith.constant 0 : index
    %179 = vector.load %arg5[%c0_84, %c5_85, %c0_86, %c0_87] : memref<1x8x8x64xbf16, #tpu.memory_space<vmem>>, vector<1x1x8x64xbf16>
    %180 = vector.shape_cast %179 : vector<1x1x8x64xbf16> to vector<8x64xbf16>
    %cst_88 = arith.constant dense<0.000000e+00> : vector<16x64xf32>
    %181 = tpu.matmul %178, %180, %cst_88 {dimension_numbers = #tpu.dot_dimension_numbers<[1], [0], [0], [1], [0, 0, 1, 1], [], []>} : vector<16x8xbf16>, vector<8x64xbf16>, vector<16x64xf32> -> vector<16x64xf32>
    %182 = arith.addf %176, %181 : vector<16x64xf32>
    %183 = vector.extract_strided_slice %145 {offsets = [6, 0, 0], sizes = [1, 16, 8], strides = [1, 1, 1]} : vector<8x16x8xbf16> to vector<1x16x8xbf16>
    %184 = vector.shape_cast %183 : vector<1x16x8xbf16> to vector<16x8xbf16>
    %c0_89 = arith.constant 0 : index
    %c6_90 = arith.constant 6 : index
    %c0_91 = arith.constant 0 : index
    %c0_92 = arith.constant 0 : index
    %185 = vector.load %arg5[%c0_89, %c6_90, %c0_91, %c0_92] : memref<1x8x8x64xbf16, #tpu.memory_space<vmem>>, vector<1x1x8x64xbf16>
    %186 = vector.shape_cast %185 : vector<1x1x8x64xbf16> to vector<8x64xbf16>
    %cst_93 = arith.constant dense<0.000000e+00> : vector<16x64xf32>
    %187 = tpu.matmul %184, %186, %cst_93 {dimension_numbers = #tpu.dot_dimension_numbers<[1], [0], [0], [1], [0, 0, 1, 1], [], []>} : vector<16x8xbf16>, vector<8x64xbf16>, vector<16x64xf32> -> vector<16x64xf32>
    %188 = arith.addf %182, %187 : vector<16x64xf32>
    %189 = vector.extract_strided_slice %145 {offsets = [7, 0, 0], sizes = [1, 16, 8], strides = [1, 1, 1]} : vector<8x16x8xbf16> to vector<1x16x8xbf16>
    %190 = vector.shape_cast %189 : vector<1x16x8xbf16> to vector<16x8xbf16>
    %c0_94 = arith.constant 0 : index
    %c7_95 = arith.constant 7 : index
    %c0_96 = arith.constant 0 : index
    %c0_97 = arith.constant 0 : index
    %191 = vector.load %arg5[%c0_94, %c7_95, %c0_96, %c0_97] : memref<1x8x8x64xbf16, #tpu.memory_space<vmem>>, vector<1x1x8x64xbf16>
    %192 = vector.shape_cast %191 : vector<1x1x8x64xbf16> to vector<8x64xbf16>
    %cst_98 = arith.constant dense<0.000000e+00> : vector<16x64xf32>
    %193 = tpu.matmul %190, %192, %cst_98 {dimension_numbers = #tpu.dot_dimension_numbers<[1], [0], [0], [1], [0, 0, 1, 1], [], []>} : vector<16x8xbf16>, vector<8x64xbf16>, vector<16x64xf32> -> vector<16x64xf32>
    %194 = arith.addf %188, %193 : vector<16x64xf32>
    %195 = tpu.concatenate %121, %194 in 0 : vector<16x64xf32>, vector<16x64xf32> -> vector<32x64xf32>
    %196 = arith.addf %4, %195 : vector<32x64xf32>
    %197 = vector.broadcast %10 : vector<1x64xf32> to vector<32x64xf32>
    %198 = arith.addf %196, %197 : vector<32x64xf32>
    %cst_99 = arith.constant dense<0.000000e+00> : vector<32xf32>
    %199 = vector.multi_reduction <add>, %198, %cst_99 [1] : vector<32x64xf32> to vector<32xf32>
    %200 = vector.shape_cast %199 : vector<32xf32> to vector<32x1xf32>
    %cst_100 = arith.constant 6.400000e+01 : f32
    %201 = vector.broadcast %cst_100 : f32 to vector<32x1xf32>
    %202 = arith.divf %200, %201 : vector<32x1xf32>
    %203 = vector.broadcast %202 : vector<32x1xf32> to vector<32x64xf32>
    %204 = arith.subf %198, %203 : vector<32x64xf32>
    %205 = arith.mulf %204, %204 : vector<32x64xf32>
    %cst_101 = arith.constant dense<0.000000e+00> : vector<32xf32>
    %206 = vector.multi_reduction <add>, %205, %cst_101 [1] : vector<32x64xf32> to vector<32xf32>
    %207 = vector.shape_cast %206 : vector<32xf32> to vector<32x1xf32>
    %cst_102 = arith.constant 6.400000e+01 : f32
    %208 = vector.broadcast %cst_102 : f32 to vector<32x1xf32>
    %209 = arith.divf %207, %208 : vector<32x1xf32>
    %210 = vector.broadcast %202 : vector<32x1xf32> to vector<32x64xf32>
    %211 = arith.subf %198, %210 : vector<32x64xf32>
    %cst_103 = arith.constant 9.99999974E-6 : f32
    %212 = vector.broadcast %cst_103 : f32 to vector<32x1xf32>
    %213 = arith.addf %209, %212 : vector<32x1xf32>
    %214 = math.rsqrt %213 : vector<32x1xf32>
    %215 = vector.broadcast %214 : vector<32x1xf32> to vector<32x64xf32>
    %216 = arith.mulf %211, %215 : vector<32x64xf32>
    %217 = vector.broadcast %11 : vector<1x64xf32> to vector<32x64xf32>
    %218 = arith.mulf %216, %217 : vector<32x64xf32>
    %219 = vector.broadcast %12 : vector<1x64xf32> to vector<32x64xf32>
    %220 = arith.addf %218, %219 : vector<32x64xf32>
    %221 = arith.truncf %220 : vector<32x64xf32> to vector<32x64xbf16>
    %c0_104 = arith.constant 0 : index
    %c0_105 = arith.constant 0 : index
    %c0_106 = arith.constant 0 : index
    %222 = vector.load %arg6[%c0_104, %c0_105, %c0_106] : memref<1x64x256xbf16, #tpu.memory_space<vmem>>, vector<1x64x256xbf16>
    %223 = vector.shape_cast %222 : vector<1x64x256xbf16> to vector<64x256xbf16>
    %cst_107 = arith.constant dense<0.000000e+00> : vector<32x256xf32>
    %224 = tpu.matmul %221, %223, %cst_107 {dimension_numbers = #tpu.dot_dimension_numbers<[1], [0], [0], [1], [0, 0, 1, 1], [], []>} : vector<32x64xbf16>, vector<64x256xbf16>, vector<32x256xf32> -> vector<32x256xf32>
    %225 = vector.broadcast %13 : vector<1x256xf32> to vector<32x256xf32>
    %226 = arith.addf %224, %225 : vector<32x256xf32>
    %cst_108 = arith.constant 5.000000e-01 : f32
    %227 = vector.broadcast %cst_108 : f32 to vector<32x256xf32>
    %228 = arith.mulf %227, %226 : vector<32x256xf32>
    %cst_109 = arith.constant 0.707106769 : f32
    %229 = vector.broadcast %cst_109 : f32 to vector<32x256xf32>
    %230 = arith.mulf %226, %229 : vector<32x256xf32>
    %cst_110 = arith.constant 0.000000e+00 : f32
    %231 = vector.broadcast %cst_110 : f32 to vector<32x256xf32>
    %232 = arith.cmpf oge, %230, %231 : vector<32x256xf32>
    %cst_111 = arith.constant 1.000000e+00 : f32
    %cst_112 = arith.constant -1.000000e+00 : f32
    %233 = vector.broadcast %cst_111 : f32 to vector<32x256xf32>
    %234 = vector.broadcast %cst_112 : f32 to vector<32x256xf32>
    %235 = arith.select %232, %233, %234 : vector<32x256xi1>, vector<32x256xf32>
    %236 = math.absf %230 : vector<32x256xf32>
    %cst_113 = arith.constant 0.327591091 : f32
    %237 = vector.broadcast %cst_113 : f32 to vector<32x256xf32>
    %238 = arith.mulf %237, %236 : vector<32x256xf32>
    %cst_114 = arith.constant 1.000000e+00 : f32
    %239 = vector.broadcast %cst_114 : f32 to vector<32x256xf32>
    %240 = arith.addf %239, %238 : vector<32x256xf32>
    %cst_115 = arith.constant 1.000000e+00 : f32
    %241 = vector.broadcast %cst_115 : f32 to vector<32x256xf32>
    %242 = arith.divf %241, %240 : vector<32x256xf32>
    %cst_116 = arith.constant 1.06140542 : f32
    %243 = vector.broadcast %cst_116 : f32 to vector<32x256xf32>
    %244 = arith.mulf %243, %242 : vector<32x256xf32>
    %cst_117 = arith.constant -1.45315206 : f32
    %245 = vector.broadcast %cst_117 : f32 to vector<32x256xf32>
    %246 = arith.addf %244, %245 : vector<32x256xf32>
    %247 = arith.mulf %246, %242 : vector<32x256xf32>
    %cst_118 = arith.constant 1.42141378 : f32
    %248 = vector.broadcast %cst_118 : f32 to vector<32x256xf32>
    %249 = arith.addf %247, %248 : vector<32x256xf32>
    %250 = arith.mulf %249, %242 : vector<32x256xf32>
    %cst_119 = arith.constant -0.284496725 : f32
    %251 = vector.broadcast %cst_119 : f32 to vector<32x256xf32>
    %252 = arith.addf %250, %251 : vector<32x256xf32>
    %253 = arith.mulf %252, %242 : vector<32x256xf32>
    %cst_120 = arith.constant 0.254829586 : f32
    %254 = vector.broadcast %cst_120 : f32 to vector<32x256xf32>
    %255 = arith.addf %253, %254 : vector<32x256xf32>
    %256 = arith.mulf %255, %242 : vector<32x256xf32>
    %cst_121 = arith.constant 0.000000e+00 : f32
    %257 = vector.broadcast %cst_121 : f32 to vector<32x256xf32>
    %258 = arith.subf %257, %236 : vector<32x256xf32>
    %259 = arith.mulf %258, %236 : vector<32x256xf32>
    %260 = math.exp %259 : vector<32x256xf32>
    %261 = arith.mulf %256, %260 : vector<32x256xf32>
    %cst_122 = arith.constant 1.000000e+00 : f32
    %262 = vector.broadcast %cst_122 : f32 to vector<32x256xf32>
    %263 = arith.subf %262, %261 : vector<32x256xf32>
    %264 = arith.mulf %235, %263 : vector<32x256xf32>
    %cst_123 = arith.constant 1.000000e+00 : f32
    %265 = vector.broadcast %cst_123 : f32 to vector<32x256xf32>
    %266 = arith.addf %265, %264 : vector<32x256xf32>
    %267 = arith.mulf %228, %266 : vector<32x256xf32>
    %268 = arith.truncf %267 : vector<32x256xf32> to vector<32x256xbf16>
    %c0_124 = arith.constant 0 : index
    %c0_125 = arith.constant 0 : index
    %c0_126 = arith.constant 0 : index
    %269 = vector.load %arg7[%c0_124, %c0_125, %c0_126] : memref<1x256x64xbf16, #tpu.memory_space<vmem>>, vector<1x256x64xbf16>
    %270 = vector.shape_cast %269 : vector<1x256x64xbf16> to vector<256x64xbf16>
    %cst_127 = arith.constant dense<0.000000e+00> : vector<32x64xf32>
    %271 = tpu.matmul %268, %270, %cst_127 {dimension_numbers = #tpu.dot_dimension_numbers<[1], [0], [0], [1], [0, 0, 1, 1], [], []>} : vector<32x256xbf16>, vector<256x64xbf16>, vector<32x64xf32> -> vector<32x64xf32>
    %272 = vector.broadcast %14 : vector<1x64xf32> to vector<32x64xf32>
    %273 = arith.addf %271, %272 : vector<32x64xf32>
    %274 = arith.addf %198, %273 : vector<32x64xf32>
    %275 = vector.shape_cast %274 : vector<32x64xf32> to vector<2x16x64xf32>
    %c0_128 = arith.constant 0 : index
    %c0_129 = arith.constant 0 : index
    %c0_130 = arith.constant 0 : index
    %276 = vector.load %arg8[%c0_128, %c0_129, %c0_130] : memref<2x16x64xf32, #tpu.memory_space<vmem>>, vector<2x16x64xf32>
    tpu.vector_store %arg8[%c0_128, %c0_129, %c0_130], %275 {strides = array<i32>} : memref<2x16x64xf32, #tpu.memory_space<vmem>>, vector<2x16x64xf32>,
    return
  }
  func.func @transform_0(%arg0: i32, %arg1: i32) -> (i32, i32, i32) {
    %c0_i32 = arith.constant 0 : i32
    %c0_i32_0 = arith.constant 0 : i32
    %c0_i32_1 = arith.constant 0 : i32
    return %arg0, %c0_i32, %c0_i32_0 : i32, i32, i32
  }
  func.func @transform_1(%arg0: i32, %arg1: i32) -> (i32, i32, i32) {
    %c0_i32 = arith.constant 0 : i32
    %c0_i32_0 = arith.constant 0 : i32
    %c0_i32_1 = arith.constant 0 : i32
    return %arg1, %c0_i32, %c0_i32_0 : i32, i32, i32
  }
  func.func @transform_2(%arg0: i32, %arg1: i32) -> (i32, i32, i32) {
    %c0_i32 = arith.constant 0 : i32
    %c0_i32_0 = arith.constant 0 : i32
    %c0_i32_1 = arith.constant 0 : i32
    return %arg1, %c0_i32, %c0_i32_0 : i32, i32, i32
  }
  func.func @transform_3(%arg0: i32, %arg1: i32) -> (i32, i32, i32, i32) {
    %c0_i32 = arith.constant 0 : i32
    %c0_i32_0 = arith.constant 0 : i32
    %c0_i32_1 = arith.constant 0 : i32
    %c0_i32_2 = arith.constant 0 : i32
    return %arg1, %c0_i32, %c0_i32_0, %c0_i32_1 : i32, i32, i32, i32
  }
  func.func @transform_4(%arg0: i32, %arg1: i32) -> (i32, i32, i32) {
    %c0_i32 = arith.constant 0 : i32
    %c0_i32_0 = arith.constant 0 : i32
    %c0_i32_1 = arith.constant 0 : i32
    return %arg1, %c0_i32, %c0_i32_0 : i32, i32, i32
  }
  func.func @transform_5(%arg0: i32, %arg1: i32) -> (i32, i32, i32) {
    %c0_i32 = arith.constant 0 : i32
    %c0_i32_0 = arith.constant 0 : i32
    %c0_i32_1 = arith.constant 0 : i32
    return %arg1, %c0_i32, %c0_i32_0 : i32, i32, i32
  }
  func.func @transform_6(%arg0: i32, %arg1: i32) -> (i32, i32, i32) {
    %c0_i32 = arith.constant 0 : i32
    %c0_i32_0 = arith.constant 0 : i32
    %c0_i32_1 = arith.constant 0 : i32
    return %arg0, %c0_i32, %c0_i32_0 : i32, i32, i32
  }
}

</mosaic_0001>

<bundles_post_ra>
// kernel: tpu_custom_call.1
= control target key start
LH: loop header
LB: loop body
LE: loop exit
PB: predicated region body
PF: predicated region fallthrough
CT: control target
= control target key end

     0   :  { %11 = vsyncpa [#allocation3], 0  ;;  %s10906_s0 = inlined_call_operand.hbm [shape: f32[2,16,64], index: 0, kind: input, shape index: {}, may-alias: {0,6}]   ;;  %s10907_s1 = inlined_call_operand.vmem [shape: f32[2,8,256], index: 1, kind: input, shape index: {}]   ;;  %s10908_s2 = inlined_call_operand.vmem [shape: bf16[2,64,192], index: 2, kind: input, shape index: {}]   ;;  %s10909_s3 = inlined_call_operand.vmem [shape: bf16[2,8,8,64], index: 3, kind: input, shape index: {}]   ;;  %s10910_s4 = inlined_call_operand.vmem [shape: bf16[2,64,256], index: 4, kind: input, shape index: {}]   ;;  %s10911_s5 = inlined_call_operand.vmem [shape: bf16[2,256,64], index: 5, kind: input, shape index: {}]   ;;  %s10912_s6 = inlined_call_operand.hbm [shape: f32[2,16,64], index: 6, kind: output, shape index: {}, may-alias: {0,6}]  }
   0x1   :  { %12 = vsyncpa [#allocation4], 0  ;;  %s8612_s21 = smov 0   ;;  %s8614_s22 = smov 0  }
   0x2   :  { %s8616_s23 = smov 0  }
   0x3 LB: > { %s7534_s24 = sadd.s32 4294967295, %s8548_s23   ;;  %s27_s25 = sadd.s32 1, %s8544_s22  ;;  %s8548_s23 = sphi %s8616_s23, %s18_s23   ;;  %s8544_s22 = sphi %s8614_s22, %s10955_s22   ;;  %s8540_s21 = sphi %s8612_s21, %s10954_s21  }
   0x4   : > { %p28_p0 = scmp.ge.s32.totalorder %s27_s25, 2  ;;  %p7535_p1 = scmp.ge.s32.totalorder %s8548_s23, 1 }
   0x5   : > { %p217_p2 = scmp.lt.s32.totalorder %s8548_s23, 3  ;;  %p8639_p4 = scmp.eq.s32.totalorder %s7534_s24, 0 }
   0x6   : > { %s10957_s25 = smov (%p28_p0, %s27_s25), 0  ;;  %s8550_s28 = smov [#allocation2]  }
   0x7   : > { %p8633_p3 = pnand %p7535_p1, %p217_p2  ;;  %s233_s29 = sshll.u32 %s8550_s28, 4  ;;  %s234_s29 = int_to_ptr.vmem [resolvable:$true] %s233_s29 }
   0x8   : > { %s10932_s27 = scalar_select %p8639_p4, 1, 0 }
   0x9   : > { %s10931_s26 = scalar_select %p8633_p3, 1, 0 }
   0xa   : > { %p8182_p5 = pneg %p8633_p3  ;;  %s8464_s9 = scalar_lea.hbm %s10906_s0, 512 }
   0xb   : > { %p8465_p7 = scmp.ne.s32.totalorder %s10906_s0, %s8464_s9  ;;  %p8471_p11 = scmp.lt.u32.totalorder %s8464_s9, %s10906_s0 }
   0xc   : > { %p8647_p6 = pnand %p8639_p4, %p8182_p5 }
   0xe   : > { %p8466_p8 = pneg %p8647_p6 }
  0x10   : > { %p8467_p9 = pnand %p8466_p8, %p8465_p7 }
  0x12   : > { %p8468_p10 = pneg %p8467_p9 }
  0x14   : > { %p8473_p12 = pnand %p8471_p11, %p8468_p10 }
  0x16   : > { %8476 = shalt.err (!%p8473_p12)
}
  0x17   : > { %s8477_s14 = scalar_lea.vmem %s234_s29, 512  ;;  %p8485_p2 = scmp.lt.s32.totalorder %s234_s29, %s234_s29 }
  0x18   : > { %p8478_p13 = scmp.ne.s32.totalorder %s234_s29, %s8477_s14  ;;  %p8486_p5 = scmp.lt.s32.totalorder %s8477_s14, %s8477_s14 }
  0x1a   : > { %p8480_p0 = pnand %p8478_p13, %p8466_p8  ;;  %p8487_p4 = por %p8486_p5, %p8485_p2 }
  0x1c   : > { %p8481_p1 = pneg %p8480_p0 }
  0x1e   : > { %p8488_p3 = pnand %p8487_p4, %p8481_p1 }
  0x20   : > { %8491 = shalt.err (!%p8488_p3)
}
  0x21   : > { %s8551_s15 = smov 128   ;;  %s8552_s16 = smov 8  }
  0x22   : > { %8185 = dma.hbm_to_vmem [thread:$0]  (!%p8647_p6), %s10906_s0, 512, %s234_s29, [#allocation3], %s8551_s15, %s8551_s15, %s8552_s16  }
  0x23   : > { %p10934_p7 = scmp.ne.s32.totalorder %s10931_s26, 0 }
  0x25   : > { %289 = sbr.rel (%p10934_p7) target bundleno = 3506 (0xdb2), region = 44 }
  0x2c   : > { %p10935_p9 = scmp.ne.s32.totalorder %s10932_s27, 0 }
  0x2e   : > { %8531 = dma.done.wait (%p10935_p9), [#allocation3], 512  }
  0x2f   : > { %8533 = vsyncadd (%p10935_p9), [#allocation3], 4294966784  ;;  %p335_p3 = scmp.lt.s32.totalorder %s8540_s21, 1  ;;  %p7550_p4 = scmp.ne.s32.totalorder %s8540_s21, 0 }
  0x30   : > { %v366_v0 = vld [vmem:[#allocation2] sm:$0xff] (!%p7550_p4)  ;;  %vm370_vm0 = vcmask (!%p7550_p4), 523264   ;;  %v367_v1 = vld [vmem:[#allocation2 + $0x8] sm:$0xff] (!%p7550_p4)  ;;  %v368_v2 = vld [vmem:[#allocation2 + $0x10] sm:$0xff] (!%p7550_p4) }
  0x31   : > { %s336_s19 = scalar_select %p335_p3, %s8540_s21, 1 }
  0x32   : > { %365 = sbr.rel (%p7550_p4) target bundleno = 57 (0x39), region = 52  ;;  %371 = vst.msk [vmem:[#allocation5] sm:$0xff] (!%p7550_p4), %vm370_vm0, %v366_v0  ;;  %372 = vst.msk [vmem:[#allocation5 + $0x8] sm:$0xff] (!%p7550_p4), %vm370_vm0, %v367_v1  ;;  %v369_v3 = vld [vmem:[#allocation2 + $0x18] sm:$0xff] (!%p7550_p4) }
  0x33   : > { %s7749_s20 = sshll.u32 %s336_s19, 4  ;;  %s7750_s28 = sshll.u32 %s336_s19, 6  ;;  %373 = vst.msk [vmem:[#allocation5 + $0x10] sm:$0xff] (!%p7550_p4), %vm370_vm0, %v368_v2  ;;  %374 = vst.msk [vmem:[#allocation5 + $0x18] sm:$0xff] (!%p7550_p4), %vm370_vm0, %v369_v3 }
  0x34   : > { %s8678_s8 = scalar_lea.vmem %s10907_s1, %s7749_s20  ;;  %s8683_s9 = scalar_lea.vmem %s10908_s2, %s7750_s28 }
  0x35   : > { %s7751_s10 = sshll.u32 %s336_s19, 5  ;;  %s8688_s12 = scalar_lea.vmem %s10910_s4, %s7750_s28 }
  0x36   : > { %s8693_s15 = scalar_lea.vmem %s10909_s3, %s7751_s10  ;;  %s7753_s16 = sshll.u32 %s336_s19, 7 }
  0x37   : > { %s8698_s20 = scalar_lea.vmem %s10911_s5, %s7753_s16 }
  0x39 PF: > { %v375_v4 = vld [vmem:[#allocation5] sm:$0xff]  ;;  %vm390_vm1 = vcmask 523264   ;;  %v376_v5 = vld [vmem:[#allocation5 + $0x8] sm:$0xff]  ;;  %v8244_v24 = vld [vmem:[%s8683_s9 + $0x14] ss:$8 sps:$4 sm:$0xff]   ;;  %v10916_v26 = vmov 0   ;;  %v10918_v40 = vlaneseq }
  0x3a   : > { %v391_v6 = vsel %vm390_vm1, %v375_v4, 0.0  ;;  %v394_v7 = vsel %vm390_vm1, %v376_v5, 0.0  ;;  %v377_v8 = vld [vmem:[#allocation5 + $0x10] sm:$0xff]  ;;  %v378_v19 = vld [vmem:[#allocation5 + $0x18] sm:$0xff]  ;;  %v8241_v22 = vld [vmem:[%s8683_s9 + $0x4] ss:$8 sps:$4 sm:$0xff]   ;;  %556 = vmatprep.mubr.bf16.mxu0 %v10916_v26  ;;  %566 = vmatprep.mubr.bf16.mxu1 %v10916_v26 }
  0x3b   : > { %392 = vadd.xlane.f32.xlu0 %v391_v6  ;;  %v397_v9 = vsel %vm390_vm1, %v377_v8, 0.0  ;;  %v400_v21 = vsel %vm390_vm1, %v378_v19, 0.0  ;;  %v8243_v23 = vld [vmem:[%s8683_s9] ss:$8 sps:$4 sm:$0xff]   ;;  %524 = vmatprep.subr.bf16.mxu0 %v8241_v22  ;;  %v8246_v25 = vld [vmem:[%s8683_s9 + $0x10] ss:$8 sps:$4 sm:$0xff]  }
  0x3c   : > { %8166 = vmatprep.subr.bf16.mxu1 %v8241_v22  ;;  %525 = vmatpush1.bf16.msra.mxu0 %v8243_v23  ;;  %v8247_v27 = vld [vmem:[%s8683_s9 + $0x24] ss:$8 sps:$4 sm:$0xff]   ;;  %v8249_v28 = vld [vmem:[%s8683_s9 + $0x20] ss:$8 sps:$4 sm:$0xff]   ;;  %v8250_v29 = vld [vmem:[%s8683_s9 + $0x34] ss:$8 sps:$4 sm:$0xff]  }
  0x3d   : > { %526 = vmatprep.subr.bf16.mxu0 %v8244_v24  ;;  %8170 = vmatpush1.bf16.msra.mxu1 %v8243_v23  ;;  %v8252_v30 = vld [vmem:[%s8683_s9 + $0x30] ss:$8 sps:$4 sm:$0xff]   ;;  %v8727_v43 = vshrl.u32 %v10918_v40, 7  ;;  %v379_v48 = vld [vmem:[%s8678_s8] sm:$0xff]  ;;  %s8554_s21 = smov 56   ;;  %s8555_s19 = smov 64  }
  0x3e   : > { %8167 = vmatprep.subr.bf16.mxu1 %v8244_v24  ;;  %s8556_s28 = smov 48   ;;  %s8557_s30 = smov 40   ;;  %v10919_v22 = vmov 0.0   ;;  %vm8567_vm2 = vmmov 0   ;;  %v380_v23 = vld [vmem:[%s8678_s8 + $0x8] sm:$0xff]  ;;  %vm2369_vm3 = vcmask 64512  }
  0x3f   : > { %395 = vadd.xlane.f32.xlu0 %v394_v7  ;;  %10936 = vst [vmem:[#allocation8_spill] sm:$0xff] %v8727_v43  ;;  %v446_v47 = vsub.s32 0, %v8727_v43  ;;  %v454_v54 = vsub.s32 1, %v8727_v43  ;;  %s8558_s7 = smov 120   ;;  %s8559_s29 = smov 112   ;;  %vm2746_vm6 = vcmask 130048  }
  0x40   : > { %527 = vmatpush1.bf16.msra.mxu0 %v8246_v25  ;;  %s8560_s26 = smov 104   ;;  %s8561_s9 = smov 32   ;;  %vm3297_vm7 = vcmask 1043456  }
  0x41   : > { %528 = vmatprep.subr.bf16.mxu0 %v8247_v27  ;;  %8171 = vmatpush1.bf16.msra.mxu1 %v8246_v25  ;;  %v447_v53 = vrot.slane %v379_v48, %v446_v47  ;;  %v455_v58 = vrot.slane %v379_v48, %v454_v54  ;;  %s8563_s10 = smov 24   ;;  %s8564_s11 = smov 16  }
  0x42   : > { %8168 = vmatprep.subr.bf16.mxu1 %v8247_v27  ;;  %s8565_s27 = smov 8   ;;  %s8566_s13 = smov 96  }
  0x43   : > { %398 = vadd.xlane.f32.xlu0 %v397_v9  ;;  %s8568_s14 = smov 88   ;;  %s8569_s16 = smov 80  }
  0x44   : > { %529 = vmatpush1.bf16.msra.mxu0 %v8249_v28  ;;  %s8570_s17 = smov 72   ;;  %p10867_p6 = scmp.eq.s32.totalorder %s7534_s24, 1 }
  0x45   : > { %530 = vmatprep.subr.bf16.mxu0 %v8250_v29  ;;  %8172 = vmatpush1.bf16.msra.mxu1 %v8249_v28  ;;  %v8571_v28 = vmov 1983009808  }
  0x46   : > { %8169 = vmatprep.subr.bf16.mxu1 %v8250_v29  ;;  %v716_v29 = vunpack.c.l.s4 %v8571_v28 }
  0x48   : > { %531 = vmatpush1.bf16.msra.mxu0 %v8252_v30 }
  0x49   : > { %8173 = vmatpush1.bf16.msra.mxu1 %v8252_v30  ;;  %7896 = vmatprep.subr.bf16.mxu0 %v10919_v22 }
  0x4a   : > { %7878 = vmatprep.subr.bf16.mxu1 %v10919_v22 }
  0xc8   : > { %v393_v10 = vpop.xlane.xlu0 %392 }
  0xc9   : > { %v404_v11 = vmul.f32 0.015625, %v393_v10 }
  0xcb   : > { %v8704_v12 = vsub.f32 %v375_v4, %v404_v11 }
  0xcc   : > { %v396_v13 = vpop.xlane.xlu0 %395 }
  0xcd   : > { %v405_v14 = vmul.f32 0.015625, %v396_v13  ;;  %v412_v15 = vmul.f32 %v8704_v12, %v8704_v12 }
  0xcf   : > { %v8708_v16 = vsub.f32 %v376_v5, %v405_v14  ;;  %v416_v17 = vsel %vm390_vm1, %v412_v15, 0.0  ;;  %v472_v14 = vsub.s32 2, %v8727_v43 }
  0xd0   : > { %417 = vadd.xlane.f32.xlu1 %v416_v17  ;;  %v399_v31 = vpop.xlane.xlu0 %398 }
  0xd1   : > { %v413_v18 = vmul.f32 %v8708_v16, %v8708_v16  ;;  %v406_v32 = vmul.f32 0.015625, %v399_v31  ;;  %v8738_v15 = vrot.slane %v379_v48, %v472_v14  ;;  %v8805_v24 = vrot.slane %v380_v23, %v472_v14 }
  0xd3   : > { %v419_v20 = vsel %vm390_vm1, %v413_v18, 0.0  ;;  %v410_v33 = vsub.f32 %v377_v8, %v406_v32  ;;  %v8572_v32 = vmov 1934713408  }
  0xd4   : > { %420 = vadd.xlane.f32.xlu1 %v419_v20 }
  0xd5   : > { %v414_v34 = vmul.f32 %v410_v33, %v410_v33 }
  0xd7   : > { %v422_v35 = vsel %vm390_vm1, %v414_v34, 0.0  ;;  %v717_v34 = vunpack.c.0.s8 %v716_v29 }
  0xd8   : > { %401 = vadd.xlane.f32.xlu1 %v400_v21  ;;  %423 = vadd.xlane.f32.xlu0 %v422_v35 }
 0x15d   : > { %v418_v36 = vpop.xlane.xlu1 %417 }
 0x15e   : > { %v428_v37 = vmul.f32 0.015625, %v418_v36 }
 0x160   : > { %v432_v38 = vadd.f32 1e-05, %v428_v37 }
 0x161   : > { %v421_v39 = vpop.xlane.xlu1 %420 }
 0x162   : > { %8281 = vrsqrt.f32 %v432_v38  ;;  %v429_v41 = vmul.f32 0.015625, %v421_v39  ;;  %v8842_v38 = vsub.s32 %v717_v34, %v8727_v43 }
 0x164   : > { %v433_v42 = vadd.f32 1e-05, %v429_v41 }
 0x165   : > { %v402_v44 = vpop.xlane.xlu1 %401  ;;  %v424_v63 = vpop.xlane.xlu0 %423 }
 0x166   : > { %8283 = vrsqrt.f32 %v433_v42  ;;  %v407_v45 = vmul.f32 0.015625, %v402_v44  ;;  %v430_v0 = vmul.f32 0.015625, %v424_v63 }
 0x168   : > { %v411_v46 = vsub.f32 %v378_v19, %v407_v45  ;;  %v434_v1 = vadd.f32 1e-05, %v430_v0 }
 0x16a   : > { %v415_v49 = vmul.f32 %v411_v46, %v411_v46  ;;  %8285 = vrsqrt.f32 %v434_v1 }
 0x16c   : > { %v8282_v50 = vpop.eup %8281  ;;  %v425_v51 = vsel %vm390_vm1, %v415_v49, 0.0 }
 0x16d   : > { %v440_v52 = vmul.f32 %v8282_v50, %v8704_v12  ;;  %426 = vadd.xlane.f32.xlu1 %v425_v51 }
 0x16f   : > { %v448_v57 = vmul.f32 %v447_v53, %v440_v52 }
 0x170   : > { %v8284_v55 = vpop.eup %8283 }
 0x171   : > { %v441_v56 = vmul.f32 %v8284_v55, %v8708_v16  ;;  %v456_v60 = vadd.f32 %v455_v58, %v448_v57 }
 0x173   : > { %v449_v59 = vmul.f32 %v447_v53, %v441_v56 }
 0x174   : > { %v8286_v5 = vpop.eup %8285 }
 0x175   : > { %v457_v61 = vadd.f32 %v455_v58, %v449_v59  ;;  %v442_v6 = vmul.f32 %v8286_v5, %v410_v33  ;;  %v780_v33 = vunpack.c.l.s4 %v8572_v32 }
 0x177   : > { %v460_v62 = vpack.c.bf16 %v457_v61, %v456_v60  ;;  %v450_v7 = vmul.f32 %v447_v53, %v442_v6  ;;  %v781_v37 = vunpack.c.0.s8 %v780_v33 }
 0x179   : > { %7559 = vmatmul.mubr.msk.bf16.vlgmr.msra.gmra.mrb[0].mxu0 %vm390_vm1, %v460_v62  ;;  %v458_v11 = vadd.f32 %v455_v58, %v450_v7  ;;  %v8845_v47 = vsub.s32 %v781_v37, %v8727_v43 }
 0x17a   : > { %7898 = vmatprep.mubr.msk.bf16.mxu0 %vm8567_vm2, %v10919_v22 }
 0x1fa   : > { %v427_v2 = vpop.xlane.xlu1 %426 }
 0x1fb   : > { %v431_v3 = vmul.f32 0.015625, %v427_v2 }
 0x1fd   : > { %v435_v4 = vadd.f32 1e-05, %v431_v3 }
 0x1ff   : > { %8287 = vrsqrt.f32 %v435_v4 }
 0x209   : > { %v8288_v8 = vpop.eup %8287 }
 0x20a   : > { %v443_v9 = vmul.f32 %v8288_v8, %v411_v46 }
 0x20c   : > { %v451_v10 = vmul.f32 %v447_v53, %v443_v9 }
 0x20e   : > { %v459_v12 = vadd.f32 %v455_v58, %v451_v10 }
 0x210   : > { %v461_v13 = vpack.c.bf16 %v459_v12, %v458_v11 }
 0x212   : > { %7560 = vmatmul.mubr.msk.bf16.vlgmr.msra.gmra.mrb[0].mxu1 %vm390_vm1, %v461_v13 }
 0x213   : > { %7880 = vmatprep.mubr.msk.bf16.mxu1 %vm8567_vm2, %v10919_v22 }
 0x24c   : > { %v558_v16 = vpop.f32.mrb[0].mxu0 }
 0x24d   : > { %v8741_v17 = vadd.f32 %v558_v16, %v8738_v15  ;;  %v560_v18 = vpop.f32.mrb[1].mxu0 }
 0x24e   : > { %v562_v19 = vpop.f32.mrb[2].mxu0  ;;  %v8812_v25 = vadd.f32 %v560_v18, %v8805_v24 }
 0x24f   : > { %v564_v20 = vpop.f32.mrb[3].mxu0  ;;  %627 = vrot.lane.b32.xlu1 %v8741_v17, %s8554_s21  ;;  %621 = vrot.lane.b32.xlu0 %v8741_v17, %s8555_s19  ;;  %v8748_v21 = vadd.f32 %v562_v19, %v8738_v15 }
 0x250   : > { %v8829_v27 = vadd.f32 %v564_v20, %v8805_v24 }
 0x253   : > { %623 = vrot.lane.b32.xlu1 %v8748_v21, %s8555_s19  ;;  %633 = vrot.lane.b32.xlu0 %v8741_v17, %s8556_s28 }
 0x257   : > { %629 = vrot.lane.b32.xlu1 %v8748_v21, %s8554_s21  ;;  %639 = vrot.lane.b32.xlu0 %v8741_v17, %s8557_s30 }
 0x25b   : > { %635 = vrot.lane.b32.xlu1 %v8748_v21, %s8556_s28  ;;  %579 = vrot.lane.b32.xlu0 %v8741_v17, %s8558_s7 }
 0x25f   : > { %641 = vrot.lane.b32.xlu1 %v8748_v21, %s8557_s30  ;;  %585 = vrot.lane.b32.xlu0 %v8741_v17, %s8559_s29 }
 0x263   : > { %581 = vrot.lane.b32.xlu1 %v8748_v21, %s8558_s7  ;;  %591 = vrot.lane.b32.xlu0 %v8741_v17, %s8560_s26 }
 0x267   : > { %587 = vrot.lane.b32.xlu1 %v8748_v21, %s8559_s29  ;;  %645 = vrot.lane.b32.xlu0 %v8741_v17, %s8561_s9 }
 0x26b   : > { %593 = vrot.lane.b32.xlu1 %v8748_v21, %s8560_s26  ;;  %651 = vrot.lane.b32.xlu0 %v8741_v17, %s8563_s10 }
 0x26f   : > { %647 = vrot.lane.b32.xlu1 %v8748_v21, %s8561_s9  ;;  %657 = vrot.lane.b32.xlu0 %v8741_v17, %s8564_s11 }
 0x273   : > { %653 = vrot.lane.b32.xlu1 %v8748_v21, %s8563_s10  ;;  %663 = vrot.lane.b32.xlu0 %v8741_v17, %s8565_s27 }
 0x277   : > { %659 = vrot.lane.b32.xlu1 %v8748_v21, %s8564_s11  ;;  %597 = vrot.lane.b32.xlu0 %v8741_v17, %s8566_s13 }
 0x27b   : > { %665 = vrot.lane.b32.xlu1 %v8748_v21, %s8565_s27  ;;  %603 = vrot.lane.b32.xlu0 %v8741_v17, %s8568_s14 }
 0x27f   : > { %599 = vrot.lane.b32.xlu1 %v8748_v21, %s8566_s13  ;;  %609 = vrot.lane.b32.xlu0 %v8741_v17, %s8569_s16 }
 0x283   : > { %605 = vrot.lane.b32.xlu1 %v8748_v21, %s8568_s14  ;;  %615 = vrot.lane.b32.xlu0 %v8741_v17, %s8570_s17 }
 0x287   : > { %611 = vrot.lane.b32.xlu1 %v8748_v21, %s8569_s16  ;;  %671 = vrot.lane.b32.xlu0 %v8812_v25, %s8558_s7 }
 0x28b   : > { %617 = vrot.lane.b32.xlu1 %v8748_v21, %s8570_s17  ;;  %683 = vrot.lane.b32.xlu0 %v8812_v25, %s8560_s26 }
 0x28f   : > { %677 = vrot.lane.b32.xlu1 %v8812_v25, %s8559_s29  ;;  %689 = vrot.lane.b32.xlu0 %v8812_v25, %s8566_s13 }
 0x293   : > { %695 = vrot.lane.b32.xlu1 %v8812_v25, %s8568_s14 }
 0x297   : > { %673 = vrot.lane.b32.xlu1 %v8829_v27, %s8558_s7 }
 0x29b   : > { %679 = vrot.lane.b32.xlu1 %v8829_v27, %s8559_s29 }
 0x29f   : > { %685 = vrot.lane.b32.xlu1 %v8829_v27, %s8560_s26 }
 0x2a3   : > { %691 = vrot.lane.b32.xlu1 %v8829_v27, %s8566_s13 }
 0x2a7   : > { %697 = vrot.lane.b32.xlu1 %v8829_v27, %s8568_s14 }
 0x2c1   : > { %v628_v30 = vpop.permute.xlu1 %627  ;;  %v622_v31 = vpop.permute.xlu0 %621 }
 0x2c5   : > { %v624_v35 = vpop.permute.xlu1 %623  ;;  %v634_v36 = vpop.permute.xlu0 %633 }
 0x2c6   : > { %v849_v39 = vcombine.low %v622_v31, %v634_v36  ;;  %v850_v41 = vcombine.high %v622_v31, %v634_v36 }
 0x2c8   : > { %v857_v48 = vrot.slane %v849_v39, %v8842_v38  ;;  %v864_v49 = vrot.slane %v850_v41, %v8842_v38 }
 0x2c9   : > { %v630_v42 = vpop.permute.xlu1 %629  ;;  %v640_v44 = vpop.permute.xlu0 %639 }
 0x2ca   : > { %v865_v45 = vcombine.low %v628_v30, %v640_v44  ;;  %v866_v46 = vcombine.high %v628_v30, %v640_v44 }
 0x2cc   : > { %v873_v50 = vrot.slane %v865_v45, %v8842_v38  ;;  %v880_v51 = vrot.slane %v866_v46, %v8842_v38 }
 0x2cd   : > { %v636_v52 = vpop.permute.xlu1 %635  ;;  %v580_v53 = vpop.permute.xlu0 %579 }
 0x2ce   : > { %v913_v54 = vcombine.low %v857_v48, %v873_v50  ;;  %v914_v55 = vcombine.high %v857_v48, %v873_v50  ;;  %v929_v56 = vcombine.low %v864_v49, %v880_v51  ;;  %v930_v57 = vcombine.high %v864_v49, %v880_v51 }
 0x2cf   : > { %v1257_v58 = vcombine.low %v624_v35, %v636_v52  ;;  %v1258_v59 = vcombine.high %v624_v35, %v636_v52 }
 0x2d0   : > { %v921_v60 = vrot.slane %v913_v54, %v8845_v47  ;;  %v928_v61 = vrot.slane %v914_v55, %v8845_v47  ;;  %v937_v62 = vrot.slane %v929_v56, %v8845_v47  ;;  %v944_v63 = vrot.slane %v930_v57, %v8845_v47 }
 0x2d1   : > { %v642_v0 = vpop.permute.xlu1 %641  ;;  %v586_v1 = vpop.permute.xlu0 %585  ;;  %v1265_v8 = vrot.slane %v1257_v58, %v8842_v38  ;;  %v1272_v9 = vrot.slane %v1258_v59, %v8842_v38 }
 0x2d2   : > { %v7577_v2 = vcombine.low %v921_v60, %v928_v61  ;;  %v7579_v3 = vcombine.high %v921_v60, %v928_v61  ;;  %v7581_v4 = vcombine.low %v937_v62, %v944_v63  ;;  %v7583_v5 = vcombine.high %v937_v62, %v944_v63 }
 0x2d3   : > { %v1273_v6 = vcombine.low %v630_v42, %v642_v0  ;;  %v1274_v7 = vcombine.high %v630_v42, %v642_v0  ;;  %v713_v10 = vcombine.low %v8741_v17, %v586_v1  ;;  %v714_v11 = vcombine.high %v8741_v17, %v586_v1 }
 0x2d4   : > { %v8862_v18 = vrot.slane %v7577_v2, %v8842_v38  ;;  %v8865_v19 = vrot.slane %v7579_v3, %v8842_v38  ;;  %v8868_v28 = vrot.slane %v7581_v4, %v8842_v38  ;;  %v8871_v29 = vrot.slane %v7583_v5, %v8842_v38 }
 0x2d5   : > { %v1281_v12 = vrot.slane %v1273_v6, %v8842_v38  ;;  %v1288_v13 = vrot.slane %v1274_v7, %v8842_v38  ;;  %v582_v14 = vpop.permute.xlu1 %581  ;;  %v592_v16 = vpop.permute.xlu0 %591  ;;  %v721_v33 = vrot.slane %v713_v10, %v8842_v38  ;;  %v728_v34 = vrot.slane %v714_v11, %v8842_v38 }
 0x2d6   : > { %v729_v20 = vcombine.low %v580_v53, %v592_v16  ;;  %v730_v23 = vcombine.high %v580_v53, %v592_v16  ;;  %v1865_v51 = vcombine.low %v8862_v18, %v8865_v19  ;;  %v1897_v52 = vcombine.low %v8868_v28, %v8871_v29 }
 0x2d7   : > { %v1321_v17 = vcombine.low %v1265_v8, %v1281_v12  ;;  %v1322_v30 = vcombine.high %v1265_v8, %v1281_v12  ;;  %v1337_v31 = vcombine.low %v1272_v9, %v1288_v13  ;;  %v1338_v32 = vcombine.high %v1272_v9, %v1288_v13 }
 0x2d8   : > { %v737_v35 = vrot.slane %v729_v20, %v8842_v38  ;;  %v744_v36 = vrot.slane %v730_v23, %v8842_v38  ;;  %v8894_v3 = vrot.slane %v1865_v51, %v8845_v47  ;;  %v8897_v4 = vrot.slane %v1897_v52, %v8845_v47 }
 0x2d9   : > { %v1329_v37 = vrot.slane %v1321_v17, %v8845_v47  ;;  %v1336_v39 = vrot.slane %v1322_v30, %v8845_v47  ;;  %v588_v41 = vpop.permute.xlu1 %587  ;;  %v8879_v42 = vpop.permute.xlu0 %645  ;;  %v1345_v49 = vrot.slane %v1337_v31, %v8845_v47  ;;  %v1352_v50 = vrot.slane %v1338_v32, %v8845_v47 }
 0x2da   : > { %v777_v44 = vcombine.low %v721_v33, %v737_v35  ;;  %v778_v45 = vcombine.high %v721_v33, %v737_v35  ;;  %v793_v46 = vcombine.low %v728_v34, %v744_v36  ;;  %v794_v48 = vcombine.high %v728_v34, %v744_v36 }
 0x2db   : > { %v1121_v57 = vcombine.low %v8748_v21, %v588_v41  ;;  %v1122_v58 = vcombine.high %v8748_v21, %v588_v41  ;;  %v7585_v61 = vcombine.low %v1329_v37, %v1336_v39  ;;  %v7587_v62 = vcombine.high %v1329_v37, %v1336_v39 }
 0x2dc   : > { %v785_v53 = vrot.slane %v777_v44, %v8845_v47  ;;  %v792_v54 = vrot.slane %v778_v45, %v8845_v47  ;;  %v801_v55 = vrot.slane %v793_v46, %v8845_v47  ;;  %v808_v56 = vrot.slane %v794_v48, %v8845_v47 }
 0x2dd   : > { %v594_v59 = vpop.permute.xlu1 %593  ;;  %v652_v60 = vpop.permute.xlu0 %651  ;;  %v7589_v5 = vcombine.low %v1345_v49, %v1352_v50  ;;  %v7591_v6 = vcombine.high %v1345_v49, %v1352_v50  ;;  %v1129_v21 = vrot.slane %v1121_v57, %v8842_v38  ;;  %v1136_v9 = vrot.slane %v1122_v58, %v8842_v38 }
 0x2de   : > { %v7561_v63 = vcombine.low %v785_v53, %v792_v54  ;;  %v7563_v0 = vcombine.high %v785_v53, %v792_v54  ;;  %v1137_v1 = vcombine.low %v582_v14, %v594_v59  ;;  %v1138_v2 = vcombine.high %v582_v14, %v594_v59 }
 0x2df   : > { %v7565_v7 = vcombine.low %v801_v55, %v808_v56  ;;  %v7567_v8 = vcombine.high %v801_v55, %v808_v56  ;;  %v8912_v20 = vrot.slane %v7585_v61, %v8842_v38  ;;  %v8915_v23 = vrot.slane %v7587_v62, %v8842_v38 }
 0x2e0   : > { %v1145_v10 = vrot.slane %v1137_v1, %v8842_v38  ;;  %v1152_v11 = vrot.slane %v1138_v2, %v8842_v38  ;;  %v8906_v14 = vrot.slane %v7561_v63, %v8842_v38  ;;  %v8909_v16 = vrot.slane %v7563_v0, %v8842_v38 }
 0x2e1   : > { %v8903_v12 = vpop.permute.xlu1 %647  ;;  %v658_v13 = vpop.permute.xlu0 %657  ;;  %v8918_v33 = vrot.slane %v7565_v7, %v8842_v38  ;;  %v8921_v34 = vrot.slane %v7567_v8, %v8842_v38  ;;  %v8924_v35 = vrot.slane %v7589_v5, %v8842_v38  ;;  %v8927_v36 = vrot.slane %v7591_v6, %v8842_v38 }
 0x2e2   : > { %v1185_v17 = vcombine.low %v1129_v21, %v1145_v10  ;;  %v1186_v30 = vcombine.high %v1129_v21, %v1145_v10  ;;  %v1201_v31 = vcombine.low %v1136_v9, %v1152_v11  ;;  %v1202_v32 = vcombine.high %v1136_v9, %v1152_v11 }
 0x2e3   : > { %v881_v48 = vcombine.low %v8879_v42, %v658_v13  ;;  %v2001_v51 = vcombine.low %v8912_v20, %v8915_v23  ;;  %v882_v58 = vcombine.high %v8879_v42, %v658_v13  ;;  %v1594_v62 = vcombine.high %v8906_v14, %v8909_v16 }
 0x2e4   : > { %v1193_v37 = vrot.slane %v1185_v17, %v8845_v47  ;;  %v1200_v39 = vrot.slane %v1186_v30, %v8845_v47  ;;  %v1209_v41 = vrot.slane %v1201_v31, %v8845_v47  ;;  %v1216_v44 = vrot.slane %v1202_v32, %v8845_v47 }
 0x2e5   : > { %v8933_v45 = vpop.permute.xlu1 %653  ;;  %v664_v46 = vpop.permute.xlu0 %663  ;;  %v1929_v63 = vcombine.low %v8894_v3, %v8897_v4  ;;  %v2033_v0 = vcombine.low %v8924_v35, %v8927_v36  ;;  %v889_v6 = vrot.slane %v881_v48, %v8842_v38  ;;  %v1625_v21 = vcombine.low %v8918_v33, %v8921_v34 }
 0x2e6   : > { %v897_v49 = vcombine.low %v652_v60, %v664_v46  ;;  %v898_v50 = vcombine.high %v652_v60, %v664_v46  ;;  %v8938_v52 = vpop.f32.mrb[0].mxu1  ;;  %v7569_v53 = vcombine.low %v1193_v37, %v1200_v39  ;;  %v7571_v54 = vcombine.high %v1193_v37, %v1200_v39 }
 0x2e7   : > { %v7573_v55 = vcombine.low %v1209_v41, %v1216_v44  ;;  %v7575_v56 = vcombine.high %v1209_v41, %v1216_v44  ;;  %v8940_v57 = vpop.f32.mrb[1].mxu1  ;;  %v1593_v60 = vcombine.low %v8906_v14, %v8909_v16  ;;  %v8975_v11 = vrot.slane %v2001_v51, %v8845_v47 }
 0x2e8   : > { %v905_v59 = vrot.slane %v897_v49, %v8842_v38  ;;  %v8944_v61 = vpop.f32.mrb[2].mxu1  ;;  %v8957_v42 = vrot.slane %v7569_v53, %v8842_v38  ;;  %v8960_v5 = vrot.slane %v7571_v54, %v8842_v38  ;;  %v912_v7 = vrot.slane %v898_v50, %v8842_v38 }
 0x2e9   : > { %v660_v1 = vpop.permute.xlu1 %659  ;;  %v8954_v2 = vpop.permute.xlu0 %597  ;;  %v8969_v9 = vrot.slane %v7573_v55, %v8842_v38  ;;  %v8972_v10 = vrot.slane %v7575_v56, %v8842_v38  ;;  %v1626_v13 = vcombine.high %v8918_v33, %v8921_v34  ;;  %v896_v17 = vrot.slane %v882_v58, %v8842_v38 }
 0x2ea   : > { %v8964_v8 = vpop.f32.mrb[3].mxu1  ;;  %v945_v30 = vcombine.low %v889_v6, %v905_v59  ;;  %v946_v31 = vcombine.high %v889_v6, %v905_v59  ;;  %v8981_v32 = vrot.slane %v2033_v0, %v8845_v47  ;;  %v1866_v37 = vcombine.high %v8862_v18, %v8865_v19 }
 0x2eb   : > { %v1898_v39 = vcombine.high %v8868_v28, %v8871_v29  ;;  %v2002_v41 = vcombine.high %v8912_v20, %v8915_v23  ;;  %v1729_v48 = vcombine.low %v8957_v42, %v8960_v5  ;;  %v1730_v49 = vcombine.high %v8957_v42, %v8960_v5 }
 0x2ec   : > { %v961_v50 = vcombine.low %v896_v17, %v912_v7  ;;  %v962_v51 = vcombine.high %v896_v17, %v912_v7  ;;  %v1761_v18 = vcombine.low %v8969_v9, %v8972_v10  ;;  %v2065_v19 = vcombine.low %v8975_v11, %v8981_v32 }
 0x2ed   : > { %v666_v44 = vpop.permute.xlu1 %665  ;;  %v8989_v46 = vpop.permute.xlu0 %603  ;;  %v9000_v28 = vrot.slane %v1866_v37, %v8845_v47  ;;  %v9003_v29 = vrot.slane %v1898_v39, %v8845_v47  ;;  %v9006_v20 = vrot.slane %v2002_v41, %v8845_v47  ;;  %v2034_v23 = vcombine.high %v8924_v35, %v8927_v36 }
 0x2ee   : > { %v1289_v53 = vcombine.low %v8903_v12, %v660_v1  ;;  %v1305_v54 = vcombine.low %v8933_v45, %v666_v44  ;;  %v1762_v55 = vcombine.high %v8969_v9, %v8972_v10  ;;  %v2353_v56 = vpack.c.bf16 %v2065_v19, %v1929_v63 }
 0x2ef   : > { %v1290_v58 = vcombine.high %v8903_v12, %v660_v1  ;;  %v1306_v59 = vcombine.high %v8933_v45, %v666_v44  ;;  %v9019_v5 = vrot.slane %v945_v30, %v8845_v47  ;;  %v9022_v35 = vrot.slane %v946_v31, %v8845_v47 }
 0x2f0   : > { %v9025_v36 = vrot.slane %v2034_v23, %v8845_v47  ;;  %v1313_v6 = vrot.slane %v1305_v54, %v8842_v38  ;;  %v9029_v63 = vrot.slane %v961_v50, %v8845_v47  ;;  %v2374_v12 = vsel %vm2369_vm3, %v2353_v56, 0 }
 0x2f1   : > { %v9016_v0 = vpop.permute.xlu1 %599  ;;  %v610_v42 = vpop.permute.xlu0 %609  ;;  %v1932_v45 = vcombine.high %v9000_v28, %v9003_v29  ;;  %v9035_v1 = vrot.slane %v1306_v59, %v8842_v38  ;;  %7879 = vmatpush3.bf16.xpose.msra.mxu1 %v2374_v12  ;;  %v1297_v9 = vrot.slane %v1289_v53, %v8842_v38  ;;  %v9043_v30 = vrot.slane %v962_v51, %v8845_v47 }
 0x2f2   : > { %v2068_v7 = vcombine.high %v9006_v20, %v9025_v36  ;;  %v745_v10 = vcombine.low %v8954_v2, %v610_v42  ;;  %v746_v17 = vcombine.high %v8954_v2, %v610_v42  ;;  %v9046_v31 = vrot.slane %v1290_v58, %v8842_v38  ;;  %7884 = vmatprep.subr.bf16.mxu1 %v10919_v22 }
 0x2f3   : > { %v9050_v37 = vrot.slane %v1593_v60, %v8845_v47  ;;  %v9053_v39 = vrot.slane %v1625_v21, %v8845_v47  ;;  %v7578_v44 = vcombine.low %v9019_v5, %v9022_v35  ;;  %v7580_v2 = vcombine.high %v9019_v5, %v9022_v35 }
 0x2f4   : > { %v2356_v50 = vpack.c.bf16 %v2068_v7, %v1932_v45  ;;  %v1353_v51 = vcombine.low %v1297_v9, %v1313_v6  ;;  %v1354_v19 = vcombine.high %v1297_v9, %v1313_v6  ;;  %v1369_v23 = vcombine.low %v9046_v31, %v9035_v1 }
 0x2f5   : > { %v9055_v41 = vpop.permute.xlu1 %605  ;;  %v1737_v60 = vrot.slane %v1729_v48, %v8845_v47  ;;  %v1769_v53 = vrot.slane %v1761_v18, %v8845_v47  ;;  %v1370_v54 = vcombine.high %v9046_v31, %v9035_v1  ;;  %v753_v56 = vrot.slane %v745_v10, %v8842_v38  ;;  %v616_v59 = vpop.permute.xlu0 %615 }
 0x2f6   : > { %v2515_v21 = vsel %vm2369_vm3, %v2356_v50, 0  ;;  %v760_v58 = vrot.slane %v746_v17, %v8842_v38  ;;  %v1657_v42 = vcombine.low %v9050_v37, %v9053_v39  ;;  %v1930_v48 = vcombine.high %v8894_v3, %v8897_v4 }
 0x2f7   : > { %7897 = vmatpush3.bf16.xpose.msra.mxu0 %v2515_v21  ;;  %v1793_v6 = vcombine.low %v1737_v60, %v1769_v53  ;;  %v2066_v18 = vcombine.high %v8975_v11, %v8981_v32  ;;  %v9080_v45 = vrot.slane %v1594_v62, %v8845_v47  ;;  %v9086_v7 = vrot.slane %v1626_v13, %v8845_v47 }
 0x2f8   : > { %v9089_v9 = vrot.slane %v1730_v49, %v8845_v47  ;;  %v9092_v3 = vrot.slane %v1762_v55, %v8845_v47  ;;  %7908 = vmatprep.subr.bf16.mxu0 %v10919_v22  ;;  %v761_v14 = vcombine.low %v8989_v46, %v616_v59  ;;  %v762_v16 = vcombine.high %v8989_v46, %v616_v59 }
 0x2f9   : > { %v612_v12 = vpop.permute.xlu1 %611  ;;  %v2345_v4 = vpack.c.bf16 %v1793_v6, %v1657_v42  ;;  %v2354_v11 = vpack.c.bf16 %v2066_v18, %v1930_v48  ;;  %v9098_v62 = vrot.slane %v1353_v51, %v8845_v47  ;;  %v9101_v33 = vrot.slane %v1354_v19, %v8845_v47  ;;  %v9119_v6 = vpop.permute.xlu0 %671 }
 0x2fa   : > { %v1660_v34 = vcombine.high %v9080_v45, %v9086_v7  ;;  %v1796_v13 = vcombine.high %v9089_v9, %v9092_v3  ;;  %v769_v49 = vrot.slane %v761_v14, %v8842_v38  ;;  %v776_v46 = vrot.slane %v762_v16, %v8842_v38 }
 0x2fb   : > { %7881 = vmatmul.mubr.msk.bf16.vlgmr.msra.gmra.mrb[4].mxu1 %vm2369_vm3, %v2345_v4  ;;  %v2421_v32 = vsel %vm2369_vm3, %v2354_v11, 0  ;;  %v1153_v55 = vcombine.low %v9016_v0, %v612_v12  ;;  %v1154_v50 = vcombine.high %v9016_v0, %v612_v12  ;;  %v1658_v51 = vcombine.high %v9050_v37, %v9053_v39 }
 0x2fc   : > { %7885 = vmatpush3.bf16.xpose.msra.mxu1 %v2421_v32  ;;  %v2348_v17 = vpack.c.bf16 %v1796_v13, %v1660_v34  ;;  %7886 = vmatprep.mubr.msk.bf16.mxu1 %vm8567_vm2, %v10919_v22  ;;  %v809_v19 = vcombine.low %v753_v56, %v769_v49  ;;  %v810_v21 = vcombine.high %v753_v56, %v769_v49 }
 0x2fd   : > { %v618_v10 = vpop.permute.xlu1 %617  ;;  %v825_v59 = vcombine.low %v760_v58, %v776_v46  ;;  %v826_v42 = vcombine.high %v760_v58, %v776_v46  ;;  %7890 = vmatprep.subr.bf16.mxu1 %v10919_v22  ;;  %v1794_v48 = vcombine.high %v1737_v60, %v1769_v53  ;;  %v1931_v0 = vcombine.low %v9000_v28, %v9003_v29 }
 0x2fe   : > { %7899 = vmatmul.mubr.msk.bf16.vlgmr.msra.gmra.mrb[4].mxu0 %vm2369_vm3, %v2348_v17  ;;  %v2067_v18 = vcombine.low %v9006_v20, %v9025_v36  ;;  %v1169_v12 = vcombine.low %v9055_v41, %v618_v10  ;;  %v817_v37 = vrot.slane %v809_v19, %v8845_v47  ;;  %v824_v39 = vrot.slane %v810_v21, %v8845_v47  ;;  %v684_v21 = vpop.permute.xlu0 %683 }
 0x2ff   : > { %v833_v56 = vrot.slane %v825_v59, %v8845_v47  ;;  %v840_v58 = vrot.slane %v826_v42, %v8845_v47  ;;  %7910 = vmatprep.mubr.msk.bf16.mxu0 %vm8567_vm2, %v10919_v22  ;;  %v1161_v60 = vrot.slane %v1153_v55, %v8842_v38  ;;  %v1170_v29 = vcombine.high %v9055_v41, %v618_v10 }
 0x300   : > { %v2355_v28 = vpack.c.bf16 %v2067_v18, %v1931_v0  ;;  %v1177_v20 = vrot.slane %v1169_v12, %v8842_v38  ;;  %v7562_v36 = vcombine.low %v817_v37, %v824_v39  ;;  %v7564_v53 = vcombine.high %v817_v37, %v824_v39 }
 0x301   : > { %v678_v4 = vpop.permute.xlu1 %677  ;;  %v1168_v11 = vrot.slane %v1154_v50, %v8842_v38  ;;  %v2346_v14 = vpack.c.bf16 %v1794_v48, %v1658_v51  ;;  %v7566_v16 = vcombine.low %v833_v56, %v840_v58  ;;  %v1184_v34 = vrot.slane %v1170_v29, %v8842_v38 }
 0x302   : > { %v1217_v13 = vcombine.low %v1161_v60, %v1177_v20  ;;  %v1218_v32 = vcombine.high %v1161_v60, %v1177_v20  ;;  %v7582_v49 = vcombine.low %v9029_v63, %v9043_v30  ;;  %v7584_v46 = vcombine.high %v9029_v63, %v9043_v30 }
 0x303   : > { %v7568_v55 = vcombine.high %v833_v56, %v840_v58  ;;  %7887 = vmatmul.mubr.msk.bf16.vlgmr.msra.gmra.mrb[8].mxu1 %vm2369_vm3, %v2346_v14  ;;  %v2468_v41 = vsel %vm2369_vm3, %v2355_v28, 0  ;;  %v1233_v51 = vcombine.low %v1168_v11, %v1184_v34  ;;  %v1234_v19 = vcombine.high %v1168_v11, %v1184_v34 }
 0x304   : > { %7891 = vmatpush3.bf16.xpose.msra.mxu1 %v2468_v41  ;;  %v1225_v17 = vrot.slane %v1217_v13, %v8845_v47  ;;  %v1232_v50 = vrot.slane %v1218_v32, %v8845_v47  ;;  %v1377_v63 = vrot.slane %v1369_v23, %v8845_v47  ;;  %v1384_v30 = vrot.slane %v1370_v54, %v8845_v47 }
 0x305   : > { %v9143_v10 = vpop.permute.xlu1 %695  ;;  %v7586_v59 = vcombine.low %v9098_v62, %v9101_v33  ;;  %v9158_v42 = vrot.slane %v7562_v36, %v8842_v38  ;;  %7892 = vmatprep.mubr.msk.bf16.mxu1 %vm8567_vm2, %v10919_v22  ;;  %v9163_v48 = vrot.slane %v7564_v53, %v8842_v38  ;;  %v9166_v0 = vrot.slane %v7566_v16, %v8842_v38 }
 0x306   : > { %v1241_v23 = vrot.slane %v1233_v51, %v8845_v47  ;;  %v1248_v1 = vrot.slane %v1234_v19, %v8845_v47  ;;  %7902 = vmatprep.subr.bf16.mxu1 %v10919_v22  ;;  %v9172_v31 = vrot.slane %v7568_v55, %v8842_v38  ;;  %v1001_v54 = vcombine.low %v9119_v6, %v684_v21 }
 0x307   : > { %v985_v18 = vcombine.low %v8812_v25, %v678_v4  ;;  %v986_v12 = vcombine.high %v8812_v25, %v678_v4  ;;  %v7588_v39 = vcombine.high %v9098_v62, %v9101_v33  ;;  %v7570_v56 = vcombine.low %v1225_v17, %v1232_v50 }
 0x308   : > { %v7572_v58 = vcombine.high %v1225_v17, %v1232_v50  ;;  %v1002_v60 = vcombine.high %v9119_v6, %v684_v21  ;;  %v7574_v28 = vcombine.low %v1241_v23, %v1248_v1  ;;  %v7576_v29 = vcombine.high %v1241_v23, %v1248_v1 }
 0x309   : > { %v9177_v37 = vpop.permute.xlu1 %673  ;;  %v1009_v20 = vrot.slane %v1001_v54, %v8842_v38  ;;  %v993_v36 = vrot.slane %v985_v18, %v8842_v38  ;;  %v7590_v53 = vcombine.low %v1377_v63, %v1384_v30  ;;  %v7592_v11 = vcombine.high %v1377_v63, %v1384_v30 }
 0x30a   : > { %v1609_v4 = vcombine.low %v9158_v42, %v9163_v48  ;;  %v1610_v14 = vcombine.high %v9158_v42, %v9163_v48  ;;  %v1641_v62 = vcombine.low %v9166_v0, %v9172_v31  ;;  %v1000_v33 = vrot.slane %v986_v12, %v8842_v38 }
 0x30b   : > { %v1049_v6 = vcombine.low %v993_v36, %v1009_v20  ;;  %v1050_v16 = vcombine.high %v993_v36, %v1009_v20  ;;  %v1642_v34 = vcombine.high %v9166_v0, %v9172_v31  ;;  %v9194_v13 = vrot.slane %v7570_v56, %v8842_v38 }
 0x30c   : > { %v1659_v32 = vcombine.low %v9080_v45, %v9086_v7  ;;  %v1795_v55 = vcombine.low %v9089_v9, %v9092_v3  ;;  %v9201_v17 = vrot.slane %v7572_v58, %v8842_v38  ;;  %v9204_v50 = vrot.slane %v7574_v28, %v8842_v38 }
 0x30d   : > { %v680_v41 = vpop.permute.xlu1 %679  ;;  %v9207_v51 = vrot.slane %v7576_v29, %v8842_v38  ;;  %v1016_v19 = vrot.slane %v1002_v60, %v8842_v38  ;;  %v9214_v45 = vrot.slane %v7578_v44, %v8842_v38  ;;  %v9220_v7 = vrot.slane %v7580_v2, %v8842_v38 }
 0x30e   : > { %v2347_v21 = vpack.c.bf16 %v1795_v55, %v1659_v32  ;;  %v9223_v9 = vrot.slane %v7582_v49, %v8842_v38  ;;  %v9226_v3 = vrot.slane %v1049_v6, %v8845_v47  ;;  %v9229_v63 = vrot.slane %v1050_v16, %v8845_v47 }
 0x30f   : > { %v1065_v30 = vcombine.low %v1000_v33, %v1016_v19  ;;  %v1066_v23 = vcombine.high %v1000_v33, %v1016_v19  ;;  %v9233_v44 = vrot.slane %v7584_v46, %v8842_v38  ;;  %v1881_v5 = vcombine.low %v9214_v45, %v9220_v7 }
 0x310   : > { %7893 = vmatmul.mubr.msk.bf16.vlgmr.msra.gmra.mrb[12].mxu1 %vm2369_vm3, %v2347_v21  ;;  %v9238_v35 = vrot.slane %v7586_v59, %v8842_v38  ;;  %v9241_v2 = vrot.slane %v7588_v39, %v8842_v38  ;;  %v1745_v49 = vcombine.low %v9194_v13, %v9201_v17  ;;  %v1746_v1 = vcombine.high %v9194_v13, %v9201_v17 }
 0x311   : > { %v1777_v54 = vcombine.low %v9204_v50, %v9207_v51  ;;  %v1778_v46 = vcombine.high %v9204_v50, %v9207_v51  ;;  %7904 = vmatprep.mubr.msk.bf16.mxu1 %vm8567_vm2, %v10919_v22  ;;  %v1889_v59 = vrot.slane %v1881_v5, %v8845_v47  ;;  %v1913_v18 = vcombine.low %v9223_v9, %v9233_v44  ;;  %v686_v56 = vpop.permute.xlu1 %685 }
 0x312   : > { %v9257_v12 = vrot.slane %v7590_v53, %v8842_v38  ;;  %v9260_v39 = vrot.slane %v7592_v11, %v8842_v38  ;;  %v1073_v58 = vrot.slane %v1065_v30, %v8845_v47  ;;  %v1080_v60 = vrot.slane %v1066_v23, %v8845_v47 }
 0x313   : > { %v7593_v28 = vcombine.low %v9226_v3, %v9229_v63  ;;  %v2017_v29 = vcombine.low %v9238_v35, %v9241_v2  ;;  %v7595_v20 = vcombine.high %v9226_v3, %v9229_v63  ;;  %v1921_v36 = vrot.slane %v1913_v18, %v8845_v47 }
 0x314   : > { %v2049_v53 = vcombine.low %v9257_v12, %v9260_v39  ;;  %v1393_v11 = vcombine.low %v8829_v27, %v680_v41  ;;  %v1394_v6 = vcombine.high %v8829_v27, %v680_v41  ;;  %v1409_v16 = vcombine.low %v9177_v37, %v686_v56 }
 0x315   : > { %v2025_v33 = vrot.slane %v2017_v29, %v8845_v47  ;;  %v1410_v32 = vcombine.high %v9177_v37, %v686_v56  ;;  %v1933_v55 = vcombine.low %v1889_v59, %v1921_v36  ;;  %v1934_v21 = vcombine.high %v1889_v59, %v1921_v36 }
 0x316   : > { %v2057_v19 = vrot.slane %v2049_v53, %v8845_v47  ;;  %v1401_v3 = vrot.slane %v1393_v11, %v8842_v38  ;;  %v1408_v63 = vrot.slane %v1394_v6, %v8842_v38  ;;  %v1417_v30 = vrot.slane %v1409_v16, %v8842_v38 }
 0x317   : > { %v1424_v23 = vrot.slane %v1410_v32, %v8842_v38  ;;  %v1617_v5 = vrot.slane %v1609_v4, %v8845_v47  ;;  %v1649_v29 = vrot.slane %v1641_v62, %v8845_v47  ;;  %v1753_v37 = vrot.slane %v1745_v49, %v8845_v47 }
 0x318   : > { %v2069_v18 = vcombine.low %v2025_v33, %v2057_v19  ;;  %v2070_v41 = vcombine.high %v2025_v33, %v2057_v19  ;;  %v1457_v56 = vcombine.low %v1401_v3, %v1417_v30  ;;  %v1458_v26 = vcombine.high %v1401_v3, %v1417_v30 }
 0x319   : > { %v1473_v53 = vcombine.low %v1408_v63, %v1424_v23  ;;  %v1474_v59 = vcombine.high %v1408_v63, %v1424_v23  ;;  %v7597_v36 = vcombine.low %v1073_v58, %v1080_v60  ;;  %v1785_v6 = vrot.slane %v1777_v54, %v8845_v47 }
 0x31a   : > { %v2357_v11 = vpack.c.bf16 %v2069_v18, %v1933_v55  ;;  %v2358_v40 = vpack.c.bf16 %v2070_v41, %v1934_v21  ;;  %v1465_v16 = vrot.slane %v1457_v56, %v8845_v47  ;;  %v1472_v32 = vrot.slane %v1458_v26, %v8845_v47 }
 0x31b   : > { %v1481_v4 = vrot.slane %v1473_v53, %v8845_v47  ;;  %v1488_v33 = vrot.slane %v1474_v59, %v8845_v47  ;;  %v7599_v62 = vcombine.high %v1073_v58, %v1080_v60  ;;  %v1797_v3 = vcombine.low %v1753_v37, %v1785_v6 }
 0x31c   : > { %v2562_v49 = vsel %vm2369_vm3, %v2357_v11, 0  ;;  %v2609_v19 = vsel %vm2369_vm3, %v2358_v40, 0  ;;  %v2081_v63 = vrot.slane %v7593_v28, %v8842_v38  ;;  %v1661_v55 = vcombine.low %v1617_v5, %v1649_v29 }
 0x31d   : > { %7903 = vmatpush3.bf16.xpose.msra.mxu1 %v2562_v49  ;;  %7909 = vmatpush3.bf16.xpose.msra.mxu0 %v2609_v19  ;;  %v1662_v54 = vcombine.high %v1617_v5, %v1649_v29  ;;  %v7601_v21 = vcombine.low %v1465_v16, %v1472_v32  ;;  %v7603_v30 = vcombine.high %v1465_v16, %v1472_v32 }
 0x31e   : > { %7914 = vmatprep.subr.bf16.mxu1 %v10919_v22  ;;  %7920 = vmatprep.subr.bf16.mxu0 %v10919_v22  ;;  %v1798_v26 = vcombine.high %v1753_v37, %v1785_v6  ;;  %v2097_v58 = vrot.slane %v7595_v20, %v8842_v38  ;;  %v7605_v60 = vcombine.low %v1481_v4, %v1488_v33 }
 0x31f   : > { %v7607_v23 = vcombine.high %v1481_v4, %v1488_v33  ;;  %v1882_v40 = vcombine.high %v9214_v45, %v9220_v7  ;;  %v2349_v18 = vpack.c.bf16 %v1797_v3, %v1661_v55  ;;  %v1914_v41 = vcombine.high %v9223_v9, %v9233_v44 }
 0x320   : > { %v2350_v28 = vpack.c.bf16 %v1798_v26, %v1662_v54  ;;  %v2018_v5 = vcombine.high %v9238_v35, %v9241_v2  ;;  %v2113_v29 = vrot.slane %v7597_v36, %v8842_v38  ;;  %v2129_v56 = vrot.slane %v7599_v62, %v8842_v38 }
 0x321   : > { %v1896_v37 = vrot.slane %v1882_v40, %v8845_v47  ;;  %v2050_v20 = vcombine.high %v9257_v12, %v9260_v39  ;;  %v2217_v53 = vrot.slane %v7601_v21, %v8842_v38  ;;  %v2233_v45 = vrot.slane %v7603_v30, %v8842_v38 }
 0x322   : > { %v1928_v7 = vrot.slane %v1914_v41, %v8845_v47  ;;  %v2032_v9 = vrot.slane %v2018_v5, %v8845_v47  ;;  %v2249_v44 = vrot.slane %v7605_v60, %v8842_v38  ;;  %v2265_v35 = vrot.slane %v7607_v23, %v8842_v38 }
 0x323   : > { %v2064_v2 = vrot.slane %v2050_v20, %v8845_v47  ;;  %v2137_v59 = vcombine.low %v2081_v63, %v2097_v58  ;;  %v1624_v39 = vrot.slane %v1610_v14, %v8845_v47  ;;  %v1656_v36 = vrot.slane %v1642_v34, %v8845_v47 }
 0x324   : > { %7905 = vmatmul.mubr.msk.bf16.vlgmr.msra.gmra.mrb[16].mxu1 %vm2369_vm3, %v2349_v18  ;;  %7911 = vmatmul.mubr.msk.bf16.vlgmr.msra.gmra.mrb[8].mxu0 %vm2369_vm3, %v2350_v28  ;;  %v1935_v12 = vcombine.low %v1896_v37, %v1928_v7  ;;  %v1936_v6 = vcombine.high %v1896_v37, %v1928_v7  ;;  %v1760_v42 = vrot.slane %v1746_v1, %v8845_v47  ;;  %v10937_v7 = vlaneseq }
 0x325   : > { %v2071_v11 = vcombine.low %v2032_v9, %v2064_v2  ;;  %v2072_v16 = vcombine.high %v2032_v9, %v2064_v2  ;;  %7916 = vmatprep.mubr.msk.bf16.mxu1 %vm8567_vm2, %v10919_v22  ;;  %7922 = vmatprep.mubr.msk.bf16.mxu0 %vm8567_vm2, %v10919_v22  ;;  %v1792_v48 = vrot.slane %v1778_v46, %v8845_v47 }
 0x326   : > { %v2169_v0 = vcombine.low %v2113_v29, %v2129_v56  ;;  %v2273_v31 = vcombine.low %v2217_v53, %v2233_v45  ;;  %v2145_v32 = vrot.slane %v2137_v59, %v8845_v47  ;;  %v2305_v4 = vcombine.low %v2249_v44, %v2265_v35 }
 0x327   : > { %v2359_v14 = vpack.c.bf16 %v2071_v11, %v1935_v12  ;;  %v2360_v34 = vpack.c.bf16 %v2072_v16, %v1936_v6  ;;  %v2138_v49 = vcombine.high %v2081_v63, %v2097_v58  ;;  %v2170_v19 = vcombine.high %v2113_v29, %v2129_v56 }
 0x328   : > { %v2177_v33 = vrot.slane %v2169_v0, %v8845_v47  ;;  %v2281_v62 = vrot.slane %v2273_v31, %v8845_v47  ;;  %v2313_v50 = vrot.slane %v2305_v4, %v8845_v47  ;;  %v2274_v51 = vcombine.high %v2217_v53, %v2233_v45 }
 0x329   : > { %v2656_v13 = vsel %vm2369_vm3, %v2359_v14, 0  ;;  %v2703_v17 = vsel %vm2369_vm3, %v2360_v34, 0  ;;  %v1799_v1 = vcombine.low %v1760_v42, %v1792_v48  ;;  %v1800_v46 = vcombine.high %v1760_v42, %v1792_v48 }
 0x32a   : > { %7915 = vmatpush3.bf16.xpose.msra.mxu1 %v2656_v13  ;;  %7921 = vmatpush3.bf16.xpose.msra.mxu0 %v2703_v17  ;;  %v2152_v3 = vrot.slane %v2138_v49, %v8845_v47  ;;  %v2337_v55 = vcombine.low %v2281_v62, %v2313_v50  ;;  %v2338_v63 = vcombine.high %v2281_v62, %v2313_v50  ;;  %v385_v9 = vand.u32 127, %v10937_v7 }
 0x32b   : > { %7926 = vmatprep.subr.bf16.mxu1 %v10919_v22  ;;  %7932 = vmatprep.subr.bf16.mxu0 %v10919_v22  ;;  %v2184_v54 = vrot.slane %v2170_v19, %v8845_v47  ;;  %v2201_v21 = vcombine.low %v2145_v32, %v2177_v33  ;;  %v2202_v30 = vcombine.high %v2145_v32, %v2177_v33 }
 0x32c   : > { %v2288_v26 = vrot.slane %v2274_v51, %v8845_v47  ;;  %v2306_v58 = vcombine.high %v2249_v44, %v2265_v35  ;;  %v1663_v60 = vcombine.low %v1624_v39, %v1656_v36  ;;  %v1664_v23 = vcombine.high %v1624_v39, %v1656_v36 }
 0x32d   : > { %v2203_v40 = vcombine.low %v2152_v3, %v2184_v54  ;;  %v2204_v18 = vcombine.high %v2152_v3, %v2184_v54  ;;  %v2361_v28 = vpack.c.bf16 %v2337_v55, %v2201_v21  ;;  %v2362_v41 = vpack.c.bf16 %v2338_v63, %v2202_v30 }
 0x32e   : > { %v2320_v5 = vrot.slane %v2306_v58, %v8845_v47  ;;  %v2351_v29 = vpack.c.bf16 %v1799_v1, %v1663_v60  ;;  %v2352_v56 = vpack.c.bf16 %v1800_v46, %v1664_v23  ;;  %v383_v44 = vadd.s32 8, %v8727_v43 }
 0x32f   : > { %vm386_vm4 = vcmp.le.s32.totalorder %v385_v9, %v8727_v43  ;;  %v8573_v35 = vmov -1e+30  }
 0x330   : > { %v2339_v37 = vcombine.low %v2288_v26, %v2320_v5  ;;  %v2340_v20 = vcombine.high %v2288_v26, %v2320_v5  ;;  %vm387_vm5 = vcmp.le.s32.totalorder %v385_v9, %v383_v44  ;;  %v9364_v2 = vsel %vm386_vm4, 0.0, %v8573_v35 }
 0x331   : > { %7917 = vmatmul.mubr.msk.bf16.vlgmr.msra.gmra.mrb[20].mxu1 %vm2369_vm3, %v2351_v29  ;;  %7923 = vmatmul.mubr.msk.bf16.vlgmr.msra.gmra.mrb[12].mxu0 %vm2369_vm3, %v2352_v56  ;;  %10938 = vst [vmem:[#allocation9_spill] sm:$0xff] %v9364_v2  ;;  %v9366_v12 = vsel %vm387_vm5, 0.0, %v8573_v35 }
 0x332   : > { %7927 = vmatpush3.bf16.msra.mxu1 %v2361_v28  ;;  %7933 = vmatpush3.bf16.msra.mxu0 %v2362_v41  ;;  %v9351_v53 = vpack.c.bf16 %v2339_v37, %v2203_v40  ;;  %v9353_v45 = vpack.c.bf16 %v2340_v20, %v2204_v18  ;;  %10939 = vst [vmem:[#allocation10_spill] sm:$0xff] %v9366_v12 }
 0x333   : > { %7928 = vmatprep.mubr.msk.bf16.mxu1 %vm8567_vm2, %v10919_v22  ;;  %7938 = vmatprep.subr.bf16.mxu1 %v10919_v22 }
 0x334   : > { %7934 = vmatprep.mubr.msk.bf16.mxu0 %vm8567_vm2, %v10919_v22  ;;  %7944 = vmatprep.subr.bf16.mxu0 %v10919_v22 }
 0x3ce   : > { %v2410_v59 = vpop.f32.mrb[4].mxu1 }
 0x3cf   : > { %v9369_v39 = vadd.f32 %v2410_v59, %v9364_v2  ;;  %v7882_v36 = vpop.f32.mrb[5].mxu1 }
 0x3d0   : > { %v2413_v11 = vpop.f32.mrb[6].mxu1 }
 0x3d1   : > { %v2551_v6 = vpop.f32.mrb[4].mxu0  ;;  %v9372_v16 = vadd.f32 %v2413_v11, %v9366_v12  ;;  %v7883_v42 = vpop.f32.mrb[7].mxu1  ;;  %v2747_v48 = vsel %vm2746_vm6, %v9369_v39, -inf }
 0x3d2   : > { %v9377_v0 = vadd.f32 %v2551_v6, %v9364_v2  ;;  %v7900_v31 = vpop.f32.mrb[5].mxu0  ;;  %2748 = vmax.xlane.f32.xlu0 %v2747_v48 }
 0x3d3   : > { %v2554_v14 = vpop.f32.mrb[6].mxu0  ;;  %v2750_v34 = vsel %vm2746_vm6, %v9372_v16, -inf }
 0x3d4   : > { %v9382_v32 = vadd.f32 %v2554_v14, %v9366_v12  ;;  %v7901_v4 = vpop.f32.mrb[7].mxu0  ;;  %2751 = vmax.xlane.f32.xlu1 %v2750_v34  ;;  %v2765_v33 = vsel %vm2746_vm6, %v9377_v0, -inf }
 0x3d6   : > { %2766 = vmax.xlane.f32.xlu0 %v2765_v33  ;;  %v2457_v62 = vpop.f32.mrb[8].mxu1  ;;  %v2768_v13 = vsel %vm2746_vm6, %v9382_v32, -inf }
 0x3d7   : > { %v9387_v49 = vadd.f32 %v2457_v62, %v9364_v2  ;;  %v7888_v19 = vpop.f32.mrb[9].mxu1 }
 0x3d8   : > { %2769 = vmax.xlane.f32.xlu1 %v2768_v13  ;;  %v2460_v17 = vpop.f32.mrb[10].mxu1 }
 0x3d9   : > { %v7889_v50 = vpop.f32.mrb[11].mxu1  ;;  %v2753_v51 = vsel %vm2746_vm6, %v9387_v49, -inf  ;;  %v9397_v23 = vadd.f32 %v2460_v17, %v9366_v12 }
 0x3da   : > { %2754 = vmax.xlane.f32.xlu0 %v2753_v51 }
 0x3db   : > { %v2756_v37 = vsel %vm2746_vm6, %v9397_v23, -inf }
 0x3e3   : > { %v2504_v1 = vpop.f32.mrb[12].mxu1 }
 0x3e4   : > { %v7894_v46 = vpop.f32.mrb[13].mxu1  ;;  %v9410_v56 = vadd.f32 %v2504_v1, %v9364_v2  ;;  %v9452_v1 = vpop.permute.xlu1 %691 }
 0x3e5   : > { %v2507_v3 = vpop.f32.mrb[14].mxu1  ;;  %v9456_v46 = vpop.permute.xlu0 %689 }
 0x3e6   : > { %v7895_v55 = vpop.f32.mrb[15].mxu1  ;;  %v9405_v5 = vadd.f32 %v2507_v3, %v9366_v12  ;;  %v2759_v7 = vsel %vm2746_vm6, %v9410_v56, -inf }
 0x3e8   : > { %v2762_v20 = vsel %vm2746_vm6, %v9405_v5, -inf  ;;  %v9458_v3 = vpop.permute.xlu1 %697 }
 0x3f7   : > { %v2598_v63 = vpop.f32.mrb[16].mxu1  ;;  %v2645_v54 = vpop.f32.mrb[8].mxu0 }
 0x3f8   : > { %v9394_v21 = vadd.f32 %v2645_v54, %v9364_v2  ;;  %v7906_v30 = vpop.f32.mrb[17].mxu1  ;;  %v7912_v26 = vpop.f32.mrb[9].mxu0  ;;  %v9422_v42 = vadd.f32 %v2598_v63, %v9364_v2 }
 0x3f9   : > { %v2601_v58 = vpop.f32.mrb[18].mxu1  ;;  %v2648_v60 = vpop.f32.mrb[10].mxu0 }
 0x3fa   : > { %v9400_v40 = vadd.f32 %v2648_v60, %v9366_v12  ;;  %v7907_v18 = vpop.f32.mrb[19].mxu1  ;;  %v7913_v28 = vpop.f32.mrb[11].mxu0  ;;  %v2777_v41 = vsel %vm2746_vm6, %v9394_v21, -inf  ;;  %v9430_v4 = vadd.f32 %v2601_v58, %v9366_v12  ;;  %v2771_v62 = vsel %vm2746_vm6, %v9422_v42, -inf }
 0x3fb   : > { %2778 = vmax.xlane.f32.xlu0 %v2777_v41 }
 0x3fc   : > { %v2780_v29 = vsel %vm2746_vm6, %v9400_v40, -inf  ;;  %v2774_v13 = vsel %vm2746_vm6, %v9430_v4, -inf }
 0x3fd   : > { %2781 = vmax.xlane.f32.xlu1 %v2780_v29 }
 0x3ff   : > { %2757 = vmax.xlane.f32.xlu0 %v2756_v37 }
 0x401   : > { %2763 = vmax.xlane.f32.xlu1 %v2762_v20 }
 0x403   : > { %2760 = vmax.xlane.f32.xlu0 %v2759_v7 }
 0x404   : > { %v2692_v9 = vpop.f32.mrb[20].mxu1  ;;  %v2739_v44 = vpop.f32.mrb[12].mxu0 }
 0x405   : > { %v9419_v35 = vadd.f32 %v2739_v44, %v9364_v2  ;;  %v7918_v59 = vpop.f32.mrb[21].mxu1  ;;  %v7924_v36 = vpop.f32.mrb[13].mxu0  ;;  %v9448_v50 = vadd.f32 %v2692_v9, %v9364_v2 }
 0x406   : > { %v2695_v11 = vpop.f32.mrb[22].mxu1  ;;  %v2742_v6 = vpop.f32.mrb[14].mxu0 }
 0x407   : > { %v9425_v48 = vadd.f32 %v2742_v6, %v9366_v12  ;;  %v7919_v31 = vpop.f32.mrb[23].mxu1  ;;  %v7925_v14 = vpop.f32.mrb[15].mxu0  ;;  %v2789_v34 = vsel %vm2746_vm6, %v9419_v35, -inf  ;;  %v9437_v19 = vadd.f32 %v2695_v11, %v9366_v12  ;;  %v2783_v51 = vsel %vm2746_vm6, %v9448_v50, -inf }
 0x408   : > { %2790 = vmax.xlane.f32.xlu0 %v2789_v34 }
 0x409   : > { %v2792_v33 = vsel %vm2746_vm6, %v9425_v48, -inf  ;;  %v2786_v17 = vsel %vm2746_vm6, %v9437_v19, -inf }
 0x40a   : > { %2793 = vmax.xlane.f32.xlu1 %v2792_v33 }
 0x40c   : > { %2772 = vmax.xlane.f32.xlu0 %v2771_v62 }
 0x40e   : > { %2775 = vmax.xlane.f32.xlu1 %v2774_v13 }
 0x412   : > { %2787 = vmax.xlane.f32.xlu1 %v2786_v17 }
 0x422   : > { %701 = vrot.lane.b32.xlu0 %v8812_v25, %s8569_s16 }
 0x423   : > { %703 = vrot.lane.b32.xlu1 %v8829_v27, %s8569_s16 }
 0x441   : > { %2784 = vmax.xlane.f32.xlu0 %v2783_v51 }
 0x457   : > { %707 = vrot.lane.b32.xlu0 %v8812_v25, %s8570_s17 }
 0x45f   : > { %v2749_v55 = vpop.xlane.xlu0 %2748 }
 0x460   : > { %v2795_v63 = vsub.f32 %v9369_v39, %v2749_v55 }
 0x461   : > { %v2752_v54 = vpop.xlane.xlu1 %2751 }
 0x462   : > { %v2811_v30 = vmul.f32 1.442695, %v2795_v63  ;;  %v2796_v26 = vsub.f32 %v9372_v16, %v2752_v54 }
 0x463   : > { %v2767_v58 = vpop.xlane.xlu0 %2766 }
 0x464   : > { %v2813_v60 = vmul.f32 1.442695, %v2796_v26  ;;  %v2801_v18 = vsub.f32 %v9377_v0, %v2767_v58  ;;  %8289 = vpow2.f32 %v2811_v30 }
 0x465   : > { %v2770_v28 = vpop.xlane.xlu1 %2769 }
 0x466   : > { %8291 = vpow2.f32 %v2813_v60  ;;  %v2823_v41 = vmul.f32 1.442695, %v2801_v18  ;;  %v2802_v25 = vsub.f32 %v9382_v32, %v2770_v28 }
 0x467   : > { %v2755_v29 = vpop.xlane.xlu0 %2754 }
 0x468   : > { %8293 = vpow2.f32 %v2823_v41  ;;  %v2825_v37 = vmul.f32 1.442695, %v2802_v25  ;;  %v2797_v20 = vsub.f32 %v9387_v49, %v2755_v29 }
 0x46a   : > { %8295 = vpow2.f32 %v2825_v37  ;;  %v2815_v16 = vmul.f32 1.442695, %v2797_v20 }
 0x46c   : > { %8297 = vpow2.f32 %v2815_v16 }
 0x46e   : > { %v9465_v39 = vpop.eup %8289 }
 0x46f   : > { %v2843_v9 = vsel %vm2746_vm6, %v9465_v39, 0.0 }
 0x470   : > { %v9467_v7 = vpop.eup %8291 }
 0x471   : > { %v2846_v0 = vsel %vm2746_vm6, %v9467_v7, 0.0 }
 0x472   : > { %2847 = vadd.xlane.f32.xlu1 %v2846_v0  ;;  %v9473_v44 = vpop.eup %8293 }
 0x473   : > { %v2861_v32 = vsel %vm2746_vm6, %v9473_v44, 0.0 }
 0x474   : > { %v9477_v49 = vpop.eup %8295 }
 0x475   : > { %v2864_v59 = vsel %vm2746_vm6, %v9477_v49, 0.0 }
 0x476   : > { %2844 = vadd.xlane.f32.xlu0 %v2843_v9  ;;  %v9481_v36 = vpop.eup %8297 }
 0x477   : > { %v2849_v11 = vsel %vm2746_vm6, %v9481_v36, 0.0 }
 0x47a   : > { %2862 = vadd.xlane.f32.xlu0 %v2861_v32 }
 0x47e   : > { %2865 = vadd.xlane.f32.xlu0 %v2864_v59 }
 0x482   : > { %2850 = vadd.xlane.f32.xlu0 %v2849_v11 }
 0x488   : > { %v2779_v6 = vpop.xlane.xlu0 %2778 }
 0x489   : > { %v2805_v31 = vsub.f32 %v9394_v21, %v2779_v6 }
 0x48a   : > { %v2782_v14 = vpop.xlane.xlu1 %2781 }
 0x48b   : > { %v2831_v34 = vmul.f32 1.442695, %v2805_v31  ;;  %v2806_v33 = vsub.f32 %v9400_v40, %v2782_v14 }
 0x48c   : > { %v2758_v62 = vpop.xlane.xlu0 %2757 }
 0x48d   : > { %8299 = vpow2.f32 %v2831_v34  ;;  %v2798_v13 = vsub.f32 %v9397_v23, %v2758_v62  ;;  %v2833_v51 = vmul.f32 1.442695, %v2806_v33 }
 0x48e   : > { %v2764_v17 = vpop.xlane.xlu1 %2763 }
 0x48f   : > { %v2817_v55 = vmul.f32 1.442695, %v2798_v13  ;;  %v2800_v63 = vsub.f32 %v9405_v5, %v2764_v17 }
 0x490   : > { %v2761_v54 = vpop.xlane.xlu0 %2760 }
 0x491   : > { %8301 = vpow2.f32 %v2817_v55  ;;  %v2799_v30 = vsub.f32 %v9410_v56, %v2761_v54  ;;  %v2821_v26 = vmul.f32 1.442695, %v2800_v63 }
 0x492   : > { %8303 = vpow2.f32 %v2833_v51 }
 0x493   : > { %v2819_v21 = vmul.f32 1.442695, %v2799_v30 }
 0x495   : > { %8305 = vpow2.f32 %v2819_v21  ;;  %v2791_v58 = vpop.xlane.xlu0 %2790 }
 0x496   : > { %8307 = vpow2.f32 %v2821_v26  ;;  %v2809_v33 = vsub.f32 %v9419_v35, %v2791_v58  ;;  %v9546_v58 = vadd.f32 %v8944_v61, %v8738_v15 }
 0x497   : > { %v9490_v60 = vpop.eup %8299  ;;  %v2794_v40 = vpop.xlane.xlu1 %2793 }
 0x498   : > { %v2873_v23 = vsel %vm2746_vm6, %v9490_v60, 0.0  ;;  %v2810_v51 = vsub.f32 %v9425_v48, %v2794_v40  ;;  %v2839_v55 = vmul.f32 1.442695, %v2809_v33  ;;  %v9552_v40 = vadd.f32 %v8938_v52, %v8738_v15 }
 0x499   : > { %v2773_v18 = vpop.xlane.xlu0 %2772  ;;  %2874 = vadd.xlane.f32.xlu0 %v2873_v23  ;;  %v9630_v33 = vadd.f32 %v8964_v8, %v8805_v24 }
 0x49a   : > { %v2803_v5 = vsub.f32 %v9422_v42, %v2773_v18  ;;  %v2841_v54 = vmul.f32 1.442695, %v2810_v51 }
 0x49b   : > { %v9495_v28 = vpop.eup %8301  ;;  %v2776_v41 = vpop.xlane.xlu1 %2775  ;;  %10940 = vst [vmem:[#allocation11_spill] sm:$0xff] %v9630_v33 }
 0x49c   : > { %v2804_v56 = vsub.f32 %v9430_v4, %v2776_v41  ;;  %v2827_v25 = vmul.f32 1.442695, %v2803_v5  ;;  %v2852_v29 = vsel %vm2746_vm6, %v9495_v28, 0.0  ;;  %v9500_v37 = vpop.eup %8303 }
 0x49d   : > { %2853 = vadd.xlane.f32.xlu1 %v2852_v29  ;;  %v2876_v42 = vsel %vm2746_vm6, %v9500_v37, 0.0  ;;  %v9523_v34 = vpop.permute.xlu0 %701 }
 0x49e   : > { %v2829_v20 = vmul.f32 1.442695, %v2804_v56  ;;  %8309 = vpow2.f32 %v2827_v25 }
 0x49f   : > { %v9502_v16 = vpop.eup %8305  ;;  %v2788_v31 = vpop.xlane.xlu1 %2787 }
 0x4a0   : > { %8311 = vpow2.f32 %v2829_v20  ;;  %v9506_v0 = vpop.eup %8307  ;;  %v2855_v4 = vsel %vm2746_vm6, %v9502_v16, 0.0  ;;  %v2808_v14 = vsub.f32 %v9437_v19, %v2788_v31 }
 0x4a1   : > { %2877 = vadd.xlane.f32.xlu1 %v2876_v42  ;;  %2856 = vadd.xlane.f32.xlu0 %v2855_v4  ;;  %v2858_v9 = vsel %vm2746_vm6, %v9506_v0, 0.0  ;;  %v1017_v4 = vcombine.low %v9456_v46, %v9523_v34 }
 0x4a2   : > { %v2837_v62 = vmul.f32 1.442695, %v2808_v14 }
 0x4a3   : > { %v9558_v23 = vpop.permute.xlu1 %703 }
 0x4a4   : > { %8313 = vpow2.f32 %v2837_v62 }
 0x4a5   : > { %2859 = vadd.xlane.f32.xlu1 %v2858_v9 }
 0x4a8   : > { %v9512_v32 = vpop.eup %8309 }
 0x4a9   : > { %v2867_v59 = vsel %vm2746_vm6, %v9512_v32, 0.0 }
 0x4aa   : > { %v9516_v11 = vpop.eup %8311  ;;  %2868 = vadd.xlane.f32.xlu0 %v2867_v59 }
 0x4ab   : > { %v2870_v6 = vsel %vm2746_vm6, %v9516_v11, 0.0 }
 0x4ac   : > { %2871 = vadd.xlane.f32.xlu1 %v2870_v6  ;;  %v1018_v6 = vcombine.high %v9456_v46, %v9523_v34 }
 0x4ae   : > { %v1032_v34 = vrot.slane %v1018_v6, %v8842_v38 }
 0x4bd   : > { %709 = vrot.lane.b32.xlu1 %v8829_v27, %s8570_s17  ;;  %v9528_v27 = vpop.eup %8313 }
 0x4be   : > { %v2882_v48 = vsel %vm2746_vm6, %v9528_v27, 0.0 }
 0x4ce   : > { %v2785_v13 = vpop.xlane.xlu0 %2784 }
 0x4cf   : > { %v2807_v17 = vsub.f32 %v9448_v50, %v2785_v13  ;;  %v9638_v13 = vadd.f32 %v8940_v57, %v8805_v24 }
 0x4d1   : > { %v2835_v63 = vmul.f32 1.442695, %v2807_v17  ;;  %10941 = vst [vmem:[#allocation12_spill] sm:$0xff] %v9638_v13 }
 0x4d2   : > { %v708_v61 = vpop.permute.xlu0 %707 }
 0x4d3   : > { %8315 = vpow2.f32 %v2835_v63  ;;  %v1033_v20 = vcombine.low %v9143_v10, %v708_v61  ;;  %v1034_v9 = vcombine.high %v9143_v10, %v708_v61  ;;  %v1025_v10 = vrot.slane %v1017_v4, %v8842_v38 }
 0x4d4   : > { %8317 = vpow2.f32 %v2839_v55  ;;  %v1426_v61 = vcombine.high %v9452_v1, %v9558_v23 }
 0x4d5   : > { %8319 = vpow2.f32 %v2841_v54  ;;  %v1041_v31 = vrot.slane %v1033_v20, %v8842_v38  ;;  %v1048_v62 = vrot.slane %v1034_v9, %v8842_v38 }
 0x4d7   : > { %v1081_v17 = vcombine.low %v1025_v10, %v1041_v31  ;;  %v1082_v51 = vcombine.high %v1025_v10, %v1041_v31  ;;  %v1097_v63 = vcombine.low %v1032_v34, %v1048_v62  ;;  %v1098_v54 = vcombine.high %v1032_v34, %v1048_v62 }
 0x4dd   : > { %v9530_v19 = vpop.eup %8315 }
 0x4de   : > { %v2879_v35 = vsel %vm2746_vm6, %v9530_v19, 0.0  ;;  %v9534_v30 = vpop.eup %8317 }
 0x4df   : > { %2880 = vadd.xlane.f32.xlu0 %v2879_v35  ;;  %v2885_v50 = vsel %vm2746_vm6, %v9534_v30, 0.0  ;;  %v9540_v26 = vpop.eup %8319  ;;  %v1089_v35 = vrot.slane %v1081_v17, %v8845_v47 }
 0x4e0   : > { %v2888_v21 = vsel %vm2746_vm6, %v9540_v26, 0.0 }
 0x4e1   : > { %2883 = vadd.xlane.f32.xlu1 %v2882_v48  ;;  %v1096_v48 = vrot.slane %v1082_v51, %v8845_v47 }
 0x4e3   : > { %2886 = vadd.xlane.f32.xlu0 %v2885_v50  ;;  %v1425_v50 = vcombine.low %v9452_v1, %v9558_v23 }
 0x4e5   : > { %v1433_v23 = vrot.slane %v1425_v50, %v8842_v38 }
 0x4e7   : > { %2889 = vadd.xlane.f32.xlu0 %v2888_v21 }
 0x4f2   : > { %3741 = vrot.lane.b32.xlu1 %v9546_v58, %s8555_s19 }
 0x4f6   : > { %3745 = vrot.lane.b32.xlu1 %v9552_v40, %s8554_s21 }
 0x4fa   : > { %3747 = vrot.lane.b32.xlu1 %v9546_v58, %s8554_s21 }
 0x4fd   : > { %3739 = vrot.lane.b32.xlu0 %v9552_v40, %s8555_s19 }
 0x4fe   : > { %3753 = vrot.lane.b32.xlu1 %v9546_v58, %s8556_s28 }
 0x4ff   : > { %v2848_v18 = vpop.xlane.xlu1 %2847 }
 0x500   : > { %8321 = vrcp.f32 %v2848_v18  ;;  %v1105_v18 = vrot.slane %v1097_v63, %v8845_v47 }
 0x501   : > { %3751 = vrot.lane.b32.xlu0 %v9552_v40, %s8556_s28 }
 0x502   : > { %3759 = vrot.lane.b32.xlu1 %v9546_v58, %s8557_s30 }
 0x503   : > { %v2845_v15 = vpop.xlane.xlu0 %2844 }
 0x504   : > { %8323 = vrcp.f32 %v2845_v15 }
 0x505   : > { %3757 = vrot.lane.b32.xlu0 %v9552_v40, %s8557_s30 }
 0x506   : > { %3699 = vrot.lane.b32.xlu1 %v9546_v58, %s8558_s7 }
 0x509   : > { %3697 = vrot.lane.b32.xlu0 %v9552_v40, %s8558_s7 }
 0x50a   : > { %v8322_v52 = vpop.eup %8321  ;;  %3705 = vrot.lane.b32.xlu1 %v9546_v58, %s8559_s29 }
 0x50b   : > { %v2908_v5 = vmul.f32 %v8322_v52, %v9467_v7 }
 0x50d   : > { %3703 = vrot.lane.b32.xlu0 %v9552_v40, %s8559_s29 }
 0x50e   : > { %v8324_v41 = vpop.eup %8323  ;;  %3711 = vrot.lane.b32.xlu1 %v9546_v58, %s8560_s26 }
 0x50f   : > { %v2907_v56 = vmul.f32 %v8324_v41, %v9465_v39  ;;  %v2863_v39 = vpop.xlane.xlu0 %2862  ;;  %v7596_v41 = vcombine.high %v1089_v35, %v1096_v48 }
 0x511   : > { %3709 = vrot.lane.b32.xlu0 %v9552_v40, %s8560_s26  ;;  %v2923_v25 = vpack.c.bf16 %v2908_v5, %v2907_v56  ;;  %v7594_v5 = vcombine.low %v1089_v35, %v1096_v48 }
 0x512   : > { %3765 = vrot.lane.b32.xlu1 %v9546_v58, %s8561_s9 }
 0x513   : > { %7929 = vmatmul.mubr.msk.bf16.vlgmr.msra.gmra.mrb[24].mxu1 %vm2746_vm6, %v2923_v25  ;;  %v1440_v25 = vrot.slane %v1426_v61, %v8842_v38  ;;  %v2088_v31 = vrot.slane %v7594_v5, %v8842_v38 }
 0x514   : > { %7939 = vmatpush3.bf16.msra.mxu1 %v9351_v53  ;;  %7940 = vmatprep.mubr.msk.bf16.mxu1 %vm8567_vm2, %v10919_v22  ;;  %v2866_v53 = vpop.xlane.xlu0 %2865 }
 0x515   : > { %3763 = vrot.lane.b32.xlu0 %v9552_v40, %s8561_s9  ;;  %7950 = vmatprep.subr.bf16.mxu1 %v10919_v22 }
 0x516   : > { %3771 = vrot.lane.b32.xlu1 %v9546_v58, %s8563_s10 }
 0x518   : > { %v2851_v7 = vpop.xlane.xlu0 %2850 }
 0x519   : > { %3769 = vrot.lane.b32.xlu0 %v9552_v40, %s8563_s10  ;;  %8325 = vrcp.f32 %v2851_v7 }
 0x51a   : > { %3777 = vrot.lane.b32.xlu1 %v9546_v58, %s8564_s11 }
 0x51d   : > { %3775 = vrot.lane.b32.xlu0 %v9552_v40, %s8564_s11 }
 0x51e   : > { %3783 = vrot.lane.b32.xlu1 %v9546_v58, %s8565_s27 }
 0x521   : > { %3781 = vrot.lane.b32.xlu0 %v9552_v40, %s8565_s27 }
 0x522   : > { %3717 = vrot.lane.b32.xlu1 %v9546_v58, %s8566_s13 }
 0x523   : > { %v8326_v8 = vpop.eup %8325 }
 0x524   : > { %v2909_v24 = vmul.f32 %v8326_v8, %v9481_v36  ;;  %v1112_v36 = vrot.slane %v1098_v54, %v8845_v47 }
 0x525   : > { %3715 = vrot.lane.b32.xlu0 %v9552_v40, %s8566_s13 }
 0x526   : > { %3723 = vrot.lane.b32.xlu1 %v9546_v58, %s8568_s14  ;;  %v9616_v42 = vpop.xlane.xlu0 %2874 }
 0x529   : > { %3721 = vrot.lane.b32.xlu0 %v9552_v40, %s8568_s14 }
 0x52a   : > { %3729 = vrot.lane.b32.xlu1 %v9546_v58, %s8569_s16  ;;  %v2854_v29 = vpop.xlane.xlu1 %2853 }
 0x52b   : > { %8327 = vrcp.f32 %v2854_v29 }
 0x52c   : > { %8329 = vrcp.f32 %v2866_v53  ;;  %v7600_v53 = vcombine.high %v1105_v18, %v1112_v36 }
 0x52d   : > { %3727 = vrot.lane.b32.xlu0 %v9552_v40, %s8569_s16 }
 0x52e   : > { %3735 = vrot.lane.b32.xlu1 %v9546_v58, %s8570_s17  ;;  %v2878_v59 = vpop.xlane.xlu1 %2877  ;;  %v2857_v14 = vpop.xlane.xlu0 %2856 }
 0x52f   : > { %8331 = vrcp.f32 %v2857_v14 }
 0x530   : > { %8333 = vrcp.f32 %v2863_v39  ;;  %v7598_v39 = vcombine.low %v1105_v18, %v1112_v36 }
 0x531   : > { %3733 = vrot.lane.b32.xlu0 %v9552_v40, %s8570_s17 }
 0x532   : > { %3791 = vrot.lane.b32.xlu1 %v9630_v33, %s8558_s7  ;;  %v2860_v46 = vpop.xlane.xlu1 %2859  ;;  %v2120_v62 = vrot.slane %v7598_v39, %v8842_v38 }
 0x533   : > { %8335 = vrcp.f32 %v2860_v46 }
 0x534   : > { %8337 = vrcp.f32 %v2878_v59 }
 0x535   : > { %v8328_v55 = vpop.eup %8327  ;;  %3789 = vrot.lane.b32.xlu0 %v9638_v13, %s8558_s7 }
 0x536   : > { %v2910_v57 = vmul.f32 %v8328_v55, %v9495_v28  ;;  %3795 = vrot.lane.b32.xlu1 %v9638_v13, %s8559_s29  ;;  %v8330_v28 = vpop.eup %8329 }
 0x537   : > { %v2914_v7 = vmul.f32 %v8330_v28, %v9477_v49  ;;  %v2869_v29 = vpop.xlane.xlu0 %2868  ;;  %v2104_v49 = vrot.slane %v7596_v41, %v8842_v38 }
 0x538   : > { %v2924_v21 = vpack.c.bf16 %v2910_v57, %v2909_v24  ;;  %8339 = vrcp.f32 %v2869_v29 }
 0x539   : > { %v2872_v15 = vpop.xlane.xlu1 %2871  ;;  %3801 = vrot.lane.b32.xlu0 %v9638_v13, %s8560_s26  ;;  %v8332_v52 = vpop.eup %8331  ;;  %v2153_v54 = vcombine.low %v2088_v31, %v2104_v49 }
 0x53a   : > { %3797 = vrot.lane.b32.xlu1 %v9630_v33, %s8559_s29  ;;  %7935 = vmatmul.mubr.msk.bf16.vlgmr.msra.gmra.mrb[16].mxu0 %vm2746_vm6, %v2924_v21  ;;  %v8334_v1 = vpop.eup %8333  ;;  %8341 = vrcp.f32 %v2872_v15 }
 0x53b   : > { %7945 = vmatpush3.bf16.msra.mxu0 %v9353_v45  ;;  %7946 = vmatprep.mubr.msk.bf16.mxu0 %vm8567_vm2, %v10919_v22  ;;  %v2911_v45 = vmul.f32 %v8332_v52, %v9502_v16  ;;  %v2913_v14 = vmul.f32 %v8334_v1, %v9473_v44  ;;  %8343 = vrcp.f32 %v9616_v42  ;;  %v2161_v15 = vrot.slane %v2153_v54, %v8845_v47 }
 0x53c   : > { %7956 = vmatprep.subr.bf16.mxu0 %v10919_v22  ;;  %v2154_v52 = vcombine.high %v2088_v31, %v2104_v49 }
 0x53d   : > { %v8336_v56 = vpop.eup %8335  ;;  %v710_v20 = vpop.permute.xlu1 %709  ;;  %3807 = vrot.lane.b32.xlu0 %v9638_v13, %s8566_s13  ;;  %v2926_v46 = vpack.c.bf16 %v2914_v7, %v2913_v14 }
 0x53e   : > { %v2912_v4 = vmul.f32 %v8336_v56, %v9506_v0  ;;  %v1441_v9 = vcombine.low %v9458_v3, %v710_v20  ;;  %v1442_v6 = vcombine.high %v9458_v3, %v710_v20  ;;  %3803 = vrot.lane.b32.xlu1 %v9630_v33, %s8560_s26  ;;  %v2136_v3 = vrot.slane %v7600_v53, %v8842_v38  ;;  %v8338_v36 = vpop.eup %8337 }
 0x540   : > { %v1449_v10 = vrot.slane %v1441_v9, %v8842_v38  ;;  %v1456_v16 = vrot.slane %v1442_v6, %v8842_v38  ;;  %v2925_v0 = vpack.c.bf16 %v2912_v4, %v2911_v45  ;;  %v2185_v24 = vcombine.low %v2120_v62, %v2136_v3 }
 0x541   : > { %v2186_v5 = vcombine.high %v2120_v62, %v2136_v3  ;;  %v2168_v4 = vrot.slane %v2154_v52, %v8845_v47  ;;  %v3291_v52 = vld [vmem:[%s8693_s15] sm:$0xf] }
 0x542   : > { %v1489_v8 = vcombine.low %v1433_v23, %v1449_v10  ;;  %v1490_v34 = vcombine.high %v1433_v23, %v1449_v10  ;;  %v1505_v17 = vcombine.low %v1440_v25, %v1456_v16  ;;  %v1506_v51 = vcombine.high %v1440_v25, %v1456_v16  ;;  %3809 = vrot.lane.b32.xlu1 %v9630_v33, %s8566_s13  ;;  %v8340_v41 = vpop.eup %8339 }
 0x543   : > { %7941 = vmatmul.mubr.msk.bf16.vlgmr.msra.gmra.mrb[28].mxu1 %vm2746_vm6, %v2925_v0  ;;  %7947 = vmatmul.mubr.msk.bf16.vlgmr.msra.gmra.mrb[20].mxu0 %vm2746_vm6, %v2926_v46  ;;  %v2193_v28 = vrot.slane %v2185_v24, %v8845_v47  ;;  %v2200_v9 = vrot.slane %v2186_v5, %v8845_v47  ;;  %v2918_v10 = vmul.f32 %v8338_v36, %v9500_v37 }
 0x544   : > { %v1497_v44 = vrot.slane %v1489_v8, %v8845_v47  ;;  %v1504_v59 = vrot.slane %v1490_v34, %v8845_v47  ;;  %v1513_v55 = vrot.slane %v1505_v17, %v8845_v47  ;;  %v1520_v63 = vrot.slane %v1506_v51, %v8845_v47  ;;  %7952 = vmatprep.mubr.msk.bf16.mxu1 %vm8567_vm2, %v10919_v22  ;;  %v8342_v39 = vpop.eup %8341 }
 0x545   : > { %7958 = vmatprep.mubr.msk.bf16.mxu0 %vm8567_vm2, %v10919_v22  ;;  %v8344_v45 = vpop.eup %8343  ;;  %v2205_v6 = vcombine.low %v2161_v15, %v2193_v28  ;;  %v2206_v49 = vcombine.high %v2161_v15, %v2193_v28  ;;  %v2916_v16 = vmul.f32 %v8342_v39, %v9516_v11  ;;  %v2915_v0 = vmul.f32 %v8340_v41, %v9512_v32 }
 0x546   : > { %v7602_v42 = vcombine.low %v1497_v44, %v1504_v59  ;;  %v7604_v57 = vcombine.high %v1497_v44, %v1504_v59  ;;  %v7606_v35 = vcombine.low %v1513_v55, %v1520_v63  ;;  %v7608_v48 = vcombine.high %v1513_v55, %v1520_v63  ;;  %3813 = vrot.lane.b32.xlu1 %v9638_v13, %s8568_s14 }
 0x547   : > { %v2917_v34 = vmul.f32 %v8344_v45, %v9490_v60  ;;  %v2207_v17 = vcombine.low %v2168_v4, %v2200_v9  ;;  %v2208_v51 = vcombine.high %v2168_v4, %v2200_v9  ;;  %v2927_v44 = vpack.c.bf16 %v2916_v16, %v2915_v0 }
 0x548   : > { %v2224_v50 = vrot.slane %v7602_v42, %v8842_v38  ;;  %v2240_v21 = vrot.slane %v7604_v57, %v8842_v38  ;;  %v2256_v61 = vrot.slane %v7606_v35, %v8842_v38  ;;  %v2272_v18 = vrot.slane %v7608_v48, %v8842_v38 }
 0x549   : > { %v2928_v59 = vpack.c.bf16 %v2918_v10, %v2917_v34 }
 0x54a   : > { %3815 = vrot.lane.b32.xlu1 %v9630_v33, %s8568_s14  ;;  %v2289_v1 = vcombine.low %v2224_v50, %v2240_v21  ;;  %v2321_v23 = vcombine.low %v2256_v61, %v2272_v18  ;;  %v2290_v56 = vcombine.high %v2224_v50, %v2240_v21  ;;  %v2322_v25 = vcombine.high %v2256_v61, %v2272_v18 }
 0x54c   : > { %v2297_v53 = vrot.slane %v2289_v1, %v8845_v47  ;;  %v2329_v7 = vrot.slane %v2321_v23, %v8845_v47  ;;  %v2304_v29 = vrot.slane %v2290_v56, %v8845_v47  ;;  %v2336_v20 = vrot.slane %v2322_v25, %v8845_v47 }
 0x54d   : > { %v3346_v23 = vsel %vm3297_vm7, %v3291_v52, 0 }
 0x54e   : > { %v2341_v31 = vcombine.low %v2297_v53, %v2329_v7  ;;  %v2342_v14 = vcombine.high %v2297_v53, %v2329_v7  ;;  %v2343_v46 = vcombine.low %v2304_v29, %v2336_v20  ;;  %v2344_v8 = vcombine.high %v2304_v29, %v2336_v20  ;;  %v7625_v29 = vld [vmem:[%s8693_s15 + $0x4] sm:$0xf] }
 0x54f   : > { %v3299_v45 = vsel %vm3297_vm7, %v7625_v29, 0 }
 0x550   : > { %v2365_v62 = vpack.c.bf16 %v2341_v31, %v2205_v6  ;;  %v2366_v3 = vpack.c.bf16 %v2342_v14, %v2206_v49  ;;  %v2367_v37 = vpack.c.bf16 %v2343_v46, %v2207_v17  ;;  %v2368_v11 = vpack.c.bf16 %v2344_v8, %v2208_v51 }
 0x552   : > { %7951 = vmatpush3.bf16.msra.mxu1 %v2365_v62  ;;  %7957 = vmatpush3.bf16.msra.mxu0 %v2366_v3 }
 0x553   : > { %7962 = vmatprep.subr.bf16.mxu1 %v10919_v22  ;;  %7968 = vmatprep.subr.bf16.mxu0 %v10919_v22 }
 0x555   : > { %7953 = vmatmul.mubr.msk.bf16.vlgmr.msra.gmra.mrb[32].mxu1 %vm2746_vm6, %v2927_v44  ;;  %7959 = vmatmul.mubr.msk.bf16.vlgmr.msra.gmra.mrb[24].mxu0 %vm2746_vm6, %v2928_v59 }
 0x556   : > { %7963 = vmatpush3.bf16.msra.mxu1 %v2367_v37  ;;  %7969 = vmatpush3.bf16.msra.mxu0 %v2368_v11 }
 0x557   : > { %7964 = vmatprep.mubr.msk.bf16.mxu1 %vm8567_vm2, %v10919_v22  ;;  %7970 = vmatprep.mubr.msk.bf16.mxu0 %vm8567_vm2, %v10919_v22 }
 0x558   : > { %7980 = vmatprep.subr.bf16.mxu0 %v10919_v22  ;;  %7974 = vmatprep.subr.bf16.mxu1 %v10919_v22 }
 0x56c   : > { %v2881_v60 = vpop.xlane.xlu0 %2880 }
 0x56d   : > { %8345 = vrcp.f32 %v2881_v60 }
 0x56e   : > { %v2884_v32 = vpop.xlane.xlu1 %2883 }
 0x56f   : > { %8347 = vrcp.f32 %v2884_v32 }
 0x570   : > { %v2887_v55 = vpop.xlane.xlu0 %2886 }
 0x571   : > { %8349 = vrcp.f32 %v2887_v55 }
 0x572   : > { %v9727_v63 = vpop.permute.xlu1 %3741 }
 0x574   : > { %v2890_v54 = vpop.xlane.xlu0 %2889 }
 0x575   : > { %8351 = vrcp.f32 %v2890_v54 }
 0x576   : > { %v9729_v24 = vpop.permute.xlu1 %3745 }
 0x577   : > { %v8346_v42 = vpop.eup %8345 }
 0x578   : > { %v2919_v57 = vmul.f32 %v8346_v42, %v9530_v19  ;;  %v9732_v35 = vpop.permute.xlu0 %3739 }
 0x579   : > { %v8348_v48 = vpop.eup %8347 }
 0x57a   : > { %v2920_v50 = vmul.f32 %v8348_v48, %v9528_v27  ;;  %v9735_v21 = vpop.permute.xlu1 %3747 }
 0x57b   : > { %v8350_v36 = vpop.eup %8349 }
 0x57c   : > { %v2929_v61 = vpack.c.bf16 %v2920_v50, %v2919_v57  ;;  %v9737_v18 = vpop.permute.xlu0 %3751  ;;  %v2921_v19 = vmul.f32 %v8350_v36, %v9534_v30 }
 0x57e   : > { %v9739_v15 = vpop.permute.xlu1 %3753  ;;  %7965 = vmatmul.mubr.msk.bf16.vlgmr.msra.gmra.mrb[36].mxu1 %vm2746_vm6, %v2929_v61 }
 0x57f   : > { %v8352_v28 = vpop.eup %8351  ;;  %7976 = vmatprep.mubr.msk.bf16.mxu1 %vm8567_vm2, %v10919_v22  ;;  %7975 = vmatpush3.bf16.msra.mxu1 %v3299_v45 }
 0x580   : > { %v2922_v27 = vmul.f32 %v8352_v28, %v9540_v26  ;;  %v9747_v5 = vpop.permute.xlu0 %3757  ;;  %7986 = vmatprep.subr.bf16.mxu1 %v10919_v22 }
 0x582   : > { %v9749_v41 = vpop.permute.xlu1 %3759  ;;  %v2930_v1 = vpack.c.bf16 %v2922_v27, %v2921_v19 }
 0x584   : > { %7971 = vmatmul.mubr.msk.bf16.vlgmr.msra.gmra.mrb[28].mxu0 %vm2746_vm6, %v2930_v1  ;;  %v9753_v56 = vpop.permute.xlu0 %3697 }
 0x585   : > { %7981 = vmatpush3.bf16.msra.mxu0 %v3346_v23  ;;  %7982 = vmatprep.mubr.msk.bf16.mxu0 %vm8567_vm2, %v10919_v22 }
 0x586   : > { %v9755_v25 = vpop.permute.xlu1 %3699  ;;  %7992 = vmatprep.subr.bf16.mxu0 %v10919_v22 }
 0x588   : > { %v9760_v30 = vpop.permute.xlu0 %3703 }
 0x58a   : > { %v9762_v26 = vpop.permute.xlu1 %3705 }
 0x58c   : > { %v9764_v39 = vpop.permute.xlu0 %3709 }
 0x58e   : > { %v9766_v53 = vpop.permute.xlu1 %3711 }
 0x590   : > { %v9768_v7 = vpop.permute.xlu0 %3763 }
 0x592   : > { %v9771_v20 = vpop.permute.xlu1 %3765 }
 0x594   : > { %v9774_v4 = vpop.permute.xlu0 %3769 }
 0x596   : > { %v9777_v9 = vpop.permute.xlu1 %3771 }
 0x598   : > { %v9781_v31 = vpop.permute.xlu0 %3775 }
 0x59a   : > { %v9779_v6 = vpop.permute.xlu1 %3777 }
 0x59c   : > { %v9785_v14 = vpop.permute.xlu0 %3781 }
 0x59e   : > { %v9783_v49 = vpop.permute.xlu1 %3783 }
 0x5a0   : > { %v9789_v16 = vpop.permute.xlu0 %3715 }
 0x5a2   : > { %v9787_v10 = vpop.permute.xlu1 %3717 }
 0x5a4   : > { %v9795_v3 = vpop.permute.xlu0 %3721 }
 0x5a6   : > { %v9791_v0 = vpop.permute.xlu1 %3723 }
 0x5a8   : > { %v9799_v8 = vpop.permute.xlu0 %3727 }
 0x5aa   : > { %v9793_v62 = vpop.permute.xlu1 %3729 }
 0x5ac   : > { %v9801_v17 = vpop.permute.xlu0 %3733 }
 0x5ae   : > { %v9797_v46 = vpop.permute.xlu1 %3735 }
 0x5b0   : > { %v3790_v44 = vpop.permute.xlu0 %3789 }
 0x5b2   : > { %v3792_v34 = vpop.permute.xlu1 %3791 }
 0x5b4   : > { %v3802_v37 = vpop.permute.xlu0 %3801 }
 0x5b5   : > { %v4119_v55 = vcombine.low %v3790_v44, %v3802_v37  ;;  %v4120_v54 = vcombine.high %v3790_v44, %v3802_v37 }
 0x5b6   : > { %v3796_v51 = vpop.permute.xlu1 %3795 }
 0x5b7   : > { %v4103_v60 = vcombine.low %v9638_v13, %v3796_v51  ;;  %v4104_v32 = vcombine.high %v9638_v13, %v3796_v51  ;;  %v4127_v36 = vrot.slane %v4119_v55, %v8842_v38  ;;  %v4134_v28 = vrot.slane %v4120_v54, %v8842_v38 }
 0x5b9   : > { %v4111_v50 = vrot.slane %v4103_v60, %v8842_v38  ;;  %v4118_v61 = vrot.slane %v4104_v32, %v8842_v38 }
 0x5ba   : > { %v3798_v59 = vpop.permute.xlu1 %3797 }
 0x5bb   : > { %v4511_v57 = vcombine.low %v9630_v33, %v3798_v59  ;;  %v4512_v52 = vcombine.high %v9630_v33, %v3798_v59  ;;  %v4167_v23 = vcombine.low %v4111_v50, %v4127_v36  ;;  %v4168_v29 = vcombine.high %v4111_v50, %v4127_v36 }
 0x5bc   : > { %v4183_v45 = vcombine.low %v4118_v61, %v4134_v28 }
 0x5bd   : > { %v4519_v27 = vrot.slane %v4511_v57, %v8842_v38  ;;  %v4526_v51 = vrot.slane %v4512_v52, %v8842_v38  ;;  %v4175_v32 = vrot.slane %v4167_v23, %v8845_v47  ;;  %v4182_v59 = vrot.slane %v4168_v29, %v8845_v47 }
 0x5be   : > { %v3804_v11 = vpop.permute.xlu1 %3803  ;;  %v4191_v55 = vrot.slane %v4183_v45, %v8845_v47 }
 0x5bf   : > { %v4527_v42 = vcombine.low %v3792_v34, %v3804_v11  ;;  %v4528_v48 = vcombine.high %v3792_v34, %v3804_v11  ;;  %v4184_v34 = vcombine.high %v4118_v61, %v4134_v28  ;;  %v7672_v61 = vcombine.low %v4175_v32, %v4182_v59 }
 0x5c0   : > { %v7674_v36 = vcombine.high %v4175_v32, %v4182_v59 }
 0x5c1   : > { %v4535_v19 = vrot.slane %v4527_v42, %v8842_v38  ;;  %v4542_v1 = vrot.slane %v4528_v48, %v8842_v38  ;;  %v4198_v54 = vrot.slane %v4184_v34, %v8845_v47  ;;  %v9824_v29 = vrot.slane %v7672_v61, %v8842_v38 }
 0x5c2   : > { %v9827_v45 = vrot.slane %v7674_v36, %v8842_v38 }
 0x5c3   : > { %v4575_v44 = vcombine.low %v4519_v27, %v4535_v19  ;;  %v4576_v37 = vcombine.high %v4519_v27, %v4535_v19  ;;  %v4591_v11 = vcombine.low %v4526_v51, %v4542_v1  ;;  %v4592_v60 = vcombine.high %v4526_v51, %v4542_v1 }
 0x5c4   : > { %v7676_v28 = vcombine.low %v4191_v55, %v4198_v54  ;;  %v7678_v52 = vcombine.high %v4191_v55, %v4198_v54  ;;  %v5256_v32 = vcombine.high %v9824_v29, %v9827_v45 }
 0x5c5   : > { %v4583_v42 = vrot.slane %v4575_v44, %v8845_v47  ;;  %v4590_v57 = vrot.slane %v4576_v37, %v8845_v47  ;;  %v4599_v48 = vrot.slane %v4591_v11, %v8845_v47  ;;  %v4606_v50 = vrot.slane %v4592_v60, %v8845_v47 }
 0x5c6   : > { %v9830_v34 = vrot.slane %v7676_v28, %v8842_v38  ;;  %v9833_v51 = vrot.slane %v7678_v52, %v8842_v38  ;;  %v5270_v55 = vrot.slane %v5256_v32, %v8845_v47  ;;  %v7630_v52 = vld [vmem:[%s8693_s15 + $0xc] sm:$0xf] }
 0x5c7   : > { %v7680_v19 = vcombine.low %v4583_v42, %v4590_v57  ;;  %v7682_v27 = vcombine.high %v4583_v42, %v4590_v57  ;;  %v7684_v1 = vcombine.low %v4599_v48, %v4606_v50  ;;  %v7686_v23 = vcombine.high %v4599_v48, %v4606_v50 }
 0x5c8   : > { %v5288_v59 = vcombine.high %v9830_v34, %v9833_v51  ;;  %v3446_v33 = vsel %vm3297_vm7, %v7630_v52, 0  ;;  %v7632_v52 = vld [vmem:[%s8693_s15 + $0x10] sm:$0xf] }
 0x5c9   : > { %v9836_v44 = vrot.slane %v7680_v19, %v8842_v38  ;;  %v9839_v37 = vrot.slane %v7682_v27, %v8842_v38  ;;  %v9842_v11 = vrot.slane %v7684_v1, %v8842_v38  ;;  %v9845_v60 = vrot.slane %v7686_v23, %v8842_v38 }
 0x5ca   : > { %v5302_v54 = vrot.slane %v5288_v59, %v8845_v47 }
 0x5cb   : > { %v5392_v42 = vcombine.high %v9836_v44, %v9839_v37  ;;  %v5424_v57 = vcombine.high %v9842_v11, %v9845_v60 }
 0x5cc   : > { %v5321_v48 = vcombine.low %v5270_v55, %v5302_v54  ;;  %v5322_v61 = vcombine.high %v5270_v55, %v5302_v54  ;;  %v10944_v55 = vmov 0.0  }
 0x5cd   : > { %v5406_v50 = vrot.slane %v5392_v42, %v8845_v47  ;;  %v5438_v36 = vrot.slane %v5424_v57, %v8845_v47  ;;  %v7628_v42 = vld [vmem:[%s8693_s15 + $0x8] sm:$0xf] }
 0x5cf   : > { %v5457_v19 = vcombine.low %v5406_v50, %v5438_v36  ;;  %v5458_v27 = vcombine.high %v5406_v50, %v5438_v36 }
 0x5d1   : > { %v9860_v32 = vpack.c.bf16 %v5457_v19, %v5321_v48  ;;  %v9862_v59 = vpack.c.bf16 %v5458_v27, %v5322_v61  ;;  %v7634_v19 = vld [vmem:[%s8693_s15 + $0x14] sm:$0xf]  ;;  %v3967_v27 = vcombine.low %v9732_v35, %v9737_v18 }
 0x5d3   : > { %10942 = vst [vmem:[#allocation13_spill] sm:$0xff] %v9860_v32  ;;  %10943 = vst [vmem:[#allocation14_spill] sm:$0xff] %v9862_v59  ;;  %v3497_v32 = vsel %vm3297_vm7, %v7632_v52, 0  ;;  %v3975_v13 = vrot.slane %v3967_v27, %v8842_v38 }
 0x5e6   : > { %v2968_v28 = vpop.f32.mrb[24].mxu1 }
 0x5e7   : > { %v7930_v1 = vpop.f32.mrb[25].mxu1 }
 0x5e8   : > { %v2971_v23 = vpop.f32.mrb[26].mxu1  ;;  %v3968_v1 = vcombine.high %v9732_v35, %v9737_v18 }
 0x5e9   : > { %v3283_v22 = vpack.c.bf16 %v2971_v23, %v2968_v28  ;;  %v7931_v43 = vpop.f32.mrb[27].mxu1  ;;  %v4391_v23 = vcombine.low %v9735_v21, %v9749_v41 }
 0x5ea   : > { %v3395_v43 = vsel %vm3297_vm7, %v7628_v42, 0 }
 0x5eb   : > { %7983 = vmatmul.mubr.msk.bf16.vlgmr.msra.gmra.mrb[32].mxu0 %vm2369_vm3, %v3283_v22  ;;  %v3983_v22 = vcombine.low %v9729_v24, %v9747_v5 }
 0x5ec   : > { %7993 = vmatpush3.bf16.msra.mxu0 %v3446_v33  ;;  %7994 = vmatprep.mubr.msk.bf16.mxu0 %vm8567_vm2, %v10944_v55  ;;  %v3984_v33 = vcombine.high %v9729_v24, %v9747_v5  ;;  %v4375_v24 = vcombine.low %v9727_v63, %v9739_v15  ;;  %v4392_v5 = vcombine.high %v9735_v21, %v9749_v41 }
 0x5ed   : > { %8004 = vmatprep.subr.bf16.mxu0 %v10944_v55  ;;  %v3982_v21 = vrot.slane %v3968_v1, %v8842_v38  ;;  %v4399_v41 = vrot.slane %v4391_v23, %v8842_v38 }
 0x60d   : > { %v3012_v54 = vpop.f32.mrb[16].mxu0 }
 0x60e   : > { %v7936_v57 = vpop.f32.mrb[17].mxu0 }
 0x60f   : > { %v3015_v48 = vpop.f32.mrb[18].mxu0  ;;  %v3991_v57 = vrot.slane %v3983_v22, %v8842_v38  ;;  %v4383_v22 = vrot.slane %v4375_v24, %v8842_v38 }
 0x610   : > { %v3284_v50 = vpack.c.bf16 %v3015_v48, %v3012_v54  ;;  %v7937_v61 = vpop.f32.mrb[19].mxu0  ;;  %v3998_v48 = vrot.slane %v3984_v33, %v8842_v38  ;;  %v4406_v33 = vrot.slane %v4392_v5, %v8842_v38  ;;  %v4256_v5 = vcombine.high %v9755_v25, %v9766_v53 }
 0x612   : > { %7977 = vmatmul.mubr.msk.bf16.vlgmr.msra.gmra.mrb[40].mxu1 %vm2369_vm3, %v3284_v50  ;;  %v4047_v52 = vcombine.low %v3982_v21, %v3998_v48 }
 0x613   : > { %7987 = vmatpush3.bf16.msra.mxu1 %v3395_v43  ;;  %7988 = vmatprep.mubr.msk.bf16.mxu1 %vm8567_vm2, %v10944_v55 }
 0x614   : > { %7998 = vmatprep.subr.bf16.mxu1 %v10944_v55  ;;  %v4055_v24 = vrot.slane %v4047_v52, %v8845_v47 }
 0x616   : > { %v3056_v36 = vpop.f32.mrb[28].mxu1  ;;  %v3100_v28 = vpop.f32.mrb[20].mxu0 }
 0x617   : > { %v7942_v54 = vpop.f32.mrb[29].mxu1  ;;  %v7948_v42 = vpop.f32.mrb[21].mxu0 }
 0x618   : > { %v3059_v50 = vpop.f32.mrb[30].mxu1  ;;  %v3103_v61 = vpop.f32.mrb[22].mxu0  ;;  %v3548_v54 = vsel %vm3297_vm7, %v7634_v19, 0  ;;  %v4376_v42 = vcombine.high %v9727_v63, %v9739_v15  ;;  %v4048_v15 = vcombine.high %v3982_v21, %v3998_v48  ;;  %v4440_v19 = vcombine.high %v4383_v22, %v4399_v41 }
 0x619   : > { %v3285_v43 = vpack.c.bf16 %v3059_v50, %v3056_v36  ;;  %v3286_v59 = vpack.c.bf16 %v3103_v61, %v3100_v28  ;;  %v7943_v35 = vpop.f32.mrb[31].mxu1  ;;  %v7949_v18 = vpop.f32.mrb[23].mxu0  ;;  %v4031_v36 = vcombine.low %v3975_v13, %v3991_v57  ;;  %v4032_v28 = vcombine.high %v3975_v13, %v3991_v57 }
 0x61a   : > { %v4390_v63 = vrot.slane %v4376_v42, %v8842_v38  ;;  %v4255_v13 = vcombine.low %v9755_v25, %v9766_v53  ;;  %v4062_v57 = vrot.slane %v4048_v15, %v8845_v47  ;;  %v4239_v48 = vcombine.low %v9546_v58, %v9762_v26 }
 0x61b   : > { %7989 = vmatmul.mubr.msk.bf16.vlgmr.msra.gmra.mrb[44].mxu1 %vm2369_vm3, %v3285_v43  ;;  %7995 = vmatmul.mubr.msk.bf16.vlgmr.msra.gmra.mrb[36].mxu0 %vm2369_vm3, %v3286_v59  ;;  %v4439_v59 = vcombine.low %v4383_v22, %v4399_v41  ;;  %v4039_v1 = vrot.slane %v4031_v36, %v8845_v47  ;;  %v4046_v23 = vrot.slane %v4032_v28, %v8845_v47 }
 0x61c   : > { %7999 = vmatpush3.bf16.msra.mxu1 %v3497_v32  ;;  %8005 = vmatpush3.bf16.msra.mxu0 %v3548_v54  ;;  %v4455_v32 = vcombine.low %v4390_v63, %v4406_v33  ;;  %v4456_v27 = vcombine.high %v4390_v63, %v4406_v33  ;;  %v3847_v50 = vcombine.low %v9753_v56, %v9764_v39 }
 0x61d   : > { %8000 = vmatprep.mubr.msk.bf16.mxu1 %vm8567_vm2, %v10944_v55  ;;  %8006 = vmatprep.mubr.msk.bf16.mxu0 %vm8567_vm2, %v10944_v55  ;;  %v3848_v61 = vcombine.high %v9753_v56, %v9764_v39  ;;  %v9926_v43 = vrot.slane %v4439_v59, %v8845_v47  ;;  %v9929_v35 = vrot.slane %v4440_v19, %v8845_v47 }
 0x61e   : > { %8010 = vmatprep.subr.bf16.mxu1 %v10944_v55  ;;  %8016 = vmatprep.subr.bf16.mxu0 %v10944_v55  ;;  %v4240_v25 = vcombine.high %v9546_v58, %v9762_v26  ;;  %v9934_v53 = vrot.slane %v4455_v32, %v8845_v47  ;;  %v3831_v18 = vcombine.low %v9552_v40, %v9760_v30 }
 0x61f   : > { %v3832_v54 = vcombine.high %v9552_v40, %v9760_v30  ;;  %v4263_v56 = vrot.slane %v4255_v13, %v8842_v38  ;;  %v9942_v39 = vrot.slane %v4456_v27, %v8845_v47  ;;  %v7656_v42 = vcombine.low %v4039_v1, %v4046_v23  ;;  %v7636_v27 = vld [vmem:[%s8693_s15 + $0x18] sm:$0xf] }
 0x620   : > { %v7658_v21 = vcombine.high %v4039_v1, %v4046_v23  ;;  %v4270_v41 = vrot.slane %v4256_v5, %v8842_v38  ;;  %v7660_v58 = vcombine.low %v4055_v24, %v4062_v57  ;;  %v4247_v26 = vrot.slane %v4239_v48, %v8842_v38  ;;  %v7638_v48 = vld [vmem:[%s8693_s15 + $0x1c] sm:$0xf] }
 0x621   : > { %v3855_v22 = vrot.slane %v3847_v50, %v8842_v38  ;;  %v3862_v33 = vrot.slane %v3848_v61, %v8842_v38  ;;  %v7664_v40 = vcombine.low %v9926_v43, %v9929_v35  ;;  %v7666_v30 = vcombine.high %v9926_v43, %v9929_v35 }
 0x622   : > { %v7662_v36 = vcombine.high %v4055_v24, %v4062_v57  ;;  %v4254_v28 = vrot.slane %v4240_v25, %v8842_v38  ;;  %v3839_v52 = vrot.slane %v3831_v18, %v8842_v38  ;;  %v3846_v63 = vrot.slane %v3832_v54, %v8842_v38 }
 0x623   : > { %v4303_v15 = vcombine.low %v4247_v26, %v4263_v56  ;;  %v4304_v59 = vcombine.high %v4247_v26, %v4263_v56  ;;  %v7668_v13 = vcombine.low %v9934_v53, %v9942_v39  ;;  %v7670_v1 = vcombine.high %v9934_v53, %v9942_v39 }
 0x624   : > { %v4319_v23 = vcombine.low %v4254_v28, %v4270_v41  ;;  %v4320_v5 = vcombine.high %v4254_v28, %v4270_v41  ;;  %v9962_v50 = vrot.slane %v7656_v42, %v8842_v38  ;;  %v3895_v61 = vcombine.low %v3839_v52, %v3855_v22 }
 0x625   : > { %v3896_v43 = vcombine.high %v3839_v52, %v3855_v22  ;;  %v3911_v35 = vcombine.low %v3846_v63, %v3862_v33  ;;  %v3912_v54 = vcombine.high %v3846_v63, %v3862_v33  ;;  %v3599_v53 = vsel %vm3297_vm7, %v7636_v27, 0 }
 0x626   : > { %v9966_v39 = vrot.slane %v7658_v21, %v8842_v38  ;;  %v4311_v41 = vrot.slane %v4303_v15, %v8845_v47  ;;  %v4318_v42 = vrot.slane %v4304_v59, %v8845_v47  ;;  %v3650_v28 = vsel %vm3297_vm7, %v7638_v48, 0 }
 0x627   : > { %v9972_v22 = vrot.slane %v7660_v58, %v8842_v38  ;;  %v4327_v33 = vrot.slane %v4319_v23, %v8845_v47  ;;  %v4334_v52 = vrot.slane %v4320_v5, %v8845_v47  ;;  %v3910_v21 = vrot.slane %v3896_v43, %v8845_v47 }
 0x628   : > { %v3144_v19 = vpop.f32.mrb[32].mxu1  ;;  %v3188_v32 = vpop.f32.mrb[24].mxu0  ;;  %v9986_v58 = vrot.slane %v7664_v40, %v8842_v38  ;;  %v3919_v63 = vrot.slane %v3911_v35, %v8845_v47  ;;  %v3926_v15 = vrot.slane %v3912_v54, %v8845_v47  ;;  %v7648_v59 = vcombine.low %v4311_v41, %v4318_v42 }
 0x629   : > { %v7954_v24 = vpop.f32.mrb[33].mxu1  ;;  %v7960_v57 = vpop.f32.mrb[25].mxu0  ;;  %v7654_v40 = vcombine.high %v4327_v33, %v4334_v52  ;;  %v9998_v27 = vrot.slane %v7668_v13, %v8842_v38  ;;  %v10001_v23 = vrot.slane %v7670_v1, %v8842_v38  ;;  %v4423_v48 = vcombine.low %v9777_v9, %v9783_v49 }
 0x62a   : > { %v3147_v25 = vpop.f32.mrb[34].mxu1  ;;  %v3191_v18 = vpop.f32.mrb[26].mxu0  ;;  %v7644_v57 = vcombine.low %v3919_v63, %v3926_v15  ;;  %v4791_v43 = vrot.slane %v7648_v59, %v8842_v38  ;;  %v4407_v54 = vcombine.low %v9771_v20, %v9779_v6 }
 0x62b   : > { %v3287_v56 = vpack.c.bf16 %v3147_v25, %v3144_v19  ;;  %v3288_v26 = vpack.c.bf16 %v3191_v18, %v3188_v32  ;;  %v7955_v12 = vpop.f32.mrb[35].mxu1  ;;  %v7961_v2 = vpop.f32.mrb[27].mxu0  ;;  %v7650_v19 = vcombine.high %v4311_v41, %v4318_v42  ;;  %v7652_v32 = vcombine.low %v4327_v33, %v4334_v52 }
 0x62c   : > { %v9979_v2 = vrot.slane %v7662_v36, %v8842_v38  ;;  %v3903_v12 = vrot.slane %v3895_v61, %v8845_v47  ;;  %v9992_v36 = vrot.slane %v7666_v30, %v8842_v38  ;;  %v7646_v30 = vcombine.high %v3919_v63, %v3926_v15 }
 0x62d   : > { %8001 = vmatmul.mubr.msk.bf16.vlgmr.msra.gmra.mrb[48].mxu1 %vm2369_vm3, %v3287_v56  ;;  %8007 = vmatmul.mubr.msk.bf16.vlgmr.msra.gmra.mrb[40].mxu0 %vm2369_vm3, %v3288_v26  ;;  %v4983_v61 = vcombine.low %v9962_v50, %v9966_v39  ;;  %v4807_v35 = vrot.slane %v7650_v19, %v8842_v38  ;;  %v4823_v25 = vrot.slane %v7652_v32, %v8842_v38 }
 0x62e   : > { %8011 = vmatpush3.bf16.msra.mxu1 %v3599_v53  ;;  %8012 = vmatprep.mubr.msk.bf16.mxu1 %vm8567_vm2, %v10944_v55  ;;  %v7640_v5 = vcombine.low %v3903_v12, %v3910_v21  ;;  %v7642_v24 = vcombine.high %v3903_v12, %v3910_v21  ;;  %v5015_v13 = vcombine.low %v9972_v22, %v9979_v2 }
 0x62f   : > { %8017 = vmatpush3.bf16.msra.mxu0 %v3650_v28  ;;  %8022 = vmatprep.subr.bf16.mxu1 %v10944_v55  ;;  %v5119_v1 = vcombine.low %v9986_v58, %v9992_v36  ;;  %v4839_v18 = vrot.slane %v7654_v40, %v8842_v38  ;;  %v4424_v56 = vcombine.high %v9777_v9, %v9783_v49 }
 0x630   : > { %8018 = vmatprep.mubr.msk.bf16.mxu0 %vm8567_vm2, %v10944_v55  ;;  %8028 = vmatprep.subr.bf16.mxu0 %v10944_v55  ;;  %v4655_v26 = vrot.slane %v7640_v5, %v8842_v38  ;;  %v4671_v53 = vrot.slane %v7642_v24, %v8842_v38  ;;  %v4015_v41 = vcombine.low %v9774_v4, %v9785_v14 }
 0x631   : > { %v4016_v42 = vcombine.high %v9774_v4, %v9785_v14  ;;  %v4687_v28 = vrot.slane %v7644_v57, %v8842_v38  ;;  %v4703_v33 = vrot.slane %v7646_v30, %v8842_v38  ;;  %v4408_v52 = vcombine.high %v9771_v20, %v9779_v6 }
 0x632   : > { %v4431_v12 = vrot.slane %v4423_v48, %v8842_v38  ;;  %v4847_v9 = vcombine.low %v4791_v43, %v4807_v35  ;;  %v4848_v49 = vcombine.high %v4791_v43, %v4807_v35  ;;  %v3999_v21 = vcombine.low %v9768_v7, %v9781_v31 }
 0x633   : > { %v4000_v63 = vcombine.high %v9768_v7, %v9781_v31  ;;  %v4879_v15 = vcombine.low %v4823_v25, %v4839_v18  ;;  %v4880_v59 = vcombine.high %v4823_v25, %v4839_v18  ;;  %v4415_v4 = vrot.slane %v4407_v54, %v8842_v38 }
 0x634   : > { %v4438_v14 = vrot.slane %v4424_v56, %v8842_v38  ;;  %v4711_v19 = vcombine.low %v4655_v26, %v4671_v53  ;;  %v4712_v32 = vcombine.high %v4655_v26, %v4671_v53  ;;  %v4023_v20 = vrot.slane %v4015_v41, %v8842_v38 }
 0x635   : > { %v4030_v6 = vrot.slane %v4016_v42, %v8842_v38  ;;  %v4743_v40 = vcombine.low %v4687_v28, %v4703_v33  ;;  %v4422_v5 = vrot.slane %v4408_v52, %v8842_v38  ;;  %v4471_v24 = vcombine.low %v4415_v4, %v4431_v12 }
 0x636   : > { %v4472_v57 = vcombine.high %v4415_v4, %v4431_v12  ;;  %v10040_v30 = vrot.slane %v4847_v9, %v8845_v47  ;;  %v4744_v7 = vcombine.high %v4687_v28, %v4703_v33  ;;  %v4007_v31 = vrot.slane %v3999_v21, %v8842_v38 }
 0x637   : > { %v4014_v48 = vrot.slane %v4000_v63, %v8842_v38  ;;  %v10045_v43 = vrot.slane %v4848_v49, %v8845_v47  ;;  %v10048_v35 = vrot.slane %v4879_v15, %v8845_v47  ;;  %v4487_v25 = vcombine.low %v4422_v5, %v4438_v14 }
 0x638   : > { %v4488_v18 = vcombine.high %v4422_v5, %v4438_v14  ;;  %v4063_v54 = vcombine.low %v4007_v31, %v4023_v20  ;;  %v4064_v56 = vcombine.high %v4007_v31, %v4023_v20  ;;  %v10051_v41 = vrot.slane %v4880_v59, %v8845_v47 }
 0x639   : > { %v4079_v26 = vcombine.low %v4014_v48, %v4030_v6  ;;  %v4080_v53 = vcombine.high %v4014_v48, %v4030_v6  ;;  %v10054_v42 = vrot.slane %v4711_v19, %v8845_v47  ;;  %v4479_v28 = vrot.slane %v4471_v24, %v8845_v47 }
 0x63a   : > { %v4486_v33 = vrot.slane %v4472_v57, %v8845_v47  ;;  %v10059_v52 = vrot.slane %v4712_v32, %v8845_v47  ;;  %v10062_v12 = vrot.slane %v4743_v40, %v8845_v47  ;;  %v10065_v9 = vrot.slane %v4744_v7, %v8845_v47 }
 0x63b   : > { %v10068_v49 = vrot.slane %v4983_v61, %v8845_v47  ;;  %v4495_v21 = vrot.slane %v4487_v25, %v8845_v47  ;;  %v4502_v63 = vrot.slane %v4488_v18, %v8845_v47  ;;  %v3879_v15 = vcombine.low %v9795_v3, %v9801_v17 }
 0x63c   : > { %v10075_v59 = vrot.slane %v5015_v13, %v8845_v47  ;;  %v4071_v4 = vrot.slane %v4063_v54, %v8845_v47  ;;  %v4078_v14 = vrot.slane %v4064_v56, %v8845_v47  ;;  %v4087_v19 = vrot.slane %v4079_v26, %v8845_v47 }
 0x63d   : > { %v4094_v32 = vrot.slane %v4080_v53, %v8845_v47  ;;  %v7665_v61 = vcombine.low %v4479_v28, %v4486_v33  ;;  %v3863_v20 = vcombine.low %v9789_v16, %v9799_v8  ;;  %v4287_v6 = vcombine.low %v9791_v0, %v9797_v46 }
 0x63e   : > { %v3880_v40 = vcombine.high %v9795_v3, %v9801_v17  ;;  %v7667_v13 = vcombine.high %v4479_v28, %v4486_v33  ;;  %v4271_v5 = vcombine.low %v9787_v10, %v9793_v62  ;;  %v3864_v24 = vcombine.high %v9789_v16, %v9799_v8 }
 0x63f   : > { %v4288_v57 = vcombine.high %v9791_v0, %v9797_v46  ;;  %v7669_v7 = vcombine.low %v4495_v21, %v4502_v63  ;;  %v7671_v31 = vcombine.high %v4495_v21, %v4502_v63  ;;  %v3887_v48 = vrot.slane %v3879_v15, %v8842_v38 }
 0x640   : > { %v5151_v25 = vcombine.low %v9998_v27, %v10001_v23  ;;  %v7657_v18 = vcombine.low %v4071_v4, %v4078_v14  ;;  %v7659_v54 = vcombine.high %v4071_v4, %v4078_v14  ;;  %v7661_v3 = vcombine.low %v4087_v19, %v4094_v32 }
 0x641   : > { %v4272_v17 = vcombine.high %v9787_v10, %v9793_v62  ;;  %v7663_v56 = vcombine.high %v4087_v19, %v4094_v32  ;;  %v3871_v26 = vrot.slane %v3863_v20, %v8842_v38  ;;  %v4295_v16 = vrot.slane %v4287_v6, %v8842_v38 }
 0x642   : > { %v3894_v0 = vrot.slane %v3880_v40, %v8842_v38  ;;  %v10102_v46 = vrot.slane %v7665_v61, %v8842_v38  ;;  %v4279_v8 = vrot.slane %v4271_v5, %v8842_v38  ;;  %v3878_v53 = vrot.slane %v3864_v24, %v8842_v38 }
 0x643   : > { %v4302_v28 = vrot.slane %v4288_v57, %v8842_v38  ;;  %v3927_v33 = vcombine.low %v3871_v26, %v3887_v48  ;;  %v3928_v21 = vcombine.high %v3871_v26, %v3887_v48  ;;  %v10111_v10 = vrot.slane %v5119_v1, %v8845_v47 }
 0x644   : > { %v10114_v62 = vrot.slane %v5151_v25, %v8845_v47  ;;  %v10117_v63 = vrot.slane %v7667_v13, %v8842_v38  ;;  %v10120_v15 = vrot.slane %v7669_v7, %v8842_v38  ;;  %v10123_v4 = vrot.slane %v7671_v31, %v8842_v38 }
 0x645   : > { %v4286_v14 = vrot.slane %v4272_v17, %v8842_v38  ;;  %v4335_v19 = vcombine.low %v4279_v8, %v4295_v16  ;;  %v4336_v32 = vcombine.high %v4279_v8, %v4295_v16  ;;  %v3943_v61 = vcombine.low %v3878_v53, %v3894_v0 }
 0x646   : > { %v3944_v20 = vcombine.high %v3878_v53, %v3894_v0  ;;  %v10127_v1 = vrot.slane %v7657_v18, %v8842_v38  ;;  %v10130_v6 = vrot.slane %v7659_v54, %v8842_v38  ;;  %v3935_v5 = vrot.slane %v3927_v33, %v8845_v47 }
 0x647   : > { %v4351_v40 = vcombine.low %v4286_v14, %v4302_v28  ;;  %v4352_v13 = vcombine.high %v4286_v14, %v4302_v28  ;;  %v3942_v24 = vrot.slane %v3928_v21, %v8845_v47  ;;  %v5047_v57 = vcombine.low %v10068_v49, %v10075_v59 }
 0x648   : > { %v5183_v7 = vcombine.low %v10111_v10, %v10114_v62  ;;  %v4984_v31 = vcombine.high %v9962_v50, %v9966_v39  ;;  %v5016_v48 = vcombine.high %v9972_v22, %v9979_v2  ;;  %v5120_v25 = vcombine.high %v9986_v58, %v9992_v36 }
 0x649   : > { %v5152_v18 = vcombine.high %v9998_v27, %v10001_v23  ;;  %v4343_v54 = vrot.slane %v4335_v19, %v8845_v47  ;;  %v4350_v17 = vrot.slane %v4336_v32, %v8845_v47  ;;  %v3951_v26 = vrot.slane %v3943_v61, %v8845_v47 }
 0x64a   : > { %v3958_v16 = vrot.slane %v3944_v20, %v8845_v47  ;;  %v10151_v0 = vrot.slane %v7661_v3, %v8842_v38  ;;  %v10154_v50 = vrot.slane %v7663_v56, %v8842_v38  ;;  %v4359_v39 = vrot.slane %v4351_v40, %v8845_v47 }
 0x64b   : > { %v4366_v22 = vrot.slane %v4352_v13, %v8845_v47  ;;  %v7641_v2 = vcombine.low %v3935_v5, %v3942_v24  ;;  %v7643_v58 = vcombine.high %v3935_v5, %v3942_v24  ;;  %v5471_v27 = vpack.c.bf16 %v5183_v7, %v5047_v57 }
 0x64c   : > { %v4775_v23 = vcombine.low %v10054_v42, %v10062_v12  ;;  %v10161_v53 = vrot.slane %v4984_v31, %v8845_v47  ;;  %v10164_v3 = vrot.slane %v5016_v48, %v8845_v47  ;;  %v10167_v56 = vrot.slane %v5120_v25, %v8845_v47 }
 0x64d   : > { %v10170_v28 = vrot.slane %v5152_v18, %v8845_v47  ;;  %v7649_v33 = vcombine.low %v4343_v54, %v4350_v17  ;;  %v7651_v21 = vcombine.high %v4343_v54, %v4350_v17  ;;  %v7645_v14 = vcombine.low %v3951_v26, %v3958_v16 }
 0x64e   : > { %v7647_v19 = vcombine.high %v3951_v26, %v3958_v16  ;;  %v7653_v61 = vcombine.low %v4359_v39, %v4366_v22  ;;  %v5048_v13 = vcombine.high %v10068_v49, %v10075_v59  ;;  %v5184_v5 = vcombine.high %v10111_v10, %v10114_v62 }
 0x64f   : > { %v4999_v24 = vcombine.low %v10127_v1, %v10130_v6  ;;  %v5031_v57 = vcombine.low %v10151_v0, %v10154_v50  ;;  %v5135_v7 = vcombine.low %v10102_v46, %v10117_v63  ;;  %v5167_v31 = vcombine.low %v10120_v15, %v10123_v4 }
 0x650   : > { %v7655_v48 = vcombine.high %v4359_v39, %v4366_v22  ;;  %v5491_v49 = vsel %vm2369_vm3, %v5471_v27, 0  ;;  %v5049_v59 = vcombine.low %v10161_v53, %v10164_v3  ;;  %v5185_v10 = vcombine.low %v10167_v56, %v10170_v28 }
 0x651   : > { %v3232_v36 = vpop.f32.mrb[36].mxu1  ;;  %v10191_v62 = vrot.slane %v7641_v2, %v8842_v38  ;;  %v10194_v25 = vrot.slane %v7643_v58, %v8842_v38  ;;  %v4911_v54 = vcombine.low %v10040_v30, %v10048_v35  ;;  %v10201_v17 = vrot.slane %v7649_v33, %v8842_v38 }
 0x652   : > { %v7966_v8 = vpop.f32.mrb[37].mxu1  ;;  %v10204_v26 = vrot.slane %v7645_v14, %v8842_v38  ;;  %v10207_v16 = vrot.slane %v7647_v19, %v8842_v38  ;;  %v5472_v22 = vpack.c.bf16 %v5184_v5, %v5048_v13  ;;  %v10211_v58 = vrot.slane %v4999_v24, %v8845_v47 }
 0x653   : > { %v3235_v32 = vpop.f32.mrb[38].mxu1  ;;  %v10217_v27 = vrot.slane %v5135_v7, %v8845_v47  ;;  %v10220_v8 = vrot.slane %v5167_v31, %v8845_v47  ;;  %v10223_v33 = vrot.slane %v7651_v21, %v8842_v38  ;;  %v10226_v14 = vrot.slane %v7653_v61, %v8842_v38 }
 0x654   : > { %v3289_v20 = vpack.c.bf16 %v3235_v32, %v3232_v36  ;;  %v7967_v40 = vpop.f32.mrb[39].mxu1  ;;  %v10214_v36 = vrot.slane %v5031_v57, %v8845_v47  ;;  %v4727_v13 = vcombine.low %v10191_v62, %v10194_v25  ;;  %v5463_v5 = vpack.c.bf16 %v4911_v54, %v4775_v23 }
 0x655   : > { %v10229_v40 = vrot.slane %v7655_v48, %v8842_v38  ;;  %v4776_v24 = vcombine.high %v10054_v42, %v10062_v12  ;;  %v5538_v21 = vsel %vm2369_vm3, %v5472_v22, 0  ;;  %v4912_v61 = vcombine.high %v10040_v30, %v10048_v35 }
 0x656   : > { %8013 = vmatmul.mubr.msk.bf16.vlgmr.msra.gmra.mrb[52].mxu1 %vm2369_vm3, %v3289_v20  ;;  %v5473_v20 = vpack.c.bf16 %v5185_v10, %v5049_v59  ;;  %v5050_v57 = vcombine.high %v10161_v53, %v10164_v3  ;;  %v5186_v7 = vcombine.high %v10167_v56, %v10170_v28  ;;  %v5051_v42 = vcombine.low %v10211_v58, %v10214_v36 }
 0x657   : > { %8023 = vmatpush3.bf16.xpose.msra.mxu1 %v5491_v49  ;;  %v3276_v18 = vpop.f32.mrb[28].mxu0  ;;  %8024 = vmatprep.mubr.msk.bf16.mxu1 %vm8567_vm2, %v10944_v55  ;;  %v5187_v12 = vcombine.low %v10217_v27, %v10220_v8  ;;  %v5000_v23 = vcombine.high %v10127_v1, %v10130_v6  ;;  %v5032_v35 = vcombine.high %v10151_v0, %v10154_v50 }
 0x658   : > { %v7972_v39 = vpop.f32.mrb[29].mxu0  ;;  %8034 = vmatprep.subr.bf16.mxu1 %v10944_v55  ;;  %v5585_v30 = vsel %vm2369_vm3, %v5473_v20, 0  ;;  %v5136_v53 = vcombine.high %v10102_v46, %v10117_v63  ;;  %v5168_v3 = vcombine.high %v10120_v15, %v10123_v4  ;;  %v4863_v56 = vcombine.low %v10201_v17, %v10223_v33 }
 0x659   : > { %v3279_v2 = vpop.f32.mrb[30].mxu0  ;;  %v4895_v1 = vcombine.low %v10226_v14, %v10229_v40  ;;  %v4759_v6 = vcombine.low %v10204_v26, %v10207_v16  ;;  %v4777_v46 = vcombine.low %v10059_v52, %v10065_v9  ;;  %v4913_v63 = vcombine.low %v10045_v43, %v10051_v41 }
 0x65a   : > { %v3290_v19 = vpack.c.bf16 %v3279_v2, %v3276_v18  ;;  %v7973_v32 = vpop.f32.mrb[31].mxu0  ;;  %v5474_v15 = vpack.c.bf16 %v5186_v7, %v5050_v57  ;;  %v5464_v4 = vpack.c.bf16 %v4912_v61, %v4776_v24  ;;  %v5475_v0 = vpack.c.bf16 %v5187_v12, %v5051_v42 }
 0x65b   : > { %v10274_v50 = vrot.slane %v5000_v23, %v8845_v47  ;;  %v10277_v28 = vrot.slane %v5032_v35, %v8845_v47  ;;  %v5150_v31 = vrot.slane %v5136_v53, %v8845_v47  ;;  %v5182_v48 = vrot.slane %v5168_v3, %v8845_v47 }
 0x65c   : > { %8019 = vmatmul.mubr.msk.bf16.vlgmr.msra.gmra.mrb[44].mxu0 %vm2369_vm3, %v3290_v19  ;;  %v4871_v49 = vrot.slane %v4863_v56, %v8845_v47  ;;  %v4903_v59 = vrot.slane %v4895_v1, %v8845_v47  ;;  %v4735_v10 = vrot.slane %v4727_v13, %v8845_v47  ;;  %v4767_v18 = vrot.slane %v4759_v6, %v8845_v47 }
 0x65d   : > { %8029 = vmatpush3.bf16.xpose.msra.mxu0 %v5538_v21  ;;  %8030 = vmatprep.mubr.msk.bf16.mxu0 %vm8567_vm2, %v10944_v55  ;;  %v5465_v54 = vpack.c.bf16 %v4913_v63, %v4777_v46  ;;  %v5632_v39 = vsel %vm2369_vm3, %v5474_v15, 0  ;;  %v5052_v22 = vcombine.high %v10211_v58, %v10214_v36  ;;  %v5188_v2 = vcombine.high %v10217_v27, %v10220_v8 }
 0x65e   : > { %8025 = vmatmul.mubr.msk.bf16.vlgmr.msra.gmra.mrb[56].mxu1 %vm2369_vm3, %v5463_v5  ;;  %8040 = vmatprep.subr.bf16.mxu0 %v10944_v55  ;;  %v4728_v19 = vcombine.high %v10191_v62, %v10194_v25  ;;  %v4760_v32 = vcombine.high %v10204_v26, %v10207_v16  ;;  %v4778_v20 = vcombine.high %v10059_v52, %v10065_v9  ;;  %v5679_v58 = vsel %vm2369_vm3, %v5475_v0, 0 }
 0x65f   : > { %8035 = vmatpush3.bf16.xpose.msra.mxu1 %v5585_v30  ;;  %8036 = vmatprep.mubr.msk.bf16.mxu1 %vm8567_vm2, %v10944_v55  ;;  %v4914_v36 = vcombine.high %v10045_v43, %v10051_v41  ;;  %v5053_v62 = vcombine.low %v10274_v50, %v10277_v28  ;;  %v5189_v25 = vcombine.low %v5150_v31, %v5182_v48 }
 0x660   : > { %8046 = vmatprep.subr.bf16.mxu1 %v10944_v55  ;;  %v4864_v26 = vcombine.high %v10201_v17, %v10223_v33  ;;  %v4896_v16 = vcombine.high %v10226_v14, %v10229_v40  ;;  %v4779_v52 = vcombine.low %v4735_v10, %v4767_v18  ;;  %v4915_v9 = vcombine.low %v4871_v49, %v4903_v59 }
 0x661   : > { %v5476_v27 = vpack.c.bf16 %v5188_v2, %v5052_v22  ;;  %v5391_v43 = vcombine.low %v9836_v44, %v9839_v37  ;;  %v5423_v41 = vcombine.low %v9842_v11, %v9845_v60  ;;  %v4742_v17 = vrot.slane %v4728_v19, %v8845_v47 }
 0x662   : > { %v4774_v8 = vrot.slane %v4760_v32, %v8845_v47  ;;  %v5466_v33 = vpack.c.bf16 %v4914_v36, %v4778_v20  ;;  %v5477_v14 = vpack.c.bf16 %v5189_v25, %v5053_v62  ;;  %v4878_v40 = vrot.slane %v4864_v26, %v8845_v47 }
 0x663   : > { %v4910_v13 = vrot.slane %v4896_v16, %v8845_v47  ;;  %v5255_v5 = vcombine.low %v9824_v29, %v9827_v45  ;;  %v5287_v24 = vcombine.low %v9830_v34, %v9833_v51  ;;  %v5467_v44 = vpack.c.bf16 %v4915_v9, %v4779_v52 }
 0x664   : > { %8031 = vmatmul.mubr.msk.bf16.vlgmr.msra.gmra.mrb[48].mxu0 %vm2369_vm3, %v5464_v4  ;;  %v5726_v37 = vsel %vm2369_vm3, %v5476_v27, 0  ;;  %v5054_v11 = vcombine.high %v10274_v50, %v10277_v28  ;;  %v5190_v60 = vcombine.high %v5150_v31, %v5182_v48  ;;  %v5399_v21 = vrot.slane %v5391_v43, %v8845_v47 }
 0x665   : > { %8041 = vmatpush3.bf16.xpose.msra.mxu0 %v5632_v39  ;;  %8042 = vmatprep.mubr.msk.bf16.mxu0 %vm8567_vm2, %v10944_v55  ;;  %v5431_v29 = vrot.slane %v5423_v41, %v8845_v47  ;;  %v5773_v45 = vsel %vm2369_vm3, %v5477_v14, 0  ;;  %v4780_v34 = vcombine.high %v4735_v10, %v4767_v18  ;;  %v4916_v51 = vcombine.high %v4871_v49, %v4903_v59 }
 0x666   : > { %8037 = vmatmul.mubr.msk.bf16.vlgmr.msra.gmra.mrb[60].mxu1 %vm2369_vm3, %v5465_v54  ;;  %8052 = vmatprep.subr.bf16.mxu0 %v10944_v55  ;;  %v5263_v61 = vrot.slane %v5255_v5, %v8845_v47  ;;  %v5295_v57 = vrot.slane %v5287_v24, %v8845_v47  ;;  %v4781_v7 = vcombine.low %v4742_v17, %v4774_v8 }
 0x667   : > { %8047 = vmatpush3.bf16.xpose.msra.mxu1 %v5679_v58  ;;  %8048 = vmatprep.mubr.msk.bf16.mxu1 %vm8567_vm2, %v10944_v55  ;;  %v4917_v42 = vcombine.low %v4878_v40, %v4910_v13  ;;  %v5478_v12 = vpack.c.bf16 %v5190_v60, %v5054_v11  ;;  %v5455_v23 = vcombine.low %v5399_v21, %v5431_v29 }
 0x668   : > { %8058 = vmatprep.subr.bf16.mxu1 %v10944_v55  ;;  %v5468_v30 = vpack.c.bf16 %v4916_v51, %v4780_v34  ;;  %v5319_v35 = vcombine.low %v5263_v61, %v5295_v57  ;;  %v4782_v1 = vcombine.high %v4742_v17, %v4774_v8  ;;  %v4918_v6 = vcombine.high %v4878_v40, %v4910_v13 }
 0x669   : > { %v5469_v53 = vpack.c.bf16 %v4917_v42, %v4781_v7  ;;  %v5820_v3 = vsel %vm2369_vm3, %v5478_v12, 0  ;;  %v5456_v46 = vcombine.high %v5399_v21, %v5431_v29  ;;  %v5320_v63 = vcombine.high %v5263_v61, %v5295_v57  ;;  %v10945_v57 = vld [vmem:[#allocation9_spill] sm:$0xff] }
 0x66a   : > { %v5479_v56 = vpack.c.bf16 %v5455_v23, %v5319_v35  ;;  %v5470_v15 = vpack.c.bf16 %v4918_v6, %v4782_v1  ;;  %v10946_v35 = vld [vmem:[#allocation10_spill] sm:$0xff] }
 0x66b   : > { %v5480_v4 = vpack.c.bf16 %v5456_v46, %v5320_v63 }
 0x66c   : > { %8043 = vmatmul.mubr.msk.bf16.vlgmr.msra.gmra.mrb[52].mxu0 %vm2369_vm3, %v5466_v33 }
 0x66d   : > { %8053 = vmatpush3.bf16.xpose.msra.mxu0 %v5726_v37  ;;  %8054 = vmatprep.mubr.msk.bf16.mxu0 %vm8567_vm2, %v10944_v55 }
 0x66e   : > { %8049 = vmatmul.mubr.msk.bf16.vlgmr.msra.gmra.mrb[64].mxu1 %vm2369_vm3, %v5467_v44  ;;  %8064 = vmatprep.subr.bf16.mxu0 %v10944_v55 }
 0x66f   : > { %8059 = vmatpush3.bf16.xpose.msra.mxu1 %v5773_v45  ;;  %8060 = vmatprep.mubr.msk.bf16.mxu1 %vm8567_vm2, %v10944_v55 }
 0x670   : > { %8070 = vmatprep.subr.bf16.mxu1 %v10944_v55 }
 0x674   : > { %8055 = vmatmul.mubr.msk.bf16.vlgmr.msra.gmra.mrb[56].mxu0 %vm2369_vm3, %v5468_v30 }
 0x675   : > { %8065 = vmatpush3.bf16.xpose.msra.mxu0 %v5820_v3  ;;  %8066 = vmatprep.mubr.msk.bf16.mxu0 %vm8567_vm2, %v10944_v55 }
 0x676   : > { %8061 = vmatmul.mubr.msk.bf16.vlgmr.msra.gmra.mrb[68].mxu1 %vm2369_vm3, %v5469_v53  ;;  %8076 = vmatprep.subr.bf16.mxu0 %v10944_v55 }
 0x677   : > { %8071 = vmatpush3.bf16.msra.mxu1 %v5479_v56  ;;  %8072 = vmatprep.mubr.msk.bf16.mxu1 %vm8567_vm2, %v10944_v55 }
 0x678   : > { %8082 = vmatprep.subr.bf16.mxu1 %v10944_v55 }
 0x67c   : > { %8067 = vmatmul.mubr.msk.bf16.vlgmr.msra.gmra.mrb[60].mxu0 %vm2369_vm3, %v5470_v15 }
 0x67d   : > { %8077 = vmatpush3.bf16.msra.mxu0 %v5480_v4  ;;  %8078 = vmatprep.mubr.msk.bf16.mxu0 %vm8567_vm2, %v10944_v55 }
 0x67e   : > { %8088 = vmatprep.subr.bf16.mxu0 %v10944_v55 }
 0x6be   : > { %v3382_v0 = vpop.f32.mrb[32].mxu0 }
 0x6bf   : > { %v7984_v50 = vpop.f32.mrb[33].mxu0 }
 0x6c0   : > { %v3385_v28 = vpop.f32.mrb[34].mxu0 }
 0x6c1   : > { %v7985_v31 = vpop.f32.mrb[35].mxu0 }
 0x6e5   : > { %v3335_v48 = vpop.f32.mrb[40].mxu1 }
 0x6e6   : > { %v3383_v49 = vadd.f32 %v3382_v0, %v3335_v48  ;;  %v7978_v59 = vpop.f32.mrb[41].mxu1 }
 0x6e7   : > { %v3338_v10 = vpop.f32.mrb[42].mxu1 }
 0x6e8   : > { %v3386_v18 = vadd.f32 %v3385_v28, %v3338_v10  ;;  %v7979_v54 = vpop.f32.mrb[43].mxu1 }
 0x6ee   : > { %v3431_v39 = vpop.f32.mrb[44].mxu1  ;;  %v3482_v22 = vpop.f32.mrb[36].mxu0 }
 0x6ef   : > { %v3438_v2 = vadd.f32 %v3431_v39, %v3383_v49  ;;  %v7990_v19 = vpop.f32.mrb[45].mxu1  ;;  %v7996_v32 = vpop.f32.mrb[37].mxu0 }
 0x6f0   : > { %v3434_v20 = vpop.f32.mrb[46].mxu1  ;;  %v3485_v58 = vpop.f32.mrb[38].mxu0 }
 0x6f1   : > { %v3489_v36 = vadd.f32 %v3482_v22, %v3438_v2  ;;  %v3439_v62 = vadd.f32 %v3434_v20, %v3386_v18  ;;  %v7991_v25 = vpop.f32.mrb[47].mxu1  ;;  %v7997_v26 = vpop.f32.mrb[39].mxu0 }
 0x6f3   : > { %v3490_v16 = vadd.f32 %v3485_v58, %v3439_v62 }
 0x700   : > { %v3533_v52 = vpop.f32.mrb[48].mxu1  ;;  %v3584_v9 = vpop.f32.mrb[40].mxu0 }
 0x701   : > { %v3540_v27 = vadd.f32 %v3533_v52, %v3489_v36  ;;  %v8002_v43 = vpop.f32.mrb[49].mxu1  ;;  %v8008_v41 = vpop.f32.mrb[41].mxu0 }
 0x702   : > { %v3536_v17 = vpop.f32.mrb[50].mxu1  ;;  %v3587_v8 = vpop.f32.mrb[42].mxu0 }
 0x703   : > { %v3591_v33 = vadd.f32 %v3584_v9, %v3540_v27  ;;  %v3541_v14 = vadd.f32 %v3536_v17, %v3490_v16  ;;  %v8003_v40 = vpop.f32.mrb[51].mxu1  ;;  %v8009_v13 = vpop.f32.mrb[43].mxu0 }
 0x705   : > { %v3592_v5 = vadd.f32 %v3587_v8, %v3541_v14 }
 0x729   : > { %v3635_v24 = vpop.f32.mrb[52].mxu1 }
 0x72a   : > { %v3642_v44 = vadd.f32 %v3635_v24, %v3591_v33  ;;  %v8014_v37 = vpop.f32.mrb[53].mxu1 }
 0x72b   : > { %v3638_v11 = vpop.f32.mrb[54].mxu1 }
 0x72c   : > { %v3643_v60 = vadd.f32 %v3638_v11, %v3592_v5  ;;  %v8015_v21 = vpop.f32.mrb[55].mxu1 }
 0x72d   : > { %v10947_v21 = vld [vmem:[#allocation12_spill] sm:$0xff] }
 0x72f   : > { %v3686_v29 = vpop.f32.mrb[44].mxu0 }
 0x730   : > { %v10354_v45 = vadd.f32 %v3686_v29, %v3642_v44  ;;  %v8020_v34 = vpop.f32.mrb[45].mxu0  ;;  %v10948_v29 = vld [vmem:[#allocation11_spill] sm:$0xff] }
 0x731   : > { %v5527_v51 = vpop.f32.mrb[56].mxu1  ;;  %v3689_v61 = vpop.f32.mrb[46].mxu0 }
 0x732   : > { %v10357_v7 = vadd.f32 %v5527_v51, %v10945_v57  ;;  %v8026_v42 = vpop.f32.mrb[57].mxu1  ;;  %v10359_v12 = vadd.f32 %v3689_v61, %v3643_v60  ;;  %v8021_v23 = vpop.f32.mrb[47].mxu0 }
 0x733   : > { %v5530_v30 = vpop.f32.mrb[58].mxu1 }
 0x734   : > { %v10362_v53 = vadd.f32 %v5530_v30, %v10946_v35  ;;  %v8027_v3 = vpop.f32.mrb[59].mxu1  ;;  %v5863_v56 = vsel %vm2746_vm6, %v10357_v7, -inf }
 0x735   : > { %5864 = vmax.xlane.f32.xlu0 %v5863_v56 }
 0x736   : > { %v5866_v1 = vsel %vm2746_vm6, %v10362_v53, -inf }
 0x737   : > { %5867 = vmax.xlane.f32.xlu1 %v5866_v1  ;;  %v5574_v6 = vpop.f32.mrb[48].mxu0 }
 0x738   : > { %v10369_v46 = vadd.f32 %v5574_v6, %v10945_v57  ;;  %v8032_v63 = vpop.f32.mrb[49].mxu0 }
 0x739   : > { %v5621_v15 = vpop.f32.mrb[60].mxu1  ;;  %v5577_v4 = vpop.f32.mrb[50].mxu0 }
 0x73a   : > { %v8038_v0 = vpop.f32.mrb[61].mxu1  ;;  %v10372_v50 = vadd.f32 %v5577_v4, %v10946_v35  ;;  %v8033_v28 = vpop.f32.mrb[51].mxu0  ;;  %v5869_v31 = vsel %vm2746_vm6, %v10369_v46, -inf  ;;  %v10413_v34 = vadd.f32 %v5621_v15, %v10945_v57 }
 0x73b   : > { %v5624_v48 = vpop.f32.mrb[62].mxu1  ;;  %5870 = vmax.xlane.f32.xlu0 %v5869_v31  ;;  %v10444_v15 = vpop.permute.xlu1 %3809 }
 0x73c   : > { %v10377_v49 = vadd.f32 %v5624_v48, %v10946_v35  ;;  %v8039_v59 = vpop.f32.mrb[63].mxu1  ;;  %v5872_v18 = vsel %vm2746_vm6, %v10372_v50, -inf  ;;  %v5875_v61 = vsel %vm2746_vm6, %v10413_v34, -inf  ;;  %v10448_v0 = vpop.permute.xlu0 %3807 }
 0x73e   : > { %v5878_v10 = vsel %vm2746_vm6, %v10377_v49, -inf }
 0x73f   : > { %5879 = vmax.xlane.f32.xlu1 %v5878_v10  ;;  %v5668_v54 = vpop.f32.mrb[52].mxu0  ;;  %5873 = vmax.xlane.f32.xlu0 %v5872_v18  ;;  %v10446_v4 = vpop.permute.xlu1 %3813 }
 0x740   : > { %v8044_v39 = vpop.f32.mrb[53].mxu0  ;;  %v10416_v51 = vadd.f32 %v5668_v54, %v10945_v57 }
 0x741   : > { %v5715_v22 = vpop.f32.mrb[64].mxu1  ;;  %v5671_v2 = vpop.f32.mrb[54].mxu0 }
 0x742   : > { %v8050_v19 = vpop.f32.mrb[65].mxu1  ;;  %v10384_v32 = vadd.f32 %v5671_v2, %v10946_v35  ;;  %v8045_v20 = vpop.f32.mrb[55].mxu0  ;;  %v10421_v42 = vadd.f32 %v5715_v22, %v10945_v57  ;;  %v5881_v23 = vsel %vm2746_vm6, %v10416_v51, -inf }
 0x743   : > { %v5718_v58 = vpop.f32.mrb[66].mxu1  ;;  %v10450_v28 = vpop.permute.xlu1 %3815 }
 0x744   : > { %v10387_v36 = vadd.f32 %v5718_v58, %v10946_v35  ;;  %v8051_v62 = vpop.f32.mrb[67].mxu1  ;;  %v5884_v25 = vsel %vm2746_vm6, %v10384_v32, -inf }
 0x745   : > { %5885 = vmax.xlane.f32.xlu1 %v5884_v25 }
 0x746   : > { %v5890_v52 = vsel %vm2746_vm6, %v10387_v36, -inf }
 0x747   : > { %v5762_v26 = vpop.f32.mrb[56].mxu0 }
 0x748   : > { %v8056_v16 = vpop.f32.mrb[57].mxu0  ;;  %v10426_v30 = vadd.f32 %v5762_v26, %v10945_v57 }
 0x749   : > { %v5809_v9 = vpop.f32.mrb[68].mxu1  ;;  %v5765_v27 = vpop.f32.mrb[58].mxu0  ;;  %5891 = vmax.xlane.f32.xlu1 %v5890_v52 }
 0x74a   : > { %v8062_v43 = vpop.f32.mrb[69].mxu1  ;;  %v10394_v41 = vadd.f32 %v5765_v27, %v10946_v35  ;;  %v8057_v17 = vpop.f32.mrb[59].mxu0  ;;  %v10431_v3 = vadd.f32 %v5809_v9, %v10945_v57  ;;  %v5893_v56 = vsel %vm2746_vm6, %v10426_v30, -inf }
 0x74b   : > { %v5812_v8 = vpop.f32.mrb[70].mxu1 }
 0x74c   : > { %v10397_v33 = vadd.f32 %v5812_v8, %v10946_v35  ;;  %v8063_v14 = vpop.f32.mrb[71].mxu1  ;;  %v5896_v40 = vsel %vm2746_vm6, %v10394_v41, -inf  ;;  %v5899_v6 = vsel %vm2746_vm6, %v10431_v3, -inf }
 0x74d   : > { %5897 = vmax.xlane.f32.xlu1 %v5896_v40 }
 0x74e   : > { %v5902_v24 = vsel %vm2746_vm6, %v10397_v33, -inf }
 0x74f   : > { %v5856_v13 = vpop.f32.mrb[60].mxu0 }
 0x750   : > { %v8068_v5 = vpop.f32.mrb[61].mxu0  ;;  %v10436_v1 = vadd.f32 %v5856_v13, %v10945_v57 }
 0x751   : > { %v5859_v44 = vpop.f32.mrb[62].mxu0  ;;  %5903 = vmax.xlane.f32.xlu1 %v5902_v24 }
 0x752   : > { %v10404_v37 = vadd.f32 %v5859_v44, %v10946_v35  ;;  %v8069_v11 = vpop.f32.mrb[63].mxu0  ;;  %v5887_v35 = vsel %vm2746_vm6, %v10421_v42, -inf  ;;  %v5905_v63 = vsel %vm2746_vm6, %v10436_v1, -inf }
 0x754   : > { %v5908_v60 = vsel %vm2746_vm6, %v10404_v37, -inf }
 0x755   : > { %3819 = vrot.lane.b32.xlu0 %v10947_v21, %s8569_s16  ;;  %5909 = vmax.xlane.f32.xlu1 %v5908_v60 }
 0x766   : > { %3821 = vrot.lane.b32.xlu1 %v10948_v29, %s8569_s16 }
 0x774   : > { %5876 = vmax.xlane.f32.xlu0 %v5875_v61 }
 0x778   : > { %5882 = vmax.xlane.f32.xlu0 %v5881_v23 }
 0x77c   : > { %5888 = vmax.xlane.f32.xlu0 %v5887_v35 }
 0x780   : > { %5894 = vmax.xlane.f32.xlu0 %v5893_v56 }
 0x784   : > { %5900 = vmax.xlane.f32.xlu0 %v5899_v6 }
 0x788   : > { %5906 = vmax.xlane.f32.xlu0 %v5905_v63 }
 0x79e   : > { %3825 = vrot.lane.b32.xlu0 %v10947_v21, %s8570_s17 }
 0x7c2   : > { %v5865_v57 = vpop.xlane.xlu0 %5864 }
 0x7c3   : > { %v5911_v31 = vsub.f32 %v10357_v7, %v5865_v57 }
 0x7c4   : > { %v5868_v48 = vpop.xlane.xlu1 %5867 }
 0x7c5   : > { %v5927_v59 = vmul.f32 1.442695, %v5911_v31  ;;  %v5912_v10 = vsub.f32 %v10362_v53, %v5868_v48 }
 0x7c7   : > { %8353 = vpow2.f32 %v5927_v59  ;;  %v5929_v18 = vmul.f32 1.442695, %v5912_v10 }
 0x7c8   : > { %v5871_v54 = vpop.xlane.xlu0 %5870 }
 0x7c9   : > { %8355 = vpow2.f32 %v5929_v18  ;;  %v5913_v39 = vsub.f32 %v10369_v46, %v5871_v54 }
 0x7cb   : > { %v5931_v22 = vmul.f32 1.442695, %v5913_v39 }
 0x7cc   : > { %v5880_v2 = vpop.xlane.xlu1 %5879  ;;  %v5874_v19 = vpop.xlane.xlu0 %5873 }
 0x7cd   : > { %8357 = vpow2.f32 %v5931_v22  ;;  %v5916_v20 = vsub.f32 %v10377_v49, %v5880_v2  ;;  %v5914_v58 = vsub.f32 %v10372_v50, %v5874_v19 }
 0x7cf   : > { %v5933_v62 = vmul.f32 1.442695, %v5914_v58  ;;  %v5937_v7 = vmul.f32 1.442695, %v5916_v20 }
 0x7d0   : > { %v10457_v25 = vpop.permute.xlu0 %3819 }
 0x7d1   : > { %v10459_v26 = vpop.eup %8353  ;;  %v4135_v53 = vcombine.low %v10448_v0, %v10457_v25  ;;  %v4136_v46 = vcombine.high %v10448_v0, %v10457_v25  ;;  %8359 = vpow2.f32 %v5933_v62 }
 0x7d2   : > { %v5959_v16 = vsel %vm2746_vm6, %v10459_v26, 0.0  ;;  %v5886_v52 = vpop.xlane.xlu1 %5885  ;;  %8361 = vpow2.f32 %v5937_v7 }
 0x7d3   : > { %v10467_v49 = vpop.eup %8355  ;;  %5960 = vadd.xlane.f32.xlu0 %v5959_v16  ;;  %v5918_v35 = vsub.f32 %v10384_v32, %v5886_v52 }
 0x7d4   : > { %v5962_v50 = vsel %vm2746_vm6, %v10467_v49, 0.0 }
 0x7d5   : > { %5963 = vadd.xlane.f32.xlu1 %v5962_v50  ;;  %v5941_v31 = vmul.f32 1.442695, %v5918_v35 }
 0x7d6   : > { %v5892_v9 = vpop.xlane.xlu1 %5891 }
 0x7d7   : > { %v10471_v27 = vpop.eup %8357  ;;  %v5920_v43 = vsub.f32 %v10387_v36, %v5892_v9 }
 0x7d8   : > { %v5965_v17 = vsel %vm2746_vm6, %v10471_v27, 0.0 }
 0x7d9   : > { %v5945_v8 = vmul.f32 1.442695, %v5920_v43  ;;  %5966 = vadd.xlane.f32.xlu0 %v5965_v17 }
 0x7da   : > { %v5898_v14 = vpop.xlane.xlu1 %5897 }
 0x7db   : > { %8363 = vpow2.f32 %v5945_v8  ;;  %v5922_v40 = vsub.f32 %v10394_v41, %v5898_v14  ;;  %v10477_v13 = vpop.eup %8359 }
 0x7dc   : > { %v5968_v24 = vsel %vm2746_vm6, %v10477_v13, 0.0  ;;  %v10481_v44 = vpop.eup %8361 }
 0x7dd   : > { %v5949_v5 = vmul.f32 1.442695, %v5922_v40  ;;  %5969 = vadd.xlane.f32.xlu1 %v5968_v24  ;;  %v5974_v36 = vsel %vm2746_vm6, %v10481_v44, 0.0 }
 0x7de   : > { %v5904_v57 = vpop.xlane.xlu1 %5903 }
 0x7df   : > { %8365 = vpow2.f32 %v5949_v5  ;;  %v5924_v10 = vsub.f32 %v10397_v33, %v5904_v57 }
 0x7e1   : > { %5975 = vadd.xlane.f32.xlu1 %v5974_v36  ;;  %v4150_v36 = vrot.slane %v4136_v46, %v8842_v38 }
 0x7e5   : > { %v10485_v11 = vpop.eup %8363 }
 0x7e6   : > { %v5986_v60 = vsel %vm2746_vm6, %v10485_v11, 0.0 }
 0x7e7   : > { %5987 = vadd.xlane.f32.xlu1 %v5986_v60 }
 0x7e9   : > { %v10489_v41 = vpop.eup %8365 }
 0x7ea   : > { %v5992_v21 = vsel %vm2746_vm6, %v10489_v41, 0.0 }
 0x7eb   : > { %5993 = vadd.xlane.f32.xlu1 %v5992_v21  ;;  %v10535_v21 = vld [vmem:[%s8678_s8] sm:$0xff] }
 0x7fc   : > { %3827 = vrot.lane.b32.xlu1 %v10948_v29, %s8570_s17 }
 0x801   : > { %v5877_v61 = vpop.xlane.xlu0 %5876 }
 0x802   : > { %v5915_v23 = vsub.f32 %v10413_v34, %v5877_v61  ;;  %v5953_v34 = vmul.f32 1.442695, %v5924_v10 }
 0x804   : > { %v5935_v56 = vmul.f32 1.442695, %v5915_v23 }
 0x805   : > { %v5883_v6 = vpop.xlane.xlu0 %5882 }
 0x806   : > { %8367 = vpow2.f32 %v5935_v56  ;;  %v5917_v63 = vsub.f32 %v10416_v51, %v5883_v6 }
 0x808   : > { %v5939_v48 = vmul.f32 1.442695, %v5917_v63 }
 0x809   : > { %v5889_v59 = vpop.xlane.xlu0 %5888 }
 0x80a   : > { %8369 = vpow2.f32 %v5939_v48  ;;  %v5919_v18 = vsub.f32 %v10421_v42, %v5889_v59  ;;  %v5910_v42 = vpop.xlane.xlu1 %5909 }
 0x80b   : > { %8371 = vpow2.f32 %v5941_v31  ;;  %v5926_v16 = vsub.f32 %v10404_v37, %v5910_v42  ;;  %v4143_v37 = vrot.slane %v4135_v53, %v8842_v38 }
 0x80c   : > { %v5943_v29 = vmul.f32 1.442695, %v5919_v18 }
 0x80d   : > { %v5895_v54 = vpop.xlane.xlu0 %5894  ;;  %v5957_v5 = vmul.f32 1.442695, %v5926_v16 }
 0x80e   : > { %v5921_v32 = vsub.f32 %v10426_v30, %v5895_v54  ;;  %8373 = vpow2.f32 %v5943_v29 }
 0x80f   : > { %8375 = vpow2.f32 %v5953_v34 }
 0x810   : > { %v10501_v39 = vpop.eup %8367  ;;  %v5947_v22 = vmul.f32 1.442695, %v5921_v32 }
 0x811   : > { %v5901_v51 = vpop.xlane.xlu0 %5900  ;;  %v5971_v2 = vsel %vm2746_vm6, %v10501_v39, 0.0 }
 0x812   : > { %v5923_v33 = vsub.f32 %v10431_v3, %v5901_v51  ;;  %5972 = vadd.xlane.f32.xlu0 %v5971_v2  ;;  %8377 = vpow2.f32 %v5947_v22  ;;  %v10949_v3 = vld [vmem:[#allocation8_spill] sm:$0xff] }
 0x813   : > { %v6809_v50 = vsub.s32 3, %v10949_v3 }
 0x814   : > { %v10506_v19 = vpop.eup %8369  ;;  %v5951_v20 = vmul.f32 1.442695, %v5923_v33 }
 0x815   : > { %v5907_v58 = vpop.xlane.xlu0 %5906  ;;  %v5977_v30 = vsel %vm2746_vm6, %v10506_v19, 0.0  ;;  %v10510_v62 = vpop.eup %8371 }
 0x816   : > { %v5925_v7 = vsub.f32 %v10436_v1, %v5907_v58  ;;  %5978 = vadd.xlane.f32.xlu0 %v5977_v30  ;;  %8379 = vpow2.f32 %v5951_v20  ;;  %v5980_v43 = vsel %vm2746_vm6, %v10510_v62, 0.0  ;;  %v8457_v1 = vld [vmem:[#allocation5 + $0x8] sm:$0xff] }
 0x817   : > { %v6804_v40 = vadd.f32 %v8457_v1, %v10359_v12  ;;  %v10538_v12 = vrot.slane %v10535_v21, %v6809_v50 }
 0x818   : > { %v5955_v52 = vmul.f32 1.442695, %v5925_v7  ;;  %v10517_v17 = vpop.eup %8373 }
 0x819   : > { %v3826_v9 = vpop.permute.xlu0 %3825  ;;  %v10526_v24 = vpop.eup %8375  ;;  %v5983_v53 = vsel %vm2746_vm6, %v10517_v17, 0.0  ;;  %v10545_v25 = vadd.f32 %v10538_v12, %v6804_v40 }
 0x81a   : > { %v4151_v8 = vcombine.low %v10446_v4, %v3826_v9  ;;  %v4152_v14 = vcombine.high %v10446_v4, %v3826_v9  ;;  %5981 = vadd.xlane.f32.xlu0 %v5980_v43  ;;  %8381 = vpow2.f32 %v5955_v52  ;;  %v5998_v46 = vsel %vm2746_vm6, %v10526_v24, 0.0 }
 0x81b   : > { %8383 = vpow2.f32 %v5957_v5  ;;  %v6818_v34 = vsel %vm390_vm1, %v10545_v25, 0.0 }
 0x81c   : > { %v4159_v4 = vrot.slane %v4151_v8, %v8842_v38  ;;  %v4166_v60 = vrot.slane %v4152_v14, %v8842_v38  ;;  %v10542_v61 = vpop.eup %8377  ;;  %v8459_v8 = vld [vmem:[#allocation5] sm:$0xff] }
 0x81d   : > { %v5989_v48 = vsel %vm2746_vm6, %v10542_v61, 0.0  ;;  %v6803_v14 = vadd.f32 %v8459_v8, %v10354_v45 }
 0x81e   : > { %v4199_v23 = vcombine.low %v4143_v37, %v4159_v4  ;;  %v4200_v35 = vcombine.high %v4143_v37, %v4159_v4  ;;  %v4215_v56 = vcombine.low %v4150_v36, %v4166_v60  ;;  %v4216_v0 = vcombine.high %v4150_v36, %v4166_v60  ;;  %5984 = vadd.xlane.f32.xlu0 %v5983_v53  ;;  %v3822_v53 = vpop.permute.xlu1 %3821 }
 0x81f   : > { %v10593_v4 = vadd.f32 %v10538_v12, %v6803_v14 }
 0x820   : > { %v4207_v6 = vrot.slane %v4199_v23, %v8845_v47  ;;  %v4214_v63 = vrot.slane %v4200_v35, %v8845_v47  ;;  %v4223_v57 = vrot.slane %v4215_v56, %v8845_v47  ;;  %v4230_v31 = vrot.slane %v4216_v0, %v8845_v47  ;;  %5999 = vadd.xlane.f32.xlu1 %v5998_v46  ;;  %v10555_v59 = vpop.eup %8379 }
 0x821   : > { %v5995_v33 = vsel %vm2746_vm6, %v10555_v59, 0.0  ;;  %v6815_v60 = vsel %vm390_vm1, %v10593_v4, 0.0 }
 0x822   : > { %v7673_v10 = vcombine.low %v4207_v6, %v4214_v63  ;;  %v7675_v18 = vcombine.high %v4207_v6, %v4214_v63  ;;  %v7677_v29 = vcombine.low %v4223_v57, %v4230_v31  ;;  %v7679_v54 = vcombine.high %v4223_v57, %v4230_v31  ;;  %5990 = vadd.xlane.f32.xlu0 %v5989_v48  ;;  %v10950_v48 = vld [vmem:[#allocation13_spill] sm:$0xff] }
 0x824   : > { %v5206_v32 = vrot.slane %v7673_v10, %v8842_v38  ;;  %v5222_v22 = vrot.slane %v7675_v18, %v8842_v38  ;;  %v5238_v51 = vrot.slane %v7677_v29, %v8842_v38  ;;  %v5254_v2 = vrot.slane %v7679_v54, %v8842_v38  ;;  %6819 = vadd.xlane.f32.xlu1 %v6818_v34  ;;  %v10565_v42 = vpop.eup %8381 }
 0x825   : > { %v10579_v43 = vpop.eup %8383  ;;  %v6001_v1 = vsel %vm2746_vm6, %v10565_v42, 0.0 }
 0x826   : > { %5996 = vadd.xlane.f32.xlu0 %v5995_v33  ;;  %v5271_v20 = vcombine.low %v5206_v32, %v5222_v22  ;;  %v5303_v58 = vcombine.low %v5238_v51, %v5254_v2  ;;  %v5272_v30 = vcombine.high %v5206_v32, %v5222_v22  ;;  %v5304_v7 = vcombine.high %v5238_v51, %v5254_v2 }
 0x827   : > { %v6004_v45 = vsel %vm2746_vm6, %v10579_v43, 0.0  ;;  %v4544_v33 = vcombine.high %v10444_v15, %v3822_v53 }
 0x828   : > { %v10568_v16 = vrot.slane %v5271_v20, %v8845_v47  ;;  %v10571_v52 = vrot.slane %v5303_v58, %v8845_v47  ;;  %v10574_v50 = vrot.slane %v5272_v30, %v8845_v47  ;;  %v10577_v9 = vrot.slane %v5304_v7, %v8845_v47 }
 0x829   : > { %v4558_v7 = vrot.slane %v4544_v33, %v8842_v38 }
 0x82a   : > { %6002 = vadd.xlane.f32.xlu0 %v6001_v1  ;;  %v5323_v40 = vcombine.low %v10568_v16, %v10571_v52  ;;  %v5324_v37 = vcombine.high %v10568_v16, %v10571_v52  ;;  %v5325_v5 = vcombine.low %v10574_v50, %v10577_v9  ;;  %v5326_v36 = vcombine.high %v10574_v50, %v10577_v9  ;;  %v6407_v9 = vld [vmem:[%s8693_s15] sm:$0xf] }
 0x82e   : > { %6005 = vadd.xlane.f32.xlu0 %v6004_v45 }
 0x832   : > { %6816 = vadd.xlane.f32.xlu0 %v6815_v60 }
 0x860   : > { %v5961_v23 = vpop.xlane.xlu0 %5960 }
 0x861   : > { %8385 = vrcp.f32 %v5961_v23 }
 0x862   : > { %v5964_v35 = vpop.xlane.xlu1 %5963 }
 0x863   : > { %8387 = vrcp.f32 %v5964_v35 }
 0x866   : > { %v5967_v56 = vpop.xlane.xlu0 %5966 }
 0x867   : > { %8389 = vrcp.f32 %v5967_v56 }
 0x86a   : > { %v5970_v46 = vpop.xlane.xlu1 %5969 }
 0x86b   : > { %v8386_v0 = vpop.eup %8385  ;;  %8391 = vrcp.f32 %v5970_v46 }
 0x86c   : > { %v6023_v63 = vmul.f32 %v8386_v0, %v10459_v26 }
 0x86d   : > { %v8388_v6 = vpop.eup %8387 }
 0x86e   : > { %v6024_v57 = vmul.f32 %v8388_v6, %v10467_v49  ;;  %v5976_v34 = vpop.xlane.xlu1 %5975  ;;  %v10951_v49 = vld [vmem:[#allocation14_spill] sm:$0xff] }
 0x86f   : > { %8393 = vrcp.f32 %v5976_v34 }
 0x870   : > { %v6039_v31 = vpack.c.bf16 %v6024_v57, %v6023_v63 }
 0x871   : > { %v8390_v10 = vpop.eup %8389 }
 0x872   : > { %8073 = vmatmul.mubr.msk.bf16.vlgmr.msra.gmra.mrb[72].mxu1 %vm2746_vm6, %v6039_v31  ;;  %v6025_v29 = vmul.f32 %v8390_v10, %v10471_v27 }
 0x873   : > { %8083 = vmatpush3.bf16.msra.mxu1 %v10950_v48  ;;  %8084 = vmatprep.mubr.msk.bf16.mxu1 %vm8567_vm2, %v10944_v55 }
 0x874   : > { %8094 = vmatprep.subr.bf16.mxu1 %v10944_v55  ;;  %v5988_v32 = vpop.xlane.xlu1 %5987 }
 0x875   : > { %v8392_v18 = vpop.eup %8391 }
 0x876   : > { %v6026_v54 = vmul.f32 %v8392_v18, %v10477_v13  ;;  %v4543_v13 = vcombine.low %v10444_v15, %v3822_v53 }
 0x878   : > { %v6040_v26 = vpack.c.bf16 %v6026_v54, %v6025_v29  ;;  %v5994_v22 = vpop.xlane.xlu1 %5993  ;;  %v4551_v30 = vrot.slane %v4543_v13, %v8842_v38 }
 0x87a   : > { %8079 = vmatmul.mubr.msk.bf16.vlgmr.msra.gmra.mrb[64].mxu0 %vm2746_vm6, %v6040_v26  ;;  %v8394_v26 = vpop.eup %8393 }
 0x87b   : > { %8089 = vmatpush3.bf16.msra.mxu0 %v10951_v49  ;;  %8090 = vmatprep.mubr.msk.bf16.mxu0 %vm8567_vm2, %v10944_v55 }
 0x87c   : > { %8100 = vmatprep.subr.bf16.mxu0 %v10944_v55  ;;  %v3828_v51 = vpop.permute.xlu1 %3827 }
 0x87d   : > { %v4559_v2 = vcombine.low %v10450_v28, %v3828_v51  ;;  %v4560_v27 = vcombine.high %v10450_v28, %v3828_v51 }
 0x87f   : > { %v4567_v20 = vrot.slane %v4559_v2, %v8842_v38  ;;  %v4574_v58 = vrot.slane %v4560_v27, %v8842_v38  ;;  %v6028_v2 = vmul.f32 %v8394_v26, %v10481_v44 }
 0x881   : > { %v4607_v8 = vcombine.low %v4551_v30, %v4567_v20  ;;  %v4608_v14 = vcombine.high %v4551_v30, %v4567_v20  ;;  %v4623_v1 = vcombine.low %v4558_v7, %v4574_v58  ;;  %v4624_v45 = vcombine.high %v4558_v7, %v4574_v58 }
 0x883   : > { %v4615_v60 = vrot.slane %v4607_v8, %v8845_v47  ;;  %v4622_v28 = vrot.slane %v4608_v14, %v8845_v47  ;;  %v4631_v23 = vrot.slane %v4623_v1, %v8845_v47  ;;  %v4638_v15 = vrot.slane %v4624_v45, %v8845_v47 }
 0x885   : > { %v7681_v53 = vcombine.low %v4615_v60, %v4622_v28  ;;  %v7683_v35 = vcombine.high %v4615_v60, %v4622_v28  ;;  %v7685_v56 = vcombine.low %v4631_v23, %v4638_v15  ;;  %v7687_v0 = vcombine.high %v4631_v23, %v4638_v15 }
 0x887   : > { %v5342_v46 = vrot.slane %v7681_v53, %v8842_v38  ;;  %v5358_v6 = vrot.slane %v7683_v35, %v8842_v38  ;;  %v5374_v63 = vrot.slane %v7685_v56, %v8842_v38  ;;  %v5390_v57 = vrot.slane %v7687_v0, %v8842_v38 }
 0x889   : > { %v5407_v48 = vcombine.low %v5342_v46, %v5358_v6  ;;  %v5439_v10 = vcombine.low %v5374_v63, %v5390_v57  ;;  %v5408_v20 = vcombine.high %v5342_v46, %v5358_v6  ;;  %v5440_v58 = vcombine.high %v5374_v63, %v5390_v57 }
 0x88b   : > { %v5415_v29 = vrot.slane %v5407_v48, %v8845_v47  ;;  %v5447_v54 = vrot.slane %v5439_v10, %v8845_v47  ;;  %v7704_v48 = vld [vmem:[%s8693_s15 + $0x4] sm:$0xf] }
 0x88c   : > { %v6413_v10 = vsel %vm3297_vm7, %v7704_v48, 0 }
 0x88d   : > { %v5459_v51 = vcombine.low %v5415_v29, %v5447_v54 }
 0x88f   : > { %v5483_v33 = vpack.c.bf16 %v5459_v51, %v5323_v40  ;;  %v5454_v40 = vrot.slane %v5440_v58, %v8845_v47  ;;  %v7707_v51 = vld [vmem:[%s8693_s15 + $0x8] sm:$0xf]  ;;  %v7711_v58 = vld [vmem:[%s8693_s15 + $0x10] sm:$0xf] }
 0x89f   : > { %v5973_v31 = vpop.xlane.xlu0 %5972 }
 0x8a0   : > { %8395 = vrcp.f32 %v5973_v31  ;;  %v6460_v31 = vsel %vm3297_vm7, %v6407_v9, 0 }
 0x8a3   : > { %v5979_v18 = vpop.xlane.xlu0 %5978 }
 0x8a4   : > { %8397 = vrcp.f32 %v5979_v18 }
 0x8a7   : > { %v5982_v34 = vpop.xlane.xlu0 %5981 }
 0x8a8   : > { %8399 = vrcp.f32 %v5982_v34 }
 0x8a9   : > { %8401 = vrcp.f32 %v5988_v32 }
 0x8aa   : > { %v8396_v49 = vpop.eup %8395 }
 0x8ab   : > { %v6027_v38 = vmul.f32 %v8396_v49, %v10501_v39  ;;  %v5985_v27 = vpop.xlane.xlu0 %5984  ;;  %v5460_v39 = vcombine.high %v5415_v29, %v5447_v54 }
 0x8ac   : > { %8403 = vrcp.f32 %v5985_v27 }
 0x8ad   : > { %v6041_v13 = vpack.c.bf16 %v6028_v2, %v6027_v38  ;;  %8405 = vrcp.f32 %v5994_v22  ;;  %v6000_v30 = vpop.xlane.xlu1 %5999  ;;  %v5422_v22 = vrot.slane %v5408_v20, %v8845_v47  ;;  %v5484_v23 = vpack.c.bf16 %v5460_v39, %v5324_v37 }
 0x8ae   : > { %v8398_v32 = vpop.eup %8397  ;;  %v6608_v39 = vsel %vm3297_vm7, %v7711_v58, 0 }
 0x8af   : > { %8085 = vmatmul.mubr.msk.bf16.vlgmr.msra.gmra.mrb[76].mxu1 %vm2746_vm6, %v6041_v13  ;;  %v5991_v7 = vpop.xlane.xlu0 %5990  ;;  %v6029_v8 = vmul.f32 %v8398_v32, %v10506_v19  ;;  %v5461_v15 = vcombine.low %v5422_v22, %v5454_v40 }
 0x8b0   : > { %8095 = vmatpush3.bf16.msra.mxu1 %v5483_v33  ;;  %8407 = vrcp.f32 %v5991_v7  ;;  %8096 = vmatprep.mubr.msk.bf16.mxu1 %vm8567_vm2, %v10944_v55  ;;  %v6508_v33 = vsel %vm3297_vm7, %v7707_v51, 0 }
 0x8b1   : > { %8106 = vmatprep.subr.bf16.mxu1 %v10944_v55  ;;  %8409 = vrcp.f32 %v6000_v30  ;;  %v5485_v16 = vpack.c.bf16 %v5461_v15, %v5325_v5 }
 0x8b2   : > { %v8400_v44 = vpop.eup %8399 }
 0x8b3   : > { %v6030_v14 = vmul.f32 %v8400_v44, %v10510_v62  ;;  %v5997_v1 = vpop.xlane.xlu0 %5996  ;;  %v8402_v45 = vpop.eup %8401 }
 0x8b4   : > { %8411 = vrcp.f32 %v5997_v1  ;;  %v6032_v53 = vmul.f32 %v8402_v45, %v10485_v11  ;;  %v5462_v11 = vcombine.high %v5422_v22, %v5454_v40  ;;  %v7713_v40 = vld [vmem:[%s8693_s15 + $0x14] sm:$0xf] }
 0x8b5   : > { %v6042_v60 = vpack.c.bf16 %v6030_v14, %v6029_v8 }
 0x8b6   : > { %v8404_v28 = vpop.eup %8403 }
 0x8b7   : > { %v6031_v35 = vmul.f32 %v8404_v28, %v10517_v17  ;;  %8091 = vmatmul.mubr.msk.bf16.vlgmr.msra.gmra.mrb[68].mxu0 %vm2746_vm6, %v6042_v60  ;;  %v6003_v47 = vpop.xlane.xlu0 %6002  ;;  %v8406_v19 = vpop.eup %8405  ;;  %v6658_v60 = vsel %vm3297_vm7, %v7713_v40, 0 }
 0x8b8   : > { %8101 = vmatpush3.bf16.msra.mxu0 %v5484_v23  ;;  %8102 = vmatprep.mubr.msk.bf16.mxu0 %vm8567_vm2, %v10944_v55  ;;  %8413 = vrcp.f32 %v6003_v47  ;;  %v6034_v17 = vmul.f32 %v8406_v19, %v10489_v41  ;;  %v5486_v41 = vpack.c.bf16 %v5462_v11, %v5326_v36  ;;  %v7715_v23 = vld [vmem:[%s8693_s15 + $0x18] sm:$0xf] }
 0x8b9   : > { %v6043_v62 = vpack.c.bf16 %v6032_v53, %v6031_v35  ;;  %8112 = vmatprep.subr.bf16.mxu0 %v10944_v55  ;;  %v6708_v19 = vsel %vm3297_vm7, %v7715_v23, 0 }
 0x8ba   : > { %v8408_v56 = vpop.eup %8407 }
 0x8bb   : > { %v6033_v52 = vmul.f32 %v8408_v56, %v10542_v61  ;;  %8097 = vmatmul.mubr.msk.bf16.vlgmr.msra.gmra.mrb[80].mxu1 %vm2746_vm6, %v6043_v62  ;;  %v6006_v37 = vpop.xlane.xlu0 %6005  ;;  %v8410_v0 = vpop.eup %8409  ;;  %v7717_v56 = vld [vmem:[%s8693_s15 + $0x1c] sm:$0xf] }
 0x8bc   : > { %8107 = vmatpush3.bf16.msra.mxu1 %v5485_v16  ;;  %8415 = vrcp.f32 %v6006_v37  ;;  %8108 = vmatprep.mubr.msk.bf16.mxu1 %vm8567_vm2, %v10944_v55  ;;  %v6036_v61 = vmul.f32 %v8410_v0, %v10526_v24  ;;  %v6758_v37 = vsel %vm3297_vm7, %v7717_v56, 0 }
 0x8bd   : > { %v6044_v46 = vpack.c.bf16 %v6034_v17, %v6033_v52  ;;  %8118 = vmatprep.subr.bf16.mxu1 %v10944_v55 }
 0x8be   : > { %v8412_v6 = vpop.eup %8411 }
 0x8bf   : > { %v6035_v5 = vmul.f32 %v8412_v6, %v10555_v59  ;;  %8103 = vmatmul.mubr.msk.bf16.vlgmr.msra.gmra.mrb[72].mxu0 %vm2746_vm6, %v6044_v46 }
 0x8c0   : > { %8113 = vmatpush3.bf16.msra.mxu0 %v5486_v41  ;;  %8114 = vmatprep.mubr.msk.bf16.mxu0 %vm8567_vm2, %v10944_v55 }
 0x8c1   : > { %v6045_v63 = vpack.c.bf16 %v6036_v61, %v6035_v5  ;;  %8124 = vmatprep.subr.bf16.mxu0 %v10944_v55  ;;  %v10952_v5 = vmov 0  }
 0x8c2   : > { %v8414_v57 = vpop.eup %8413 }
 0x8c3   : > { %8109 = vmatmul.mubr.msk.bf16.vlgmr.msra.gmra.mrb[84].mxu1 %vm2746_vm6, %v6045_v63  ;;  %v6037_v59 = vmul.f32 %v8414_v57, %v10565_v42 }
 0x8c4   : > { %8120 = vmatprep.mubr.msk.bf16.mxu1 %vm8567_vm2, %v10944_v55  ;;  %8119 = vmatpush3.bf16.msra.mxu1 %v6413_v10 }
 0x8c5   : > { %8130 = vmatprep.subr.bf16.mxu1 %v10944_v55 }
 0x8c6   : > { %v8416_v24 = vpop.eup %8415 }
 0x8c7   : > { %v6038_v50 = vmul.f32 %v8416_v24, %v10579_v43  ;;  %v7709_v43 = vld [vmem:[%s8693_s15 + $0xc] sm:$0xf] }
 0x8c8   : > { %v6558_v34 = vsel %vm3297_vm7, %v7709_v43, 0 }
 0x8c9   : > { %v6046_v36 = vpack.c.bf16 %v6038_v50, %v6037_v59 }
 0x8cb   : > { %8115 = vmatmul.mubr.msk.bf16.vlgmr.msra.gmra.mrb[76].mxu0 %vm2746_vm6, %v6046_v36 }
 0x8cc   : > { %8125 = vmatpush3.bf16.msra.mxu0 %v6460_v31  ;;  %8126 = vmatprep.mubr.msk.bf16.mxu0 %vm8567_vm2, %v10944_v55 }
 0x8cd   : > { %8136 = vmatprep.subr.bf16.mxu0 %v10944_v55 }
 0x945   : > { %v6084_v42 = vpop.f32.mrb[72].mxu1 }
 0x946   : > { %v8074_v18 = vpop.f32.mrb[73].mxu1 }
 0x947   : > { %v6087_v29 = vpop.f32.mrb[74].mxu1 }
 0x948   : > { %v6399_v54 = vpack.c.bf16 %v6087_v29, %v6084_v42  ;;  %v8075_v26 = vpop.f32.mrb[75].mxu1 }
 0x94a   : > { %8127 = vmatmul.mubr.msk.bf16.vlgmr.msra.gmra.mrb[80].mxu0 %vm2369_vm3, %v6399_v54 }
 0x94b   : > { %8137 = vmatpush3.bf16.msra.mxu0 %v6558_v34  ;;  %8138 = vmatprep.mubr.msk.bf16.mxu0 %vm8567_vm2, %v10944_v55 }
 0x94c   : > { %8148 = vmatprep.subr.bf16.mxu0 %v10944_v55 }
 0x94d   : > { %v6128_v49 = vpop.f32.mrb[64].mxu0 }
 0x94e   : > { %v8080_v2 = vpop.f32.mrb[65].mxu0 }
 0x94f   : > { %v6131_v38 = vpop.f32.mrb[66].mxu0 }
 0x950   : > { %v6400_v27 = vpack.c.bf16 %v6131_v38, %v6128_v49  ;;  %v8081_v13 = vpop.f32.mrb[67].mxu0 }
 0x952   : > { %8121 = vmatmul.mubr.msk.bf16.vlgmr.msra.gmra.mrb[88].mxu1 %vm2369_vm3, %v6400_v27 }
 0x953   : > { %8131 = vmatpush3.bf16.msra.mxu1 %v6508_v33  ;;  %8132 = vmatprep.mubr.msk.bf16.mxu1 %vm8567_vm2, %v10944_v55 }
 0x954   : > { %8142 = vmatprep.subr.bf16.mxu1 %v10944_v55 }
 0x982   : > { %v6172_v20 = vpop.f32.mrb[76].mxu1 }
 0x983   : > { %v8086_v30 = vpop.f32.mrb[77].mxu1 }
 0x984   : > { %v6175_v7 = vpop.f32.mrb[78].mxu1 }
 0x985   : > { %v6401_v32 = vpack.c.bf16 %v6175_v7, %v6172_v20  ;;  %v8087_v44 = vpop.f32.mrb[79].mxu1 }
 0x987   : > { %8133 = vmatmul.mubr.msk.bf16.vlgmr.msra.gmra.mrb[92].mxu1 %vm2369_vm3, %v6401_v32 }
 0x988   : > { %8143 = vmatpush3.bf16.msra.mxu1 %v6608_v39  ;;  %8144 = vmatprep.mubr.msk.bf16.mxu1 %vm8567_vm2, %v10944_v55 }
 0x989   : > { %8154 = vmatprep.subr.bf16.mxu1 %v10944_v55 }
 0x98a   : > { %v6216_v22 = vpop.f32.mrb[68].mxu0 }
 0x98b   : > { %v8092_v8 = vpop.f32.mrb[69].mxu0 }
 0x98c   : > { %v6219_v14 = vpop.f32.mrb[70].mxu0 }
 0x98d   : > { %v6402_v1 = vpack.c.bf16 %v6219_v14, %v6216_v22  ;;  %v8093_v45 = vpop.f32.mrb[71].mxu0 }
 0x98e   : > { %v6260_v28 = vpop.f32.mrb[80].mxu1 }
 0x98f   : > { %v8098_v15 = vpop.f32.mrb[81].mxu1  ;;  %8139 = vmatmul.mubr.msk.bf16.vlgmr.msra.gmra.mrb[84].mxu0 %vm2369_vm3, %v6402_v1 }
 0x990   : > { %v6263_v53 = vpop.f32.mrb[82].mxu1  ;;  %8149 = vmatpush3.bf16.msra.mxu0 %v6658_v60  ;;  %8150 = vmatprep.mubr.msk.bf16.mxu0 %vm8567_vm2, %v10944_v55 }
 0x991   : > { %v6403_v35 = vpack.c.bf16 %v6263_v53, %v6260_v28  ;;  %v8099_v47 = vpop.f32.mrb[83].mxu1  ;;  %8160 = vmatprep.subr.bf16.mxu0 %v10944_v55 }
 0x992   : > { %v6304_v62 = vpop.f32.mrb[72].mxu0 }
 0x993   : > { %v8104_v16 = vpop.f32.mrb[73].mxu0  ;;  %8145 = vmatmul.mubr.msk.bf16.vlgmr.msra.gmra.mrb[96].mxu1 %vm2369_vm3, %v6403_v35 }
 0x994   : > { %v6307_v11 = vpop.f32.mrb[74].mxu0  ;;  %8155 = vmatpush3.bf16.msra.mxu1 %v6708_v19  ;;  %8156 = vmatprep.mubr.msk.bf16.mxu1 %vm8567_vm2, %v10944_v55  ;;  %v6817_v19 = vpop.xlane.xlu0 %6816 }
 0x995   : > { %v6404_v17 = vpack.c.bf16 %v6307_v11, %v6304_v62  ;;  %v8105_v52 = vpop.f32.mrb[75].mxu0  ;;  %v6820_v62 = vpop.xlane.xlu1 %6819  ;;  %v6827_v56 = vmul.f32 0.015625, %v6817_v19 }
 0x996   : > { %v6348_v0 = vpop.f32.mrb[84].mxu1  ;;  %v6828_v11 = vmul.f32 0.015625, %v6820_v62 }
 0x997   : > { %v8110_v46 = vpop.f32.mrb[85].mxu1  ;;  %8151 = vmatmul.mubr.msk.bf16.vlgmr.msra.gmra.mrb[88].mxu0 %vm2369_vm3, %v6404_v17 }
 0x998   : > { %v6351_v6 = vpop.f32.mrb[86].mxu1  ;;  %8161 = vmatpush3.bf16.msra.mxu0 %v6758_v37  ;;  %8162 = vmatprep.mubr.msk.bf16.mxu0 %vm8567_vm2, %v10944_v55  ;;  %v8460_v46 = vld [vmem:[#allocation5 + $0x10] sm:$0xff] }
 0x999   : > { %v6405_v41 = vpack.c.bf16 %v6351_v6, %v6348_v0  ;;  %v8111_v61 = vpop.f32.mrb[87].mxu1  ;;  %v6831_v0 = vsub.f32 %v10593_v4, %v6827_v56 }
 0x99b   : > { %8157 = vmatmul.mubr.msk.bf16.vlgmr.msra.gmra.mrb[100].mxu1 %vm2369_vm3, %v6405_v41 }
 0x99c   : > { %6979 = vmatprep.mubr.bf16.mxu1 %v10952_v5 }
 0x99e   : > { %v6392_v63 = vpop.f32.mrb[76].mxu0 }
 0x99f   : > { %v8116_v57 = vpop.f32.mrb[77].mxu0 }
 0x9a0   : > { %v6395_v24 = vpop.f32.mrb[78].mxu0 }
 0x9a1   : > { %v6406_v59 = vpack.c.bf16 %v6395_v24, %v6392_v63  ;;  %v8117_v50 = vpop.f32.mrb[79].mxu0  ;;  %v6832_v63 = vsub.f32 %v10545_v25, %v6828_v11  ;;  %v8461_v24 = vld [vmem:[#allocation5 + $0x18] sm:$0xff] }
 0x9a3   : > { %8163 = vmatmul.mubr.msk.bf16.vlgmr.msra.gmra.mrb[92].mxu0 %vm2369_vm3, %v6406_v59 }
 0xa1d   : > { %v6496_v9 = vpop.f32.mrb[80].mxu0 }
 0xa1e   : > { %v8128_v36 = vpop.f32.mrb[81].mxu0 }
 0xa1f   : > { %v6499_v31 = vpop.f32.mrb[82].mxu0  ;;  %v6835_v36 = vmul.f32 %v6831_v0, %v6831_v0 }
 0xa20   : > { %v8129_v48 = vpop.f32.mrb[83].mxu0 }
 0xa21   : > { %v6836_v48 = vmul.f32 %v6832_v63, %v6832_v63 }
 0xa25   : > { %v6449_v10 = vpop.f32.mrb[88].mxu1 }
 0xa26   : > { %v6497_v42 = vadd.f32 %v6496_v9, %v6449_v10  ;;  %v8122_v55 = vpop.f32.mrb[89].mxu1  ;;  %v6839_v10 = vsel %vm390_vm1, %v6835_v36, 0.0 }
 0xa27   : > { %v6452_v43 = vpop.f32.mrb[90].mxu1  ;;  %v8255_v55 = vld [vmem:[%s8688_s12 + $0x4] ss:$8 sps:$4 sm:$0xff]  }
 0xa28   : > { %v6500_v18 = vadd.f32 %v6499_v31, %v6452_v43  ;;  %v8123_v29 = vpop.f32.mrb[91].mxu1  ;;  %v8258_v43 = vld [vmem:[%s8688_s12 + $0x14] ss:$8 sps:$4 sm:$0xff]   ;;  %6947 = vmatprep.subr.bf16.mxu1 %v8255_v55 }
 0xa29   : > { %v8261_v29 = vld [vmem:[%s8688_s12 + $0x24] ss:$8 sps:$4 sm:$0xff]   ;;  %v8272_v55 = vld [vmem:[%s8698_s20 + $0x18] sm:$0xff]  }
 0xa5a   : > { %v6544_v54 = vpop.f32.mrb[92].mxu1 }
 0xa5b   : > { %v6551_v26 = vadd.f32 %v6544_v54, %v6497_v42  ;;  %v8134_v34 = vpop.f32.mrb[93].mxu1  ;;  %v8253_v42 = vld [vmem:[%s8688_s12] ss:$8 sps:$4 sm:$0xff]  }
 0xa5c   : > { %v6547_v49 = vpop.f32.mrb[94].mxu1  ;;  %6948 = vmatpush1.bf16.msra.mxu1 %v8253_v42  ;;  %v8259_v54 = vld [vmem:[%s8688_s12 + $0x20] ss:$8 sps:$4 sm:$0xff]   ;;  %v8262_v34 = vld [vmem:[%s8688_s12 + $0x30] ss:$8 sps:$4 sm:$0xff]  }
 0xa5d   : > { %v6552_v51 = vadd.f32 %v6547_v49, %v6500_v18  ;;  %v8135_v2 = vpop.f32.mrb[95].mxu1  ;;  %v8256_v18 = vld [vmem:[%s8688_s12 + $0x10] ss:$8 sps:$4 sm:$0xff]   ;;  %6949 = vmatprep.subr.bf16.mxu1 %v8258_v43  ;;  %v8273_v43 = vld [vmem:[%s8698_s20 + $0x60] sm:$0xff]  }
 0xa5e   : > { %v8271_v42 = vld [vmem:[%s8698_s20 + $0x58] sm:$0xff]  }
 0xa60   : > { %6950 = vmatpush1.bf16.msra.mxu1 %v8256_v18  ;;  %v8274_v18 = vld [vmem:[%s8698_s20 + $0x20] sm:$0xff]  }
 0xa61   : > { %6951 = vmatprep.subr.bf16.mxu1 %v8261_v29  ;;  %v8275_v29 = vld [vmem:[%s8698_s20 + $0x68] sm:$0xff]  }
 0xa62   : > { %v6594_v38 = vpop.f32.mrb[84].mxu0 }
 0xa63   : > { %v6601_v27 = vadd.f32 %v6594_v38, %v6551_v26  ;;  %v8140_v13 = vpop.f32.mrb[85].mxu0  ;;  %v8264_v26 = vld [vmem:[%s8688_s12 + $0x34] ss:$8 sps:$4 sm:$0xff]  }
 0xa64   : > { %v6597_v33 = vpop.f32.mrb[86].mxu0  ;;  %6952 = vmatpush1.bf16.msra.mxu1 %v8259_v54  ;;  %v8276_v54 = vld [vmem:[%s8698_s20 + $0x28] sm:$0xff]  }
 0xa65   : > { %v6602_v20 = vadd.f32 %v6597_v33, %v6552_v51  ;;  %v8141_v58 = vpop.f32.mrb[87].mxu0  ;;  %6953 = vmatprep.subr.bf16.mxu1 %v8264_v26  ;;  %v8277_v26 = vld [vmem:[%s8698_s20 + $0x70] sm:$0xff]  }
 0xa66   : > { %v6644_v30 = vpop.f32.mrb[96].mxu1 }
 0xa67   : > { %v6651_v7 = vadd.f32 %v6644_v30, %v6601_v27  ;;  %v8146_v32 = vpop.f32.mrb[97].mxu1 }
 0xa68   : > { %v6647_v44 = vpop.f32.mrb[98].mxu1  ;;  %6954 = vmatpush1.bf16.msra.mxu1 %v8262_v34  ;;  %v8278_v34 = vld [vmem:[%s8698_s20 + $0x30] sm:$0xff]  }
 0xa69   : > { %v6652_v39 = vadd.f32 %v6647_v44, %v6602_v20  ;;  %v8147_v22 = vpop.f32.mrb[99].mxu1 }
 0xa6a   : > { %v6694_v40 = vpop.f32.mrb[88].mxu0 }
 0xa6b   : > { %v6701_v8 = vadd.f32 %v6694_v40, %v6651_v7  ;;  %v8152_v14 = vpop.f32.mrb[89].mxu0 }
 0xa6c   : > { %v6697_v1 = vpop.f32.mrb[90].mxu0 }
 0xa6d   : > { %v6702_v45 = vadd.f32 %v6697_v1, %v6652_v39  ;;  %v8153_v60 = vpop.f32.mrb[91].mxu0  ;;  %v6877_v1 = vsub.s32 5, %v10949_v3 }
 0xa6e   : > { %v6744_v28 = vpop.f32.mrb[100].mxu1 }
 0xa6f   : > { %v6751_v23 = vadd.f32 %v6744_v28, %v6701_v8  ;;  %v8158_v15 = vpop.f32.mrb[101].mxu1  ;;  %v6869_v8 = vsub.s32 4, %v10949_v3 }
 0xa70   : > { %v6747_v53 = vpop.f32.mrb[102].mxu1 }
 0xa71   : > { %v6752_v35 = vadd.f32 %v6747_v53, %v6702_v45  ;;  %v8159_v47 = vpop.f32.mrb[103].mxu1  ;;  %v6870_v14 = vrot.slane %v10535_v21, %v6869_v8  ;;  %v6878_v53 = vrot.slane %v10535_v21, %v6877_v1 }
 0xa76   : > { %v6794_v16 = vpop.f32.mrb[92].mxu0 }
 0xa77   : > { %v6801_v17 = vadd.f32 %v6794_v16, %v6751_v23  ;;  %v8164_v52 = vpop.f32.mrb[93].mxu0 }
 0xa78   : > { %v6797_v37 = vpop.f32.mrb[94].mxu0 }
 0xa79   : > { %v6805_v6 = vadd.f32 %v8460_v46, %v6801_v17  ;;  %v6802_v41 = vadd.f32 %v6797_v37, %v6752_v35  ;;  %v8165_v61 = vpop.f32.mrb[95].mxu0 }
 0xa7b   : > { %v10725_v57 = vadd.f32 %v10538_v12, %v6805_v6  ;;  %v6806_v59 = vadd.f32 %v8461_v24, %v6802_v41  ;;  %v8267_v24 = vld [vmem:[%s8698_s20 + $0x48] sm:$0xff]  }
 0xa7d   : > { %v10728_v50 = vadd.f32 %v10538_v12, %v6806_v59  ;;  %v6821_v9 = vsel %vm390_vm1, %v10725_v57, 0.0  ;;  %v6842_v12 = vsel %vm390_vm1, %v6836_v48, 0.0  ;;  %v8269_v48 = vld [vmem:[%s8698_s20 + $0x50] sm:$0xff]  }
 0xa7e   : > { %6822 = vadd.xlane.f32.xlu0 %v6821_v9  ;;  %v8268_v9 = vld [vmem:[%s8698_s20 + $0x8] sm:$0xff]  }
 0xa7f   : > { %v6824_v31 = vsel %vm390_vm1, %v10728_v50, 0.0 }
 0xa80   : > { %6825 = vadd.xlane.f32.xlu1 %v6824_v31 }
 0xa82   : > { %6840 = vadd.xlane.f32.xlu0 %v6839_v10 }
 0xa84   : > { %6843 = vadd.xlane.f32.xlu1 %v6842_v12  ;;  %v8270_v12 = vld [vmem:[%s8698_s20 + $0x10] sm:$0xff]  }
 0xb0b   : > { %v6823_v49 = vpop.xlane.xlu0 %6822 }
 0xb0c   : > { %v6829_v51 = vmul.f32 0.015625, %v6823_v49  ;;  %v8279_v49 = vld [vmem:[%s8698_s20 + $0x78] sm:$0xff]  }
 0xb0d   : > { %v6826_v2 = vpop.xlane.xlu1 %6825 }
 0xb0e   : > { %v6833_v38 = vsub.f32 %v10725_v57, %v6829_v51  ;;  %v6830_v27 = vmul.f32 0.015625, %v6826_v2  ;;  %v8280_v51 = vld [vmem:[%s8698_s20 + $0x38] sm:$0xff]   ;;  %v6895_v2 = vsub.s32 6, %v10949_v3 }
 0xb0f   : > { %v6841_v13 = vpop.xlane.xlu0 %6840 }
 0xb10   : > { %v6834_v33 = vsub.f32 %v10728_v50, %v6830_v27  ;;  %v6851_v20 = vmul.f32 0.015625, %v6841_v13  ;;  %v6837_v58 = vmul.f32 %v6833_v38, %v6833_v38  ;;  %v8462_v27 = vld [vmem:[%s8678_s8 + $0x8] sm:$0xff] }
 0xb11   : > { %v6844_v30 = vpop.xlane.xlu1 %6843  ;;  %v10776_v13 = vrot.slane %v8462_v27, %v6895_v2 }
 0xb12   : > { %v6855_v7 = vadd.f32 1e-05, %v6851_v20  ;;  %v6852_v32 = vmul.f32 0.015625, %v6844_v30  ;;  %v6845_v44 = vsel %vm390_vm1, %v6837_v58, 0.0  ;;  %v6838_v39 = vmul.f32 %v6834_v33, %v6834_v33 }
 0xb13   : > { %6846 = vadd.xlane.f32.xlu0 %v6845_v44 }
 0xb14   : > { %8417 = vrsqrt.f32 %v6855_v7  ;;  %v6856_v22 = vadd.f32 1e-05, %v6852_v32  ;;  %v6848_v40 = vsel %vm390_vm1, %v6838_v39, 0.0 }
 0xb15   : > { %6849 = vadd.xlane.f32.xlu1 %v6848_v40 }
 0xb16   : > { %8419 = vrsqrt.f32 %v6856_v22 }
 0xb1e   : > { %v8418_v45 = vpop.eup %8417 }
 0xb1f   : > { %v6863_v60 = vmul.f32 %v8418_v45, %v6831_v0 }
 0xb20   : > { %v8420_v28 = vpop.eup %8419 }
 0xb21   : > { %v6871_v23 = vmul.f32 %v6870_v14, %v6863_v60  ;;  %v6864_v15 = vmul.f32 %v8420_v28, %v6832_v63  ;;  %v8265_v63 = vld [vmem:[%s8698_s20 + $0x40] sm:$0xff]  }
 0xb22   : > { %7850 = vmatprep.subr.bf16.mxu0 %v8265_v63 }
 0xb23   : > { %v6872_v35 = vmul.f32 %v6870_v14, %v6864_v15  ;;  %v6879_v47 = vadd.f32 %v6878_v53, %v6871_v23 }
 0xb25   : > { %v6880_v19 = vadd.f32 %v6878_v53, %v6872_v35 }
 0xb27   : > { %v6883_v62 = vpack.c.bf16 %v6880_v19, %v6879_v47 }
 0xb29   : > { %7727 = vmatmul.mubr.msk.bf16.vlgmr.msra.gmra.mrb[104].mxu1 %vm390_vm1, %v6883_v62 }
 0xb2a   : > { %6989 = vmatprep.mubr.bf16.mxu1 %v10952_v5  ;;  %v8266_v5 = vld [vmem:[%s8698_s20] sm:$0xff]  }
 0xb2b   : > { %7851 = vmatpush3.bf16.msra.mxu0 %v8266_v5 }
 0xb2c   : > { %7852 = vmatprep.subr.bf16.mxu0 %v8267_v24 }
 0xb2f   : > { %7853 = vmatpush3.bf16.msra.mxu0 %v8268_v9 }
 0xb30   : > { %7854 = vmatprep.subr.bf16.mxu0 %v8269_v48 }
 0xb33   : > { %7855 = vmatpush3.bf16.msra.mxu0 %v8270_v12 }
 0xb34   : > { %7856 = vmatprep.subr.bf16.mxu0 %v8271_v42 }
 0xb37   : > { %7857 = vmatpush3.bf16.msra.mxu0 %v8272_v55 }
 0xb38   : > { %7858 = vmatprep.subr.bf16.mxu0 %v8273_v43 }
 0xb3b   : > { %7859 = vmatpush3.bf16.msra.mxu0 %v8274_v18 }
 0xb3c   : > { %7860 = vmatprep.subr.bf16.mxu0 %v8275_v29 }
 0xb3f   : > { %7861 = vmatpush3.bf16.msra.mxu0 %v8276_v54 }
 0xb40   : > { %7862 = vmatprep.subr.bf16.mxu0 %v8277_v26 }
 0xb43   : > { %7863 = vmatpush3.bf16.msra.mxu0 %v8278_v34 }
 0xb44   : > { %7864 = vmatprep.subr.bf16.mxu0 %v8279_v49 }
 0xb47   : > { %7865 = vmatpush3.bf16.msra.mxu0 %v8280_v51 }
 0xba0   : > { %v6847_v56 = vpop.xlane.xlu0 %6846 }
 0xba1   : > { %v6853_v16 = vmul.f32 0.015625, %v6847_v56 }
 0xba2   : > { %v6850_v11 = vpop.xlane.xlu1 %6849 }
 0xba3   : > { %v6857_v17 = vadd.f32 1e-05, %v6853_v16  ;;  %v6854_v52 = vmul.f32 0.015625, %v6850_v11 }
 0xba5   : > { %8421 = vrsqrt.f32 %v6857_v17  ;;  %v6858_v37 = vadd.f32 1e-05, %v6854_v52 }
 0xba7   : > { %8423 = vrsqrt.f32 %v6858_v37 }
 0xbaf   : > { %v8422_v0 = vpop.eup %8421 }
 0xbb0   : > { %v6865_v46 = vmul.f32 %v8422_v0, %v6833_v38  ;;  %v10773_v38 = vrot.slane %v10535_v21, %v6895_v2 }
 0xbb1   : > { %v8424_v6 = vpop.eup %8423 }
 0xbb2   : > { %v6866_v41 = vmul.f32 %v8424_v6, %v6834_v33  ;;  %v6873_v61 = vmul.f32 %v6870_v14, %v6865_v46 }
 0xbb4   : > { %v6874_v59 = vmul.f32 %v6870_v14, %v6866_v41  ;;  %v6881_v36 = vadd.f32 %v6878_v53, %v6873_v61 }
 0xbb6   : > { %v6882_v31 = vadd.f32 %v6878_v53, %v6874_v59 }
 0xbb8   : > { %v6884_v10 = vpack.c.bf16 %v6882_v31, %v6881_v36 }
 0xbba   : > { %7728 = vmatmul.mubr.msk.bf16.gmra.mrb[108].mxu1 %vm390_vm1, %v6884_v10 }
 0xbfc   : > { %v6981_v33 = vpop.f32.mrb[104].mxu1 }
 0xbfd   : > { %v10779_v20 = vadd.f32 %v6981_v33, %v10773_v38  ;;  %v6983_v58 = vpop.f32.mrb[105].mxu1 }
 0xbfe   : > { %v10782_v30 = vadd.f32 %v6983_v58, %v10776_v13  ;;  %v6985_v7 = vpop.f32.mrb[106].mxu1 }
 0xbff   : > { %v10785_v32 = vmul.f32 0.70710677, %v10779_v20  ;;  %v10788_v44 = vadd.f32 %v6985_v7, %v10773_v38  ;;  %v6987_v21 = vpop.f32.mrb[107].mxu1 }
 0xc00   : > { %v10791_v39 = vmul.f32 0.70710677, %v10782_v30  ;;  %v10798_v8 = vadd.f32 %v6987_v21, %v10776_v13 }
 0xc01   : > { %v7032_v22 = vand.u32 2147483647, %v10785_v32  ;;  %v10795_v40 = vmul.f32 0.70710677, %v10788_v44  ;;  %vm7016_vm8 = vcmp.ge.f32.partialorder %v10785_v32, 0.0 }
 0xc02   : > { %v7033_v14 = vand.u32 2147483647, %v10791_v39  ;;  %v10803_v23 = vmul.f32 0.70710677, %v10798_v8  ;;  %vm7017_vm9 = vcmp.ge.f32.partialorder %v10791_v39, 0.0 }
 0xc03   : > { %v7040_v1 = vmul.f32 0.3275911, %v7032_v22  ;;  %v7034_v60 = vand.u32 2147483647, %v10795_v40  ;;  %v7144_v56 = vsub.f32 0.0, %v7032_v22  ;;  %vm7018_vm10 = vcmp.ge.f32.partialorder %v10795_v40, 0.0 }
 0xc04   : > { %v7041_v45 = vmul.f32 0.3275911, %v7033_v14  ;;  %v7035_v35 = vand.u32 2147483647, %v10803_v23  ;;  %v7145_v16 = vsub.f32 0.0, %v7033_v14  ;;  %vm7019_vm11 = vcmp.ge.f32.partialorder %v10803_v23, 0.0 }
 0xc05   : > { %v7048_v28 = vadd.f32 1.0, %v7040_v1  ;;  %v7042_v53 = vmul.f32 0.3275911, %v7034_v60  ;;  %v7152_v17 = vmul.f32 %v7144_v56, %v7032_v22  ;;  %v7146_v52 = vsub.f32 0.0, %v7034_v60 }
 0xc06   : > { %v7049_v15 = vadd.f32 1.0, %v7041_v45  ;;  %v7043_v19 = vmul.f32 0.3275911, %v7035_v35  ;;  %v7153_v46 = vmul.f32 %v7145_v16, %v7033_v14  ;;  %v7147_v41 = vsub.f32 0.0, %v7035_v35 }
 0xc07   : > { %8425 = vrcp.f32 %v7048_v28  ;;  %v7050_v47 = vadd.f32 1.0, %v7042_v53  ;;  %v7160_v5 = vmul.f32 1.442695, %v7152_v17  ;;  %v7154_v59 = vmul.f32 %v7146_v52, %v7034_v60 }
 0xc08   : > { %8427 = vrcp.f32 %v7049_v15  ;;  %v7051_v62 = vadd.f32 1.0, %v7043_v19  ;;  %v7162_v36 = vmul.f32 1.442695, %v7153_v46  ;;  %v7155_v12 = vmul.f32 %v7147_v41, %v7035_v35 }
 0xc09   : > { %8429 = vrcp.f32 %v7050_v47  ;;  %v7164_v29 = vmul.f32 1.442695, %v7154_v59  ;;  %v7003_v23 = vmul.f32 0.5, %v10798_v8 }
 0xc0a   : > { %8431 = vrcp.f32 %v7051_v62  ;;  %v7166_v51 = vmul.f32 1.442695, %v7155_v12 }
 0xc0b   : > { %8433 = vpow2.f32 %v7160_v5 }
 0xc0c   : > { %8435 = vpow2.f32 %v7162_v36 }
 0xc0d   : > { %8437 = vpow2.f32 %v7164_v29 }
 0xc0e   : > { %8439 = vpow2.f32 %v7166_v51 }
 0xc11   : > { %v8426_v11 = vpop.eup %8425 }
 0xc12   : > { %v8428_v37 = vpop.eup %8427  ;;  %v7072_v0 = vmul.f32 1.0614054, %v8426_v11 }
 0xc13   : > { %v7073_v6 = vmul.f32 1.0614054, %v8428_v37  ;;  %v8430_v63 = vpop.eup %8429 }
 0xc14   : > { %v7080_v61 = vadd.f32 -1.4531521, %v7072_v0  ;;  %v7074_v31 = vmul.f32 1.0614054, %v8430_v63  ;;  %v8432_v48 = vpop.eup %8431 }
 0xc15   : > { %v7081_v24 = vadd.f32 -1.4531521, %v7073_v6  ;;  %v7075_v43 = vmul.f32 1.0614054, %v8432_v48  ;;  %v8434_v47 = vpop.eup %8433 }
 0xc16   : > { %v7088_v9 = vmul.f32 %v8426_v11, %v7080_v61  ;;  %v7082_v55 = vadd.f32 -1.4531521, %v7074_v31  ;;  %v8436_v62 = vpop.eup %8435  ;;  %v8574_v61 = vmov -1.0  }
 0xc17   : > { %v7089_v10 = vmul.f32 %v8428_v37, %v7081_v24  ;;  %v7083_v34 = vadd.f32 -1.4531521, %v7075_v43  ;;  %v8438_v41 = vpop.eup %8437  ;;  %v7027_v43 = vsel %vm7019_vm11, 1.0, %v8574_v61 }
 0xc18   : > { %v7096_v42 = vadd.f32 1.4214138, %v7088_v9  ;;  %v7090_v26 = vmul.f32 %v8430_v63, %v7082_v55  ;;  %v8440_v32 = vpop.eup %8439  ;;  %v7025_v9 = vsel %vm7017_vm9, 1.0, %v8574_v61  ;;  %v7000_v55 = vmul.f32 0.5, %v10779_v20 }
 0xc19   : > { %v7097_v18 = vadd.f32 1.4214138, %v7089_v10  ;;  %v7091_v33 = vmul.f32 %v8432_v48, %v7083_v34 }
 0xc1a   : > { %v7104_v54 = vmul.f32 %v8426_v11, %v7096_v42  ;;  %v7098_v27 = vadd.f32 1.4214138, %v7090_v26 }
 0xc1b   : > { %v7105_v49 = vmul.f32 %v8428_v37, %v7097_v18  ;;  %v7099_v22 = vadd.f32 1.4214138, %v7091_v33 }
 0xc1c   : > { %v7112_v2 = vadd.f32 -0.28449672, %v7104_v54  ;;  %v7106_v21 = vmul.f32 %v8430_v63, %v7098_v27  ;;  %v7001_v54 = vmul.f32 0.5, %v10782_v30 }
 0xc1d   : > { %v7113_v58 = vadd.f32 -0.28449672, %v7105_v49  ;;  %v7107_v60 = vmul.f32 %v8432_v48, %v7099_v22 }
 0xc1e   : > { %v7120_v7 = vmul.f32 %v8426_v11, %v7112_v2  ;;  %v7114_v45 = vadd.f32 -0.28449672, %v7106_v21 }
 0xc1f   : > { %v7121_v14 = vmul.f32 %v8428_v37, %v7113_v58  ;;  %v7115_v35 = vadd.f32 -0.28449672, %v7107_v60 }
 0xc20   : > { %v7128_v1 = vadd.f32 0.2548296, %v7120_v7  ;;  %v7122_v53 = vmul.f32 %v8430_v63, %v7114_v45 }
 0xc21   : > { %v7129_v28 = vadd.f32 0.2548296, %v7121_v14  ;;  %v7123_v17 = vmul.f32 %v8432_v48, %v7115_v35 }
 0xc22   : > { %v7136_v15 = vmul.f32 %v8426_v11, %v7128_v1  ;;  %v7130_v16 = vadd.f32 0.2548296, %v7122_v53  ;;  %v7024_v11 = vsel %vm7016_vm8, 1.0, %v8574_v61 }
 0xc23   : > { %v7137_v19 = vmul.f32 %v8428_v37, %v7129_v28  ;;  %v7131_v6 = vadd.f32 0.2548296, %v7123_v17 }
 0xc24   : > { %v7176_v56 = vmul.f32 %v8434_v47, %v7136_v15  ;;  %v7138_v46 = vmul.f32 %v8430_v63, %v7130_v16  ;;  %v7026_v63 = vsel %vm7018_vm10, 1.0, %v8574_v61 }
 0xc25   : > { %v7177_v52 = vmul.f32 %v8436_v62, %v7137_v19  ;;  %v7139_v59 = vmul.f32 %v8432_v48, %v7131_v6  ;;  %v7002_v48 = vmul.f32 0.5, %v10788_v44 }
 0xc26   : > { %v7184_v0 = vsub.f32 1.0, %v7176_v56  ;;  %v7178_v37 = vmul.f32 %v8438_v41, %v7138_v46 }
 0xc27   : > { %v7185_v5 = vsub.f32 1.0, %v7177_v52  ;;  %v7179_v39 = vmul.f32 %v8440_v32, %v7139_v59 }
 0xc28   : > { %v7192_v24 = vmul.f32 %v7184_v0, %v7024_v11  ;;  %v7186_v31 = vsub.f32 1.0, %v7178_v37 }
 0xc29   : > { %v7193_v36 = vmul.f32 %v7185_v5, %v7025_v9  ;;  %v7187_v42 = vsub.f32 1.0, %v7179_v39 }
 0xc2a   : > { %v7200_v10 = vadd.f32 1.0, %v7192_v24  ;;  %v7194_v12 = vmul.f32 %v7186_v31, %v7026_v63 }
 0xc2b   : > { %v7201_v40 = vadd.f32 1.0, %v7193_v36  ;;  %v7195_v29 = vmul.f32 %v7187_v42, %v7027_v43 }
 0xc2c   : > { %v7202_v18 = vadd.f32 1.0, %v7194_v12  ;;  %v7208_v26 = vmul.f32 %v7200_v10, %v7000_v55 }
 0xc2d   : > { %v7203_v49 = vadd.f32 1.0, %v7195_v29  ;;  %v7209_v51 = vmul.f32 %v7201_v40, %v7001_v54 }
 0xc2e   : > { %v7210_v34 = vmul.f32 %v7202_v18, %v7002_v48 }
 0xc2f   : > { %v7211_v27 = vmul.f32 %v7203_v49, %v7003_v23 }
 0xc30   : > { %v7216_v2 = vpack.c.bf16 %v7210_v34, %v7208_v26 }
 0xc31   : > { %v7217_v33 = vpack.c.bf16 %v7211_v27, %v7209_v51 }
 0xc33   : > { %7384 = vmatprep.mubr.bf16.mxu0 %v7217_v33 }
 0xc34   : > { %7385 = vmatmul.mubr.bf16.vlgmr.msra.gmra.mrb[96].mxu0 %v7216_v2 }
 0xc8d   : > { %v6991_v20 = vpop.f32.mrb[108].mxu1 }
 0xc8e   : > { %v10819_v58 = vadd.f32 %v6991_v20, %v10773_v38  ;;  %v6993_v44 = vpop.f32.mrb[109].mxu1 }
 0xc8f   : > { %v10822_v7 = vadd.f32 %v6993_v44, %v10776_v13  ;;  %v6995_v30 = vpop.f32.mrb[110].mxu1 }
 0xc90   : > { %v10825_v21 = vmul.f32 0.70710677, %v10819_v58  ;;  %v10828_v8 = vadd.f32 %v6995_v30, %v10773_v38  ;;  %v6997_v22 = vpop.f32.mrb[111].mxu1 }
 0xc91   : > { %v10831_v14 = vmul.f32 0.70710677, %v10822_v7  ;;  %v10838_v60 = vadd.f32 %v6997_v22, %v10776_v13 }
 0xc92   : > { %v7036_v1 = vand.u32 2147483647, %v10825_v21  ;;  %v10835_v45 = vmul.f32 0.70710677, %v10828_v8  ;;  %vm7020_vm12 = vcmp.ge.f32.partialorder %v10825_v21, 0.0 }
 0xc93   : > { %v7037_v28 = vand.u32 2147483647, %v10831_v14  ;;  %v10843_v47 = vmul.f32 0.70710677, %v10838_v60  ;;  %vm7021_vm13 = vcmp.ge.f32.partialorder %v10831_v14, 0.0 }
 0xc94   : > { %v7044_v15 = vmul.f32 0.3275911, %v7036_v1  ;;  %v7038_v35 = vand.u32 2147483647, %v10835_v45  ;;  %v7148_v52 = vsub.f32 0.0, %v7036_v1  ;;  %vm7022_vm14 = vcmp.ge.f32.partialorder %v10835_v45, 0.0 }
 0xc95   : > { %v7045_v53 = vmul.f32 0.3275911, %v7037_v28  ;;  %v7039_v56 = vand.u32 2147483647, %v10843_v47  ;;  %v7149_v0 = vsub.f32 0.0, %v7037_v28  ;;  %v7029_v21 = vsel %vm7021_vm13, 1.0, %v8574_v61 }
 0xc96   : > { %v7052_v38 = vadd.f32 1.0, %v7044_v15  ;;  %v7046_v62 = vmul.f32 0.3275911, %v7038_v35  ;;  %v7156_v6 = vmul.f32 %v7148_v52, %v7036_v1  ;;  %v7150_v41 = vsub.f32 0.0, %v7038_v35 }
 0xc97   : > { %v7053_v19 = vadd.f32 1.0, %v7045_v53  ;;  %v7047_v17 = vmul.f32 0.3275911, %v7039_v56  ;;  %v7157_v24 = vmul.f32 %v7149_v0, %v7037_v28  ;;  %v7151_v59 = vsub.f32 0.0, %v7039_v56 }
 0xc98   : > { %8441 = vrcp.f32 %v7052_v38  ;;  %v7054_v16 = vadd.f32 1.0, %v7046_v62  ;;  %v7168_v36 = vmul.f32 1.442695, %v7156_v6  ;;  %v7158_v39 = vmul.f32 %v7150_v41, %v7038_v35 }
 0xc99   : > { %8443 = vrcp.f32 %v7053_v19  ;;  %v7055_v13 = vadd.f32 1.0, %v7047_v17  ;;  %v7170_v10 = vmul.f32 1.442695, %v7157_v24  ;;  %v7159_v43 = vmul.f32 %v7151_v59, %v7039_v56 }
 0xc9a   : > { %8445 = vrcp.f32 %v7054_v16  ;;  %v7172_v54 = vmul.f32 1.442695, %v7158_v39  ;;  %v7028_v59 = vsel %vm7020_vm12, 1.0, %v8574_v61  ;;  %vm7023_vm15 = vcmp.ge.f32.partialorder %v10843_v47, 0.0 }
 0xc9b   : > { %8447 = vrcp.f32 %v7055_v13  ;;  %v7174_v51 = vmul.f32 1.442695, %v7159_v43  ;;  %v7030_v14 = vsel %vm7022_vm14, 1.0, %v8574_v61  ;;  %v7004_v43 = vmul.f32 0.5, %v10819_v58 }
 0xc9c   : > { %8449 = vpow2.f32 %v7168_v36 }
 0xc9d   : > { %8451 = vpow2.f32 %v7170_v10 }
 0xc9e   : > { %8453 = vpow2.f32 %v7172_v54 }
 0xc9f   : > { %8455 = vpow2.f32 %v7174_v51 }
 0xca2   : > { %v8442_v46 = vpop.eup %8441 }
 0xca3   : > { %v8444_v11 = vpop.eup %8443  ;;  %v7076_v5 = vmul.f32 1.0614054, %v8442_v46 }
 0xca4   : > { %v7077_v37 = vmul.f32 1.0614054, %v8444_v11  ;;  %v8446_v9 = vpop.eup %8445 }
 0xca5   : > { %v7084_v32 = vadd.f32 -1.4531521, %v7076_v5  ;;  %v7078_v12 = vmul.f32 1.0614054, %v8446_v9  ;;  %v8448_v42 = vpop.eup %8447 }
 0xca6   : > { %v7085_v31 = vadd.f32 -1.4531521, %v7077_v37  ;;  %v7079_v18 = vmul.f32 1.0614054, %v8448_v42  ;;  %v8450_v56 = vpop.eup %8449 }
 0xca7   : > { %v7092_v63 = vmul.f32 %v8442_v46, %v7084_v32  ;;  %v7086_v48 = vadd.f32 -1.4531521, %v7078_v12  ;;  %v8452_v17 = vpop.eup %8451 }
 0xca8   : > { %v7093_v55 = vmul.f32 %v8444_v11, %v7085_v31  ;;  %v7087_v23 = vadd.f32 -1.4531521, %v7079_v18  ;;  %v8454_v37 = vpop.eup %8453 }
 0xca9   : > { %v7100_v40 = vadd.f32 1.4214138, %v7092_v63  ;;  %v7094_v34 = vmul.f32 %v8446_v9, %v7086_v48  ;;  %v8456_v31 = vpop.eup %8455 }
 0xcaa   : > { %v7101_v29 = vadd.f32 1.4214138, %v7093_v55  ;;  %v7095_v33 = vmul.f32 %v8448_v42, %v7087_v23 }
 0xcab   : > { %v7108_v26 = vmul.f32 %v8442_v46, %v7100_v40  ;;  %v7102_v27 = vadd.f32 1.4214138, %v7094_v34  ;;  %v7031_v40 = vsel %vm7023_vm15, 1.0, %v8574_v61  ;;  %v7254_v61 = vsub.s32 7, %v10949_v3 }
 0xcac   : > { %v7109_v49 = vmul.f32 %v8444_v11, %v7101_v29  ;;  %v7103_v22 = vadd.f32 1.4214138, %v7095_v33  ;;  %v7005_v29 = vmul.f32 0.5, %v10822_v7 }
 0xcad   : > { %v7116_v2 = vadd.f32 -0.28449672, %v7108_v26  ;;  %v7110_v30 = vmul.f32 %v8446_v9, %v7102_v27  ;;  %v7007_v26 = vmul.f32 0.5, %v10838_v60 }
 0xcae   : > { %v7117_v20 = vadd.f32 -0.28449672, %v7109_v49  ;;  %v7111_v53 = vmul.f32 %v8448_v42, %v7103_v22 }
 0xcaf   : > { %v7124_v44 = vmul.f32 %v8442_v46, %v7116_v2  ;;  %v7118_v15 = vadd.f32 -0.28449672, %v7110_v30 }
 0xcb0   : > { %v7125_v1 = vmul.f32 %v8444_v11, %v7117_v20  ;;  %v7119_v62 = vadd.f32 -0.28449672, %v7111_v53 }
 0xcb1   : > { %v7132_v28 = vadd.f32 0.2548296, %v7124_v44  ;;  %v7126_v19 = vmul.f32 %v8446_v9, %v7118_v15 }
 0xcb2   : > { %v7133_v35 = vadd.f32 0.2548296, %v7125_v1  ;;  %v7127_v0 = vmul.f32 %v8448_v42, %v7119_v62 }
 0xcb3   : > { %v7140_v38 = vmul.f32 %v8442_v46, %v7132_v28  ;;  %v7134_v52 = vadd.f32 0.2548296, %v7126_v19 }
 0xcb4   : > { %v7141_v16 = vmul.f32 %v8444_v11, %v7133_v35  ;;  %v7135_v24 = vadd.f32 0.2548296, %v7127_v0 }
 0xcb5   : > { %v7180_v13 = vmul.f32 %v8450_v56, %v7140_v38  ;;  %v7142_v5 = vmul.f32 %v8446_v9, %v7134_v52 }
 0xcb6   : > { %v7181_v6 = vmul.f32 %v8452_v17, %v7141_v16  ;;  %v7143_v36 = vmul.f32 %v8448_v42, %v7135_v24  ;;  %v7006_v42 = vmul.f32 0.5, %v10828_v8  ;;  %v8463_v8 = vld [vmem:[%s8678_s8] sm:$0xff]  ;;  %s8575_s8 = smov [#allocation5]  }
 0xcb7   : > { %v7188_v41 = vsub.f32 1.0, %v7180_v13  ;;  %v7182_v11 = vmul.f32 %v8454_v37, %v7142_v5  ;;  %v7255_v27 = vrot.slane %v8463_v8, %v7254_v61  ;;  %s7419_s12 = sshll.u32 %s8575_s8, 4  ;;  %s7420_s12 = int_to_ptr.vmem [resolvable:$true] %s7419_s12 }
 0xcb8   : > { %v7189_v46 = vsub.f32 1.0, %v7181_v6  ;;  %v7183_v10 = vmul.f32 %v8456_v31, %v7143_v36  ;;  %s8492_s18 = scalar_lea.vmem %s7420_s12, 512  ;;  %p8499_p12 = scmp.lt.s32.totalorder %s7420_s12, %s7420_s12 }
 0xcb9   : > { %v7196_v32 = vmul.f32 %v7188_v41, %v7028_v59  ;;  %v7190_v63 = vsub.f32 1.0, %v7182_v11  ;;  %p8493_p8 = scmp.ne.s32.totalorder %s7420_s12, %s8492_s18  ;;  %p8500_p13 = scmp.lt.s32.totalorder %s8492_s18, %s8492_s18 }
 0xcba   : > { %v7197_v39 = vmul.f32 %v7189_v46, %v7029_v21  ;;  %v7191_v55 = vsub.f32 1.0, %v7183_v10 }
 0xcbb   : > { %v7204_v9 = vadd.f32 1.0, %v7196_v32  ;;  %v7198_v12 = vmul.f32 %v7190_v63, %v7030_v14  ;;  %p8494_p10 = pnand %p8493_p8, %p10867_p6  ;;  %p8501_p0 = por %p8500_p13, %p8499_p12 }
 0xcbc   : > { %v7205_v45 = vadd.f32 1.0, %v7197_v39  ;;  %v7199_v18 = vmul.f32 %v7191_v55, %v7031_v40 }
 0xcbd   : > { %v7206_v48 = vadd.f32 1.0, %v7198_v12  ;;  %v7212_v54 = vmul.f32 %v7204_v9, %v7004_v43  ;;  %p8495_p11 = pneg %p8494_p10 }
 0xcbe   : > { %v7207_v34 = vadd.f32 1.0, %v7199_v18  ;;  %v7213_v23 = vmul.f32 %v7205_v45, %v7005_v29 }
 0xcbf   : > { %v7214_v47 = vmul.f32 %v7206_v48, %v7006_v42  ;;  %p8502_p1 = pnand %p8501_p0, %p8495_p11 }
 0xcc0   : > { %v7215_v49 = vmul.f32 %v7207_v34, %v7007_v26 }
 0xcc1   : > { %v7218_v51 = vpack.c.bf16 %v7214_v47, %v7212_v54 }
 0xcc2   : > { %v7219_v2 = vpack.c.bf16 %v7215_v49, %v7213_v23 }
 0xcc4   : > { %7392 = vmatprep.mubr.bf16.mxu0 %v7219_v2 }
 0xcc5   : > { %7393 = vmatmul.mubr.bf16.gmra.mrb[100].mxu0 %v7218_v51 }
 0xd07   : > { %v7866_v58 = vpop.f32.mrb[96].mxu0 }
 0xd08   : > { %v7867_v33 = vpop.f32.mrb[97].mxu0 }
 0xd09   : > { %v7868_v20 = vadd.f32 %v7867_v33, %v7866_v58  ;;  %v7869_v44 = vpop.f32.mrb[98].mxu0 }
 0xd0a   : > { %v7870_v7 = vpop.f32.mrb[99].mxu0 }
 0xd0b   : > { %v7387_v30 = vadd.f32 %v7868_v20, %v7255_v27  ;;  %v7871_v22 = vadd.f32 %v7870_v7, %v7869_v44 }
 0xd0d   : > { %v7401_v60 = vadd.f32 %v7387_v30, %v10593_v4  ;;  %v7390_v1 = vadd.f32 %v7871_v22, %v7255_v27 }
 0xd0f   : > { %7405 = vst.msk [vmem:[#allocation5] sm:$0xff] %vm390_vm1, %v7401_v60  ;;  %v7402_v28 = vadd.f32 %v7390_v1, %v10545_v25 }
 0xd11   : > { %7406 = vst.msk [vmem:[#allocation5 + $0x8] sm:$0xff] %vm390_vm1, %v7402_v28 }
 0xd98   : > { %v7872_v3 = vpop.f32.mrb[100].mxu0 }
 0xd99   : > { %v7873_v15 = vpop.f32.mrb[101].mxu0 }
 0xd9a   : > { %v7874_v53 = vadd.f32 %v7873_v15, %v7872_v3  ;;  %v7875_v35 = vpop.f32.mrb[102].mxu0 }
 0xd9b   : > { %v7876_v38 = vpop.f32.mrb[103].mxu0 }
 0xd9c   : > { %v7395_v19 = vadd.f32 %v7874_v53, %v7255_v27  ;;  %v7877_v62 = vadd.f32 %v7876_v38, %v7875_v35 }
 0xd9e   : > { %v7403_v56 = vadd.f32 %v7395_v19, %v10725_v57  ;;  %v7398_v4 = vadd.f32 %v7877_v62, %v7255_v27 }
 0xda0   : > { %7407 = vst.msk [vmem:[#allocation5 + $0x10] sm:$0xff] %vm390_vm1, %v7403_v56  ;;  %v7404_v25 = vadd.f32 %v7398_v4, %v10728_v50 }
 0xda2   : > { %7408 = vst.msk [vmem:[#allocation5 + $0x18] sm:$0xff] %vm390_vm1, %v7404_v25 }
 0xda3   : > { %8505 = shalt.err (!%p8502_p1)
}
 0xda4   : > { %s8506_s21 = scalar_lea.hbm %s10912_s6, 512 }
 0xda5   : > { %p8507_p2 = scmp.ne.s32.totalorder %s10912_s6, %s8506_s21  ;;  %p8512_p9 = scmp.lt.u32.totalorder %s8506_s21, %s10912_s6 }
 0xda7   : > { %p8508_p5 = pnand %p8507_p2, %p10867_p6 }
 0xda9   : > { %p8509_p7 = pneg %p8508_p5 }
 0xdab   : > { %p8514_p3 = pnand %p8512_p9, %p8509_p7 }
 0xdad   : > { %8517 = shalt.err (!%p8514_p3)
}
 0xdae   : > { %s8576_s29 = smov 128  }
 0xdaf   : > { %8179 = dma.vmem_to_hbm [thread:$0]  (%p10867_p6), %s7420_s12, 512, %s10912_s6, [#allocation4], %s8576_s29, %s8576_s29, %s8565_s27  }
 0xdb0   : > { %8535 = dma.done.wait (%p10867_p6), [#allocation4], 512  }
 0xdb1   : > { %8537 = vsyncadd (%p10867_p6), [#allocation4], 4294966784 }
 0xdb2 PF: > { %s18_s23 = sadd.s32 1, %s8548_s23   ;;  %s10954_s21 = smov %s8544_s22 }
 0xdb3   : > { %p15_p4 = scmp.ge.s32.totalorder %s18_s23, 4   ;;  %s10955_s22 = smov %s10957_s25 }
 0xdb5   :  { %17 = sbr.rel (!%p15_p4) target bundleno = 3 (0x3), region = 101 }
 0xdbc   :  { %7435 = vsyncpa [#allocation3], 1 }
 0xdbd   :  { %7437 = vsyncpa [#allocation3 + $0x1], 1 }
 0xdbe   :  { %7438 = vsyncpa [#allocation4], 1 }
 0xdbf   :  { %7440 = vsyncpa [#allocation4 + $0x1], 1 }

</bundles_post_ra>
